<compile_context>
chip_gen: v6e
topology: v6e:2x2x1
jax: 0.10.0
libtpu: 0.0.40
codegen_flags: <defaults>
</compile_context>

<pallas_src>
import functools
import math

import jax
import jax.numpy as jnp
from jax.experimental import pallas as pl
from jax.experimental.pallas import tpu as pltpu

LN_EPS = 1e-5
NEG_INF = -1e30          # finite causal-mask sentinel
NC_PAD = 128             # sentiment logits padded to 128 lanes -> unmasked lane-dense store


# ----------------------------- in-kernel helpers ------------------------------------

def _layernorm(x, w, b):
    mu = jnp.mean(x, axis=-1, keepdims=True)
    var = jnp.mean((x - mu) ** 2, axis=-1, keepdims=True)
    return (x - mu) * jax.lax.rsqrt(var + LN_EPS) * w + b


def _erf(x):
    # Abramowitz & Stegun 7.1.26, |err| <= 1.5e-7 (keeps torch.nn.GELU() erf semantics);
    # the divide goes to the EUP via approx reciprocal, exp is EUP, rest is a short VPU poly.
    a1, a2, a3, a4, a5 = 0.254829592, -0.284496736, 1.421413741, -1.453152027, 1.061405429
    p = 0.3275911
    sgn = jnp.where(x >= 0.0, 1.0, -1.0)
    ax = jnp.abs(x)
    t = pl.reciprocal(1.0 + p * ax, approx=True)
    poly = ((((a5 * t + a4) * t + a3) * t + a2) * t + a1) * t
    return sgn * (1.0 - poly * jnp.exp(-ax * ax))


def _gelu(x):
    return 0.5 * x * (1.0 + _erf(x * 0.7071067811865476))


def _softmax_lastdim(x):
    m = jnp.max(x, axis=-1, keepdims=True)
    e = jnp.exp(x - m)
    return e * pl.reciprocal(jnp.sum(e, axis=-1, keepdims=True), approx=True)


# ----------------------------- the fused GPT kernel ---------------------------------

def gpt_kernel(x_ref,
               ln1w_ref, ln1b_ref, wqkv_ref, bqkv_ref, wo_ref, bo_ref,
               ln2w_ref, ln2b_ref, wfc_ref, bfc_ref, wpr_ref, bpr_ref,
               lnfw_ref, lnfb_ref, pool_ref,
               w1_ref, b1_ref, g1w_ref, g1b_ref,
               w2_ref, b2_ref, g2w_ref, g2b_ref,
               w3_ref, b3_ref,
               o_ref, resid_ref, *, n_head):
    l = pl.program_id(0)
    l_last = pl.num_programs(0) - 1
    B, T, C = x_ref.shape
    BT = B * T
    H = n_head
    hd = C // H

    # residual stream lives in VMEM scratch across all layer steps
    @pl.when(l == 0)
    def _():
        resid_ref[...] = x_ref[...].reshape(BT, C)

    x = resid_ref[...]                                                    # (BT, C) f32

    # ---- attention sub-block: x + c_proj(attn(ln_1(x))) ----
    h = _layernorm(x, ln1w_ref[0], ln1b_ref[0]).astype(jnp.bfloat16)
    # ONE fused, lane-dense QKV matmul (scale 1/sqrt(hd) pre-folded into the Q columns)
    qkv = jnp.dot(h, wqkv_ref[0], preferred_element_type=jnp.float32) + bqkv_ref[0]   # (BT, 3C)

    def split_heads(base):
        # (BT, 3C) -> (H*B, T, hd): static lane slices + leading-dim reshape + leading concat
        parts = [qkv[:, base + hh * hd: base + (hh + 1) * hd].reshape(B, T, hd)
                 for hh in range(H)]
        return jnp.concatenate(parts, axis=0).astype(jnp.bfloat16)        # n = hh*B + b

    q = split_heads(0)
    k = split_heads(C)
    v = split_heads(2 * C)

    att = jnp.einsum('nqd,nkd->nqk', q, k,
                     preferred_element_type=jnp.float32)                  # (H*B, T, T) f32
    row = jax.lax.broadcasted_iota(jnp.int32, (T, T), 0)
    col = jax.lax.broadcasted_iota(jnp.int32, (T, T), 1)
    att = jnp.where((row >= col)[None], att, NEG_INF)
    p = _softmax_lastdim(att).astype(jnp.bfloat16)
    y = jnp.einsum('nqk,nkd->nqd', p, v,
                   preferred_element_type=jnp.float32)                    # (H*B, T, hd) f32

    # merge heads back to (BT, C) and do ONE out-projection matmul
    rows = [jnp.concatenate([y[hh * B + b] for hh in range(H)], axis=1)   # (T, C)
            for b in range(B)]
    y_merged = jnp.concatenate(rows, axis=0).astype(jnp.bfloat16)         # (BT, C) bf16
    x = x + jnp.dot(y_merged, wo_ref[0], preferred_element_type=jnp.float32) + bo_ref[0]

    # ---- MLP sub-block: x + c_proj(gelu(c_fc(ln_2(x)))) ----
    h2 = _layernorm(x, ln2w_ref[0], ln2b_ref[0]).astype(jnp.bfloat16)
    fc = jnp.dot(h2, wfc_ref[0], preferred_element_type=jnp.float32) + bfc_ref[0]     # (BT, 4C)
    g = _gelu(fc).astype(jnp.bfloat16)
    x = x + jnp.dot(g, wpr_ref[0], preferred_element_type=jnp.float32) + bpr_ref[0]

    resid_ref[...] = x

    # ---- final LN + attention pooling + sentiment head (last layer only) ----
    @pl.when(l == l_last)
    def _():
        xn = _layernorm(x, lnfw_ref[...], lnfb_ref[...])                  # (BT, C) f32
        xn3 = xn.reshape(B, T, C)
        # pooling weights (T, 1) already softmaxed outside; VPU multiply + reduce over T
        pooled = jnp.sum(xn3 * pool_ref[...], axis=1)                     # (B, C) f32

        h1 = jnp.dot(pooled.astype(jnp.bfloat16), w1_ref[...],
                     preferred_element_type=jnp.float32) + b1_ref[...]
        h1 = _gelu(_layernorm(h1, g1w_ref[...], g1b_ref[...]))
        hh2 = jnp.dot(h1.astype(jnp.bfloat16), w2_ref[...],
                      preferred_element_type=jnp.float32) + b2_ref[...]
        hh2 = _gelu(_layernorm(hh2, g2w_ref[...], g2b_ref[...]))
        # w3/b3 zero-padded to NC_PAD lanes -> lane-dense store, real logits are cols [:nc]
        o_ref[...] = jnp.dot(hh2.astype(jnp.bfloat16), w3_ref[...],
                             preferred_element_type=jnp.float32) + b3_ref[...]


def gpt_pallas_forward(prepped, x_emb, pool_w, num_classes, n_head):
    B, T, C = x_emb.shape
    L = prepped['wqkv'].shape[0]

    layer_keys = ('ln1w', 'ln1b', 'wqkv', 'bqkv', 'wo', 'bo',
                  'ln2w', 'ln2b', 'wfc', 'bfc', 'wpr', 'bpr')
    layer_ws = [prepped[k] for k in layer_keys]                 # each (L, r, c)
    head_ws = ([prepped['lnfw'], prepped['lnfb'], pool_w,
                prepped['w1'], prepped['b1'], prepped['g1w'], prepped['g1b'],
                prepped['w2'], prepped['b2'], prepped['g2w'], prepped['g2b'],
                prepped['w3p'], prepped['b3p']])                # each 2-D

    def layer_spec(arr):
        return pl.BlockSpec((1,) + arr.shape[1:], lambda l: (l, 0, 0))

    def const_spec(arr):
        return pl.BlockSpec(arr.shape, lambda l, _nd=arr.ndim: (0,) * _nd)

    in_specs = ([pl.BlockSpec((B, T, C), lambda l: (0, 0, 0))]
                + [layer_spec(w) for w in layer_ws]
                + [const_spec(w) for w in head_ws])

    kernel = functools.partial(gpt_kernel, n_head=n_head)

    out = pl.pallas_call(
        kernel,
        out_shape=jax.ShapeDtypeStruct((B, NC_PAD), jnp.float32),
        grid_spec=pltpu.PrefetchScalarGridSpec(
            num_scalar_prefetch=0,
            grid=(L,),
            in_specs=in_specs,
            out_specs=pl.BlockSpec((B, NC_PAD), lambda l: (0, 0)),
            scratch_shapes=[pltpu.VMEM((B * T, C), jnp.float32)],
        ),
        compiler_params=pltpu.CompilerParams(
            dimension_semantics=("arbitrary",),          # layers are sequential
            vmem_limit_bytes=48 * 1024 * 1024,           # safe on v7x (64 MiB physical)
        ),
    )(x_emb, *layer_ws, *head_ws)
    return out[:, :num_classes]


# ----------------------------- one-time weight prep (hoisted) -----------------------

def prepare_params(params, cfg):
    """Stack per-layer weights along a layer axis, fold the attention scale into the Q columns,
    cast matmul weights to bf16, pad the logit projection.  Called ONCE, not per forward."""
    C, H = cfg['n_embd'], cfg['n_head']
    hd = C // H
    scale = 1.0 / math.sqrt(hd)
    blocks = params['blocks']

    def stack(key):
        return jnp.stack([b[key] for b in blocks])

    wqkv = stack('w_qkv')                                           # (L, C, 3C)
    bqkv = stack('b_qkv')                                           # (L, 1, 3C)
    col_scale = jnp.concatenate([jnp.full((C,), scale, jnp.float32),
                                 jnp.ones((2 * C,), jnp.float32)])
    wqkv = wqkv * col_scale[None, None, :]
    bqkv = bqkv * col_scale[None, None, :]

    prepped = dict(
        ln1w=stack('ln1_w'), ln1b=stack('ln1_b'),
        wqkv=wqkv.astype(jnp.bfloat16), bqkv=bqkv,
        wo=stack('w_o').astype(jnp.bfloat16), bo=stack('b_o'),
        ln2w=stack('ln2_w'), ln2b=stack('ln2_b'),
        wfc=stack('w_fc').astype(jnp.bfloat16), bfc=stack('b_fc'),
        wpr=stack('w_pr').astype(jnp.bfloat16), bpr=stack('b_pr'),
        lnfw=params['lnf_w'], lnfb=params['lnf_b'],
        w1=params['w1'].astype(jnp.bfloat16), b1=params['b1'],
        g1w=params['g1w'], g1b=params['g1b'],
        w2=params['w2'].astype(jnp.bfloat16), b2=params['b2'],
        g2w=params['g2w'], g2b=params['g2b'],
        wte=params['wte'], wpe=params['wpe'], satt=params['satt'],
    )
    nc = params['w3'].shape[1]
    w3p = jnp.zeros((params['w3'].shape[0], NC_PAD), jnp.float32).at[:, :nc].set(params['w3'])
    b3p = jnp.zeros((1, NC_PAD), jnp.float32).at[:, :nc].set(params['b3'])
    prepped['w3p'] = w3p.astype(jnp.bfloat16)
    prepped['b3p'] = b3p
    return prepped


# ----------------------------- parameter init & forward -----------------------------

def init_params(key, cfg):
    C, V, BS = cfg['n_embd'], cfg['vocab_size'], cfg['block_size']
    keys = iter(jax.random.split(key, 256))

    def nrm(shape, std=0.02):
        return (std * jax.random.normal(next(keys), shape)).astype(jnp.float32)

    proj_std = 0.02 / math.sqrt(2 * cfg['n_layer'])
    p = {
        'wte': nrm((V, C)),          # tied with lm_head (lm_head unused in this forward)
        'wpe': nrm((BS, C)),
        'lnf_w': jnp.ones((1, C), jnp.float32),
        'lnf_b': jnp.zeros((1, C), jnp.float32),
    }
    blocks = []
    for _ in range(cfg['n_layer']):
        blocks.append(dict(
            ln1_w=jnp.ones((1, C), jnp.float32), ln1_b=jnp.zeros((1, C), jnp.float32),
            w_qkv=nrm((C, 3 * C)), b_qkv=jnp.zeros((1, 3 * C), jnp.float32),
            w_o=nrm((C, C), proj_std), b_o=jnp.zeros((1, C), jnp.float32),
            ln2_w=jnp.ones((1, C), jnp.float32), ln2_b=jnp.zeros((1, C), jnp.float32),
            w_fc=nrm((C, 4 * C)), b_fc=jnp.zeros((1, 4 * C), jnp.float32),
            w_pr=nrm((4 * C, C), proj_std), b_pr=jnp.zeros((1, C), jnp.float32),
        ))
    p['blocks'] = blocks

    # sentiment_attention: zeros, last min(100, block_size) entries = 1/n_focus
    n_focus = min(100, BS)
    p['satt'] = jnp.zeros((1, BS), jnp.float32).at[:, -n_focus:].set(1.0 / n_focus)

    # sentiment head: Linear(C,512) LN GELU Linear(512,256) LN GELU Linear(256,num_classes)
    p['w1'] = nrm((C, 512)); p['b1'] = jnp.zeros((1, 512), jnp.float32)
    p['g1w'] = jnp.ones((1, 512), jnp.float32); p['g1b'] = jnp.zeros((1, 512), jnp.float32)
    p['w2'] = nrm((512, 256)); p['b2'] = jnp.zeros((1, 256), jnp.float32)
    p['g2w'] = jnp.ones((1, 256), jnp.float32); p['g2b'] = jnp.zeros((1, 256), jnp.float32)
    p['w3'] = nrm((256, cfg['num_classes']))
    p['b3'] = jnp.zeros((1, cfg['num_classes']), jnp.float32)
    return p


def gpt_forward(prepped, idx, cfg):
    B, T = idx.shape
    assert T <= cfg['block_size']
    # embedding gather + positional add (plain-JAX glue); dropout(p=0.0) is identity
    tok_emb = jnp.take(prepped['wte'], idx, axis=0)          # (B, T, C)
    pos_emb = prepped['wpe'][:T][None, :, :]                 # (1, T, C)
    x = tok_emb + pos_emb
    # pooling weights: softmax(sentiment_attention[:, :T]), tiny (1, T) -> (T, 1)
    pool_w = jax.nn.softmax(prepped['satt'][:, :T], axis=-1).reshape(T, 1)
    return gpt_pallas_forward(prepped, x, pool_w, cfg['num_classes'], cfg['n_head'])


# ----------------------------- main --------------------------------------------------

if __name__ == "__main__":
    cfg = dict(block_size=8, vocab_size=64, n_layer=2, n_head=4, n_embd=32,
               num_classes=3, dropout=0.0, sentiment_dropout=0.0, bias=True)

    key = jax.random.PRNGKey(0)
    pkey, dkey = jax.random.split(key)
    params = init_params(pkey, cfg)
    prepped = prepare_params(params, cfg)     # one-time weight re-layout (hoisted out of forward)

    B, T = 2, 8
    idx = jax.random.randint(dkey, (B, T), 0, cfg['vocab_size'], dtype=jnp.int32)

    forward = jax.jit(functools.partial(gpt_forward, cfg=cfg))
    logits = forward(prepped, idx)
    logits = jax.block_until_ready(logits)
    assert logits.shape == (B, cfg['num_classes'])
    print("KERNEL_OK")
</pallas_src>

<mosaic_0001>
module attributes {stable_mosaic.version = 11 : i64} {
  func.func @gpt_kernel(%arg0: i32, %arg1: memref<2x8x32xf32, #tpu.memory_space<vmem>>, %arg2: memref<1x1x32xf32, #tpu.memory_space<vmem>>, %arg3: memref<1x1x32xf32, #tpu.memory_space<vmem>>, %arg4: memref<1x32x96xbf16, #tpu.memory_space<vmem>>, %arg5: memref<1x1x96xf32, #tpu.memory_space<vmem>>, %arg6: memref<1x32x32xbf16, #tpu.memory_space<vmem>>, %arg7: memref<1x1x32xf32, #tpu.memory_space<vmem>>, %arg8: memref<1x1x32xf32, #tpu.memory_space<vmem>>, %arg9: memref<1x1x32xf32, #tpu.memory_space<vmem>>, %arg10: memref<1x32x128xbf16, #tpu.memory_space<vmem>>, %arg11: memref<1x1x128xf32, #tpu.memory_space<vmem>>, %arg12: memref<1x128x32xbf16, #tpu.memory_space<vmem>>, %arg13: memref<1x1x32xf32, #tpu.memory_space<vmem>>, %arg14: memref<1x32xf32, #tpu.memory_space<vmem>>, %arg15: memref<1x32xf32, #tpu.memory_space<vmem>>, %arg16: memref<8x1xf32, #tpu.memory_space<vmem>>, %arg17: memref<32x512xbf16, #tpu.memory_space<vmem>>, %arg18: memref<1x512xf32, #tpu.memory_space<vmem>>, %arg19: memref<1x512xf32, #tpu.memory_space<vmem>>, %arg20: memref<1x512xf32, #tpu.memory_space<vmem>>, %arg21: memref<512x256xbf16, #tpu.memory_space<vmem>>, %arg22: memref<1x256xf32, #tpu.memory_space<vmem>>, %arg23: memref<1x256xf32, #tpu.memory_space<vmem>>, %arg24: memref<1x256xf32, #tpu.memory_space<vmem>>, %arg25: memref<256x128xbf16, #tpu.memory_space<vmem>>, %arg26: memref<1x128xf32, #tpu.memory_space<vmem>>, %arg27: memref<2x128xf32, #tpu.memory_space<vmem>>, %arg28: memref<16x32xf32, #tpu.memory_space<vmem>>) attributes {dimension_semantics = [#tpu.dimension_semantics<arbitrary>], iteration_bounds = array<i64: 2>, scalar_prefetch = 0 : i64, scratch_operands = 1 : i64, tpu.core_type = #tpu.core_type<tc>, window_params = [{pipeline_mode = #tpu.pipeline_mode<synchronous>, transform_indices = @transform_0, window_bounds = array<i64: 2, 8, 32>}, {transform_indices = @transform_1, window_bounds = array<i64: 1, 1, 32>}, {transform_indices = @transform_2, window_bounds = array<i64: 1, 1, 32>}, {transform_indices = @transform_3, window_bounds = array<i64: 1, 32, 96>}, {transform_indices = @transform_4, window_bounds = array<i64: 1, 1, 96>}, {transform_indices = @transform_5, window_bounds = array<i64: 1, 32, 32>}, {transform_indices = @transform_6, window_bounds = array<i64: 1, 1, 32>}, {transform_indices = @transform_7, window_bounds = array<i64: 1, 1, 32>}, {transform_indices = @transform_8, window_bounds = array<i64: 1, 1, 32>}, {transform_indices = @transform_9, window_bounds = array<i64: 1, 32, 128>}, {transform_indices = @transform_10, window_bounds = array<i64: 1, 1, 128>}, {transform_indices = @transform_11, window_bounds = array<i64: 1, 128, 32>}, {transform_indices = @transform_12, window_bounds = array<i64: 1, 1, 32>}, {pipeline_mode = #tpu.pipeline_mode<synchronous>, transform_indices = @transform_13, window_bounds = array<i64: 1, 32>}, {pipeline_mode = #tpu.pipeline_mode<synchronous>, transform_indices = @transform_14, window_bounds = array<i64: 1, 32>}, {pipeline_mode = #tpu.pipeline_mode<synchronous>, transform_indices = @transform_15, window_bounds = array<i64: 8, 1>}, {pipeline_mode = #tpu.pipeline_mode<synchronous>, transform_indices = @transform_16, window_bounds = array<i64: 32, 512>}, {pipeline_mode = #tpu.pipeline_mode<synchronous>, transform_indices = @transform_17, window_bounds = array<i64: 1, 512>}, {pipeline_mode = #tpu.pipeline_mode<synchronous>, transform_indices = @transform_18, window_bounds = array<i64: 1, 512>}, {pipeline_mode = #tpu.pipeline_mode<synchronous>, transform_indices = @transform_19, window_bounds = array<i64: 1, 512>}, {pipeline_mode = #tpu.pipeline_mode<synchronous>, transform_indices = @transform_20, window_bounds = array<i64: 512, 256>}, {pipeline_mode = #tpu.pipeline_mode<synchronous>, transform_indices = @transform_21, window_bounds = array<i64: 1, 256>}, {pipeline_mode = #tpu.pipeline_mode<synchronous>, transform_indices = @transform_22, window_bounds = array<i64: 1, 256>}, {pipeline_mode = #tpu.pipeline_mode<synchronous>, transform_indices = @transform_23, window_bounds = array<i64: 1, 256>}, {pipeline_mode = #tpu.pipeline_mode<synchronous>, transform_indices = @transform_24, window_bounds = array<i64: 256, 128>}, {pipeline_mode = #tpu.pipeline_mode<synchronous>, transform_indices = @transform_25, window_bounds = array<i64: 1, 128>}, {pipeline_mode = #tpu.pipeline_mode<synchronous>, transform_indices = @transform_26, window_bounds = array<i64: 2, 128>}]} {
    %c0_i32 = arith.constant 0 : i32
    %0 = arith.cmpi eq, %arg0, %c0_i32 : i32
    %1 = arith.extui %0 : i1 to i32
    %c0_i32_0 = arith.constant 0 : i32
    %2 = arith.cmpi ne, %1, %c0_i32_0 : i32
    scf.if %2 {
      %c0_74 = arith.constant 0 : index
      %c0_75 = arith.constant 0 : index
      %c0_76 = arith.constant 0 : index
      %204 = vector.load %arg1[%c0_74, %c0_75, %c0_76] : memref<2x8x32xf32, #tpu.memory_space<vmem>>, vector<2x8x32xf32>
      %205 = vector.shape_cast %204 : vector<2x8x32xf32> to vector<16x32xf32>
      %c0_77 = arith.constant 0 : index
      %c0_78 = arith.constant 0 : index
      %206 = vector.load %arg28[%c0_77, %c0_78] : memref<16x32xf32, #tpu.memory_space<vmem>>, vector<16x32xf32>
      tpu.vector_store %arg28[%c0_77, %c0_78], %205 {strides = array<i32>} : memref<16x32xf32, #tpu.memory_space<vmem>>, vector<16x32xf32>,
    } else {
    }
    %c0 = arith.constant 0 : index
    %c0_1 = arith.constant 0 : index
    %3 = vector.load %arg28[%c0, %c0_1] : memref<16x32xf32, #tpu.memory_space<vmem>>, vector<16x32xf32>
    %c0_2 = arith.constant 0 : index
    %c0_3 = arith.constant 0 : index
    %c0_4 = arith.constant 0 : index
    %4 = vector.load %arg2[%c0_2, %c0_3, %c0_4] : memref<1x1x32xf32, #tpu.memory_space<vmem>>, vector<1x1x32xf32>
    %5 = vector.shape_cast %4 : vector<1x1x32xf32> to vector<1x32xf32>
    %c0_5 = arith.constant 0 : index
    %c0_6 = arith.constant 0 : index
    %c0_7 = arith.constant 0 : index
    %6 = vector.load %arg3[%c0_5, %c0_6, %c0_7] : memref<1x1x32xf32, #tpu.memory_space<vmem>>, vector<1x1x32xf32>
    %7 = vector.shape_cast %6 : vector<1x1x32xf32> to vector<1x32xf32>
    %cst = arith.constant dense<0.000000e+00> : vector<16xf32>
    %8 = vector.multi_reduction <add>, %3, %cst [1] : vector<16x32xf32> to vector<16xf32>
    %9 = vector.shape_cast %8 : vector<16xf32> to vector<16x1xf32>
    %cst_8 = arith.constant 3.200000e+01 : f32
    %10 = vector.broadcast %cst_8 : f32 to vector<16x1xf32>
    %11 = arith.divf %9, %10 : vector<16x1xf32>
    %12 = vector.broadcast %11 : vector<16x1xf32> to vector<16x32xf32>
    %13 = arith.subf %3, %12 : vector<16x32xf32>
    %14 = arith.mulf %13, %13 : vector<16x32xf32>
    %cst_9 = arith.constant dense<0.000000e+00> : vector<16xf32>
    %15 = vector.multi_reduction <add>, %14, %cst_9 [1] : vector<16x32xf32> to vector<16xf32>
    %16 = vector.shape_cast %15 : vector<16xf32> to vector<16x1xf32>
    %cst_10 = arith.constant 3.200000e+01 : f32
    %17 = vector.broadcast %cst_10 : f32 to vector<16x1xf32>
    %18 = arith.divf %16, %17 : vector<16x1xf32>
    %19 = vector.broadcast %11 : vector<16x1xf32> to vector<16x32xf32>
    %20 = arith.subf %3, %19 : vector<16x32xf32>
    %cst_11 = arith.constant 9.99999974E-6 : f32
    %21 = vector.broadcast %cst_11 : f32 to vector<16x1xf32>
    %22 = arith.addf %18, %21 : vector<16x1xf32>
    %23 = math.rsqrt %22 : vector<16x1xf32>
    %24 = vector.broadcast %23 : vector<16x1xf32> to vector<16x32xf32>
    %25 = arith.mulf %20, %24 : vector<16x32xf32>
    %26 = vector.broadcast %5 : vector<1x32xf32> to vector<16x32xf32>
    %27 = arith.mulf %25, %26 : vector<16x32xf32>
    %28 = vector.broadcast %7 : vector<1x32xf32> to vector<16x32xf32>
    %29 = arith.addf %27, %28 : vector<16x32xf32>
    %30 = arith.truncf %29 : vector<16x32xf32> to vector<16x32xbf16>
    %c0_12 = arith.constant 0 : index
    %c0_13 = arith.constant 0 : index
    %c0_14 = arith.constant 0 : index
    %31 = vector.load %arg4[%c0_12, %c0_13, %c0_14] : memref<1x32x96xbf16, #tpu.memory_space<vmem>>, vector<1x32x96xbf16>
    %32 = vector.shape_cast %31 : vector<1x32x96xbf16> to vector<32x96xbf16>
    %cst_15 = arith.constant dense<0.000000e+00> : vector<16x96xf32>
    %33 = tpu.matmul %30, %32, %cst_15 {dimension_numbers = #tpu.dot_dimension_numbers<[1], [0], [0], [1], [0, 0, 1, 1], [], []>} : vector<16x32xbf16>, vector<32x96xbf16>, vector<16x96xf32> -> vector<16x96xf32>
    %c0_16 = arith.constant 0 : index
    %c0_17 = arith.constant 0 : index
    %c0_18 = arith.constant 0 : index
    %34 = vector.load %arg5[%c0_16, %c0_17, %c0_18] : memref<1x1x96xf32, #tpu.memory_space<vmem>>, vector<1x1x96xf32>
    %35 = vector.shape_cast %34 : vector<1x1x96xf32> to vector<1x96xf32>
    %36 = vector.broadcast %35 : vector<1x96xf32> to vector<16x96xf32>
    %37 = arith.addf %33, %36 : vector<16x96xf32>
    %38 = vector.extract_strided_slice %37 {offsets = [0, 0], sizes = [16, 8], strides = [1, 1]} : vector<16x96xf32> to vector<16x8xf32>
    %39 = vector.shape_cast %38 : vector<16x8xf32> to vector<2x8x8xf32>
    %40 = vector.extract_strided_slice %37 {offsets = [0, 8], sizes = [16, 8], strides = [1, 1]} : vector<16x96xf32> to vector<16x8xf32>
    %41 = vector.shape_cast %40 : vector<16x8xf32> to vector<2x8x8xf32>
    %42 = vector.extract_strided_slice %37 {offsets = [0, 16], sizes = [16, 8], strides = [1, 1]} : vector<16x96xf32> to vector<16x8xf32>
    %43 = vector.shape_cast %42 : vector<16x8xf32> to vector<2x8x8xf32>
    %44 = vector.extract_strided_slice %37 {offsets = [0, 24], sizes = [16, 8], strides = [1, 1]} : vector<16x96xf32> to vector<16x8xf32>
    %45 = vector.shape_cast %44 : vector<16x8xf32> to vector<2x8x8xf32>
    %46 = tpu.concatenate %39, %41, %43, %45 in 0 : vector<2x8x8xf32>, vector<2x8x8xf32>, vector<2x8x8xf32>, vector<2x8x8xf32> -> vector<8x8x8xf32>
    %47 = arith.truncf %46 : vector<8x8x8xf32> to vector<8x8x8xbf16>
    %48 = vector.extract_strided_slice %37 {offsets = [0, 32], sizes = [16, 8], strides = [1, 1]} : vector<16x96xf32> to vector<16x8xf32>
    %49 = vector.shape_cast %48 : vector<16x8xf32> to vector<2x8x8xf32>
    %50 = vector.extract_strided_slice %37 {offsets = [0, 40], sizes = [16, 8], strides = [1, 1]} : vector<16x96xf32> to vector<16x8xf32>
    %51 = vector.shape_cast %50 : vector<16x8xf32> to vector<2x8x8xf32>
    %52 = vector.extract_strided_slice %37 {offsets = [0, 48], sizes = [16, 8], strides = [1, 1]} : vector<16x96xf32> to vector<16x8xf32>
    %53 = vector.shape_cast %52 : vector<16x8xf32> to vector<2x8x8xf32>
    %54 = vector.extract_strided_slice %37 {offsets = [0, 56], sizes = [16, 8], strides = [1, 1]} : vector<16x96xf32> to vector<16x8xf32>
    %55 = vector.shape_cast %54 : vector<16x8xf32> to vector<2x8x8xf32>
    %56 = tpu.concatenate %49, %51, %53, %55 in 0 : vector<2x8x8xf32>, vector<2x8x8xf32>, vector<2x8x8xf32>, vector<2x8x8xf32> -> vector<8x8x8xf32>
    %57 = arith.truncf %56 : vector<8x8x8xf32> to vector<8x8x8xbf16>
    %58 = vector.extract_strided_slice %37 {offsets = [0, 64], sizes = [16, 8], strides = [1, 1]} : vector<16x96xf32> to vector<16x8xf32>
    %59 = vector.shape_cast %58 : vector<16x8xf32> to vector<2x8x8xf32>
    %60 = vector.extract_strided_slice %37 {offsets = [0, 72], sizes = [16, 8], strides = [1, 1]} : vector<16x96xf32> to vector<16x8xf32>
    %61 = vector.shape_cast %60 : vector<16x8xf32> to vector<2x8x8xf32>
    %62 = vector.extract_strided_slice %37 {offsets = [0, 80], sizes = [16, 8], strides = [1, 1]} : vector<16x96xf32> to vector<16x8xf32>
    %63 = vector.shape_cast %62 : vector<16x8xf32> to vector<2x8x8xf32>
    %64 = vector.extract_strided_slice %37 {offsets = [0, 88], sizes = [16, 8], strides = [1, 1]} : vector<16x96xf32> to vector<16x8xf32>
    %65 = vector.shape_cast %64 : vector<16x8xf32> to vector<2x8x8xf32>
    %66 = tpu.concatenate %59, %61, %63, %65 in 0 : vector<2x8x8xf32>, vector<2x8x8xf32>, vector<2x8x8xf32>, vector<2x8x8xf32> -> vector<8x8x8xf32>
    %67 = arith.truncf %66 : vector<8x8x8xf32> to vector<8x8x8xbf16>
    "tpu.trace_start"() <{level = 10 : i32, message = "nqd,nkd->nqk"}> : () -> ()
    %cst_19 = arith.constant dense<0.000000e+00> : vector<8x8x8xf32>
    %68 = tpu.matmul %47, %57, %cst_19 {dimension_numbers = #tpu.dot_dimension_numbers<[2], [2], [1], [1], [0, 0, 0, 1, 1, 1], [0], [0]>} : vector<8x8x8xbf16>, vector<8x8x8xbf16>, vector<8x8x8xf32> -> vector<8x8x8xf32>
    "tpu.trace_stop"() : () -> ()
    %69 = tpu.iota {dimensions = array<i32: 0>} : vector<8x8xi32>
    %70 = tpu.iota {dimensions = array<i32: 1>} : vector<8x8xi32>
    %71 = arith.cmpi sge, %69, %70 : vector<8x8xi32>
    %72 = vector.shape_cast %71 : vector<8x8xi1> to vector<1x8x8xi1>
    %cst_20 = arith.constant -1.000000e+30 : f32
    %73 = vector.shape_cast %72 : vector<1x8x8xi1> to vector<1x8x8xi1>
    %74 = vector.broadcast %73 : vector<1x8x8xi1> to vector<8x8x8xi1>
    %75 = vector.broadcast %cst_20 : f32 to vector<8x8x8xf32>
    %76 = arith.select %74, %68, %75 : vector<8x8x8xi1>, vector<8x8x8xf32>
    %cst_21 = arith.constant dense<0xFF800000> : vector<8x8xf32>
    %77 = vector.multi_reduction <maximumf>, %76, %cst_21 [2] : vector<8x8x8xf32> to vector<8x8xf32>
    %78 = vector.shape_cast %77 : vector<8x8xf32> to vector<8x8x1xf32>
    %79 = vector.broadcast %78 : vector<8x8x1xf32> to vector<8x8x8xf32>
    %80 = arith.subf %76, %79 : vector<8x8x8xf32>
    %81 = math.exp %80 : vector<8x8x8xf32>
    %cst_22 = arith.constant dense<0.000000e+00> : vector<8x8xf32>
    %82 = vector.multi_reduction <add>, %81, %cst_22 [2] : vector<8x8x8xf32> to vector<8x8xf32>
    %83 = vector.shape_cast %82 : vector<8x8xf32> to vector<8x8x1xf32>
    %84 = tpu.reciprocal %83 {approx = true} : vector<8x8x1xf32> -> vector<8x8x1xf32>
    %85 = vector.broadcast %84 : vector<8x8x1xf32> to vector<8x8x8xf32>
    %86 = arith.mulf %81, %85 : vector<8x8x8xf32>
    %87 = arith.truncf %86 : vector<8x8x8xf32> to vector<8x8x8xbf16>
    "tpu.trace_start"() <{level = 10 : i32, message = "nqk,nkd->nqd"}> : () -> ()
    %cst_23 = arith.constant dense<0.000000e+00> : vector<8x8x8xf32>
    %88 = tpu.matmul %87, %67, %cst_23 {dimension_numbers = #tpu.dot_dimension_numbers<[2], [1], [1], [2], [0, 0, 0, 1, 1, 2], [0], [0]>} : vector<8x8x8xbf16>, vector<8x8x8xbf16>, vector<8x8x8xf32> -> vector<8x8x8xf32>
    "tpu.trace_stop"() : () -> ()
    %89 = vector.extract_strided_slice %88 {offsets = [0, 0, 0], sizes = [1, 8, 8], strides = [1, 1, 1]} : vector<8x8x8xf32> to vector<1x8x8xf32>
    %90 = vector.shape_cast %89 : vector<1x8x8xf32> to vector<8x8xf32>
    %91 = vector.extract_strided_slice %88 {offsets = [2, 0, 0], sizes = [1, 8, 8], strides = [1, 1, 1]} : vector<8x8x8xf32> to vector<1x8x8xf32>
    %92 = vector.shape_cast %91 : vector<1x8x8xf32> to vector<8x8xf32>
    %93 = vector.extract_strided_slice %88 {offsets = [4, 0, 0], sizes = [1, 8, 8], strides = [1, 1, 1]} : vector<8x8x8xf32> to vector<1x8x8xf32>
    %94 = vector.shape_cast %93 : vector<1x8x8xf32> to vector<8x8xf32>
    %95 = vector.extract_strided_slice %88 {offsets = [6, 0, 0], sizes = [1, 8, 8], strides = [1, 1, 1]} : vector<8x8x8xf32> to vector<1x8x8xf32>
    %96 = vector.shape_cast %95 : vector<1x8x8xf32> to vector<8x8xf32>
    %97 = tpu.concatenate %90, %92, %94, %96 in 1 : vector<8x8xf32>, vector<8x8xf32>, vector<8x8xf32>, vector<8x8xf32> -> vector<8x32xf32>
    %98 = vector.extract_strided_slice %88 {offsets = [1, 0, 0], sizes = [1, 8, 8], strides = [1, 1, 1]} : vector<8x8x8xf32> to vector<1x8x8xf32>
    %99 = vector.shape_cast %98 : vector<1x8x8xf32> to vector<8x8xf32>
    %100 = vector.extract_strided_slice %88 {offsets = [3, 0, 0], sizes = [1, 8, 8], strides = [1, 1, 1]} : vector<8x8x8xf32> to vector<1x8x8xf32>
    %101 = vector.shape_cast %100 : vector<1x8x8xf32> to vector<8x8xf32>
    %102 = vector.extract_strided_slice %88 {offsets = [5, 0, 0], sizes = [1, 8, 8], strides = [1, 1, 1]} : vector<8x8x8xf32> to vector<1x8x8xf32>
    %103 = vector.shape_cast %102 : vector<1x8x8xf32> to vector<8x8xf32>
    %104 = vector.extract_strided_slice %88 {offsets = [7, 0, 0], sizes = [1, 8, 8], strides = [1, 1, 1]} : vector<8x8x8xf32> to vector<1x8x8xf32>
    %105 = vector.shape_cast %104 : vector<1x8x8xf32> to vector<8x8xf32>
    %106 = tpu.concatenate %99, %101, %103, %105 in 1 : vector<8x8xf32>, vector<8x8xf32>, vector<8x8xf32>, vector<8x8xf32> -> vector<8x32xf32>
    %107 = tpu.concatenate %97, %106 in 0 : vector<8x32xf32>, vector<8x32xf32> -> vector<16x32xf32>
    %108 = arith.truncf %107 : vector<16x32xf32> to vector<16x32xbf16>
    %c0_24 = arith.constant 0 : index
    %c0_25 = arith.constant 0 : index
    %c0_26 = arith.constant 0 : index
    %109 = vector.load %arg6[%c0_24, %c0_25, %c0_26] : memref<1x32x32xbf16, #tpu.memory_space<vmem>>, vector<1x32x32xbf16>
    %110 = vector.shape_cast %109 : vector<1x32x32xbf16> to vector<32x32xbf16>
    %cst_27 = arith.constant dense<0.000000e+00> : vector<16x32xf32>
    %111 = tpu.matmul %108, %110, %cst_27 {dimension_numbers = #tpu.dot_dimension_numbers<[1], [0], [0], [1], [0, 0, 1, 1], [], []>} : vector<16x32xbf16>, vector<32x32xbf16>, vector<16x32xf32> -> vector<16x32xf32>
    %112 = arith.addf %3, %111 : vector<16x32xf32>
    %c0_28 = arith.constant 0 : index
    %c0_29 = arith.constant 0 : index
    %c0_30 = arith.constant 0 : index
    %113 = vector.load %arg7[%c0_28, %c0_29, %c0_30] : memref<1x1x32xf32, #tpu.memory_space<vmem>>, vector<1x1x32xf32>
    %114 = vector.shape_cast %113 : vector<1x1x32xf32> to vector<1x32xf32>
    %115 = vector.broadcast %114 : vector<1x32xf32> to vector<16x32xf32>
    %116 = arith.addf %112, %115 : vector<16x32xf32>
    %c0_31 = arith.constant 0 : index
    %c0_32 = arith.constant 0 : index
    %c0_33 = arith.constant 0 : index
    %117 = vector.load %arg8[%c0_31, %c0_32, %c0_33] : memref<1x1x32xf32, #tpu.memory_space<vmem>>, vector<1x1x32xf32>
    %118 = vector.shape_cast %117 : vector<1x1x32xf32> to vector<1x32xf32>
    %c0_34 = arith.constant 0 : index
    %c0_35 = arith.constant 0 : index
    %c0_36 = arith.constant 0 : index
    %119 = vector.load %arg9[%c0_34, %c0_35, %c0_36] : memref<1x1x32xf32, #tpu.memory_space<vmem>>, vector<1x1x32xf32>
    %120 = vector.shape_cast %119 : vector<1x1x32xf32> to vector<1x32xf32>
    %cst_37 = arith.constant dense<0.000000e+00> : vector<16xf32>
    %121 = vector.multi_reduction <add>, %116, %cst_37 [1] : vector<16x32xf32> to vector<16xf32>
    %122 = vector.shape_cast %121 : vector<16xf32> to vector<16x1xf32>
    %cst_38 = arith.constant 3.200000e+01 : f32
    %123 = vector.broadcast %cst_38 : f32 to vector<16x1xf32>
    %124 = arith.divf %122, %123 : vector<16x1xf32>
    %125 = vector.broadcast %124 : vector<16x1xf32> to vector<16x32xf32>
    %126 = arith.subf %116, %125 : vector<16x32xf32>
    %127 = arith.mulf %126, %126 : vector<16x32xf32>
    %cst_39 = arith.constant dense<0.000000e+00> : vector<16xf32>
    %128 = vector.multi_reduction <add>, %127, %cst_39 [1] : vector<16x32xf32> to vector<16xf32>
    %129 = vector.shape_cast %128 : vector<16xf32> to vector<16x1xf32>
    %cst_40 = arith.constant 3.200000e+01 : f32
    %130 = vector.broadcast %cst_40 : f32 to vector<16x1xf32>
    %131 = arith.divf %129, %130 : vector<16x1xf32>
    %132 = vector.broadcast %124 : vector<16x1xf32> to vector<16x32xf32>
    %133 = arith.subf %116, %132 : vector<16x32xf32>
    %cst_41 = arith.constant 9.99999974E-6 : f32
    %134 = vector.broadcast %cst_41 : f32 to vector<16x1xf32>
    %135 = arith.addf %131, %134 : vector<16x1xf32>
    %136 = math.rsqrt %135 : vector<16x1xf32>
    %137 = vector.broadcast %136 : vector<16x1xf32> to vector<16x32xf32>
    %138 = arith.mulf %133, %137 : vector<16x32xf32>
    %139 = vector.broadcast %118 : vector<1x32xf32> to vector<16x32xf32>
    %140 = arith.mulf %138, %139 : vector<16x32xf32>
    %141 = vector.broadcast %120 : vector<1x32xf32> to vector<16x32xf32>
    %142 = arith.addf %140, %141 : vector<16x32xf32>
    %143 = arith.truncf %142 : vector<16x32xf32> to vector<16x32xbf16>
    %c0_42 = arith.constant 0 : index
    %c0_43 = arith.constant 0 : index
    %c0_44 = arith.constant 0 : index
    %144 = vector.load %arg10[%c0_42, %c0_43, %c0_44] : memref<1x32x128xbf16, #tpu.memory_space<vmem>>, vector<1x32x128xbf16>
    %145 = vector.shape_cast %144 : vector<1x32x128xbf16> to vector<32x128xbf16>
    %cst_45 = arith.constant dense<0.000000e+00> : vector<16x128xf32>
    %146 = tpu.matmul %143, %145, %cst_45 {dimension_numbers = #tpu.dot_dimension_numbers<[1], [0], [0], [1], [0, 0, 1, 1], [], []>} : vector<16x32xbf16>, vector<32x128xbf16>, vector<16x128xf32> -> vector<16x128xf32>
    %c0_46 = arith.constant 0 : index
    %c0_47 = arith.constant 0 : index
    %c0_48 = arith.constant 0 : index
    %147 = vector.load %arg11[%c0_46, %c0_47, %c0_48] : memref<1x1x128xf32, #tpu.memory_space<vmem>>, vector<1x1x128xf32>
    %148 = vector.shape_cast %147 : vector<1x1x128xf32> to vector<1x128xf32>
    %149 = vector.broadcast %148 : vector<1x128xf32> to vector<16x128xf32>
    %150 = arith.addf %146, %149 : vector<16x128xf32>
    %cst_49 = arith.constant 5.000000e-01 : f32
    %151 = vector.broadcast %cst_49 : f32 to vector<16x128xf32>
    %152 = arith.mulf %151, %150 : vector<16x128xf32>
    %cst_50 = arith.constant 0.707106769 : f32
    %153 = vector.broadcast %cst_50 : f32 to vector<16x128xf32>
    %154 = arith.mulf %150, %153 : vector<16x128xf32>
    %cst_51 = arith.constant 0.000000e+00 : f32
    %155 = vector.broadcast %cst_51 : f32 to vector<16x128xf32>
    %156 = arith.cmpf oge, %154, %155 : vector<16x128xf32>
    %cst_52 = arith.constant 1.000000e+00 : f32
    %cst_53 = arith.constant -1.000000e+00 : f32
    %157 = vector.broadcast %cst_52 : f32 to vector<16x128xf32>
    %158 = vector.broadcast %cst_53 : f32 to vector<16x128xf32>
    %159 = arith.select %156, %157, %158 : vector<16x128xi1>, vector<16x128xf32>
    %160 = math.absf %154 : vector<16x128xf32>
    %cst_54 = arith.constant 0.327591091 : f32
    %161 = vector.broadcast %cst_54 : f32 to vector<16x128xf32>
    %162 = arith.mulf %161, %160 : vector<16x128xf32>
    %cst_55 = arith.constant 1.000000e+00 : f32
    %163 = vector.broadcast %cst_55 : f32 to vector<16x128xf32>
    %164 = arith.addf %163, %162 : vector<16x128xf32>
    %165 = tpu.reciprocal %164 {approx = true} : vector<16x128xf32> -> vector<16x128xf32>
    %cst_56 = arith.constant 1.06140542 : f32
    %166 = vector.broadcast %cst_56 : f32 to vector<16x128xf32>
    %167 = arith.mulf %166, %165 : vector<16x128xf32>
    %cst_57 = arith.constant -1.45315206 : f32
    %168 = vector.broadcast %cst_57 : f32 to vector<16x128xf32>
    %169 = arith.addf %167, %168 : vector<16x128xf32>
    %170 = arith.mulf %169, %165 : vector<16x128xf32>
    %cst_58 = arith.constant 1.42141378 : f32
    %171 = vector.broadcast %cst_58 : f32 to vector<16x128xf32>
    %172 = arith.addf %170, %171 : vector<16x128xf32>
    %173 = arith.mulf %172, %165 : vector<16x128xf32>
    %cst_59 = arith.constant -0.284496725 : f32
    %174 = vector.broadcast %cst_59 : f32 to vector<16x128xf32>
    %175 = arith.addf %173, %174 : vector<16x128xf32>
    %176 = arith.mulf %175, %165 : vector<16x128xf32>
    %cst_60 = arith.constant 0.254829586 : f32
    %177 = vector.broadcast %cst_60 : f32 to vector<16x128xf32>
    %178 = arith.addf %176, %177 : vector<16x128xf32>
    %179 = arith.mulf %178, %165 : vector<16x128xf32>
    %cst_61 = arith.constant 0.000000e+00 : f32
    %180 = vector.broadcast %cst_61 : f32 to vector<16x128xf32>
    %181 = arith.subf %180, %160 : vector<16x128xf32>
    %182 = arith.mulf %181, %160 : vector<16x128xf32>
    %183 = math.exp %182 : vector<16x128xf32>
    %184 = arith.mulf %179, %183 : vector<16x128xf32>
    %cst_62 = arith.constant 1.000000e+00 : f32
    %185 = vector.broadcast %cst_62 : f32 to vector<16x128xf32>
    %186 = arith.subf %185, %184 : vector<16x128xf32>
    %187 = arith.mulf %159, %186 : vector<16x128xf32>
    %cst_63 = arith.constant 1.000000e+00 : f32
    %188 = vector.broadcast %cst_63 : f32 to vector<16x128xf32>
    %189 = arith.addf %188, %187 : vector<16x128xf32>
    %190 = arith.mulf %152, %189 : vector<16x128xf32>
    %191 = arith.truncf %190 : vector<16x128xf32> to vector<16x128xbf16>
    %c0_64 = arith.constant 0 : index
    %c0_65 = arith.constant 0 : index
    %c0_66 = arith.constant 0 : index
    %192 = vector.load %arg12[%c0_64, %c0_65, %c0_66] : memref<1x128x32xbf16, #tpu.memory_space<vmem>>, vector<1x128x32xbf16>
    %193 = vector.shape_cast %192 : vector<1x128x32xbf16> to vector<128x32xbf16>
    %cst_67 = arith.constant dense<0.000000e+00> : vector<16x32xf32>
    %194 = tpu.matmul %191, %193, %cst_67 {dimension_numbers = #tpu.dot_dimension_numbers<[1], [0], [0], [1], [0, 0, 1, 1], [], []>} : vector<16x128xbf16>, vector<128x32xbf16>, vector<16x32xf32> -> vector<16x32xf32>
    %195 = arith.addf %116, %194 : vector<16x32xf32>
    %c0_68 = arith.constant 0 : index
    %c0_69 = arith.constant 0 : index
    %c0_70 = arith.constant 0 : index
    %196 = vector.load %arg13[%c0_68, %c0_69, %c0_70] : memref<1x1x32xf32, #tpu.memory_space<vmem>>, vector<1x1x32xf32>
    %197 = vector.shape_cast %196 : vector<1x1x32xf32> to vector<1x32xf32>
    %198 = vector.broadcast %197 : vector<1x32xf32> to vector<16x32xf32>
    %199 = arith.addf %195, %198 : vector<16x32xf32>
    %c0_71 = arith.constant 0 : index
    %c0_72 = arith.constant 0 : index
    %200 = vector.load %arg28[%c0_71, %c0_72] : memref<16x32xf32, #tpu.memory_space<vmem>>, vector<16x32xf32>
    tpu.vector_store %arg28[%c0_71, %c0_72], %199 {strides = array<i32>} : memref<16x32xf32, #tpu.memory_space<vmem>>, vector<16x32xf32>,
    %c1_i32 = arith.constant 1 : i32
    %201 = arith.cmpi eq, %arg0, %c1_i32 : i32
    %202 = arith.extui %201 : i1 to i32
    %c0_i32_73 = arith.constant 0 : i32
    %203 = arith.cmpi ne, %202, %c0_i32_73 : i32
    scf.if %203 {
      %c0_74 = arith.constant 0 : index
      %c0_75 = arith.constant 0 : index
      %204 = vector.load %arg14[%c0_74, %c0_75] : memref<1x32xf32, #tpu.memory_space<vmem>>, vector<1x32xf32>
      %c0_76 = arith.constant 0 : index
      %c0_77 = arith.constant 0 : index
      %205 = vector.load %arg15[%c0_76, %c0_77] : memref<1x32xf32, #tpu.memory_space<vmem>>, vector<1x32xf32>
      %cst_78 = arith.constant dense<0.000000e+00> : vector<16xf32>
      %206 = vector.multi_reduction <add>, %199, %cst_78 [1] : vector<16x32xf32> to vector<16xf32>
      %207 = vector.shape_cast %206 : vector<16xf32> to vector<16x1xf32>
      %cst_79 = arith.constant 3.200000e+01 : f32
      %208 = vector.broadcast %cst_79 : f32 to vector<16x1xf32>
      %209 = arith.divf %207, %208 : vector<16x1xf32>
      %210 = vector.broadcast %209 : vector<16x1xf32> to vector<16x32xf32>
      %211 = arith.subf %199, %210 : vector<16x32xf32>
      %212 = arith.mulf %211, %211 : vector<16x32xf32>
      %cst_80 = arith.constant dense<0.000000e+00> : vector<16xf32>
      %213 = vector.multi_reduction <add>, %212, %cst_80 [1] : vector<16x32xf32> to vector<16xf32>
      %214 = vector.shape_cast %213 : vector<16xf32> to vector<16x1xf32>
      %cst_81 = arith.constant 3.200000e+01 : f32
      %215 = vector.broadcast %cst_81 : f32 to vector<16x1xf32>
      %216 = arith.divf %214, %215 : vector<16x1xf32>
      %217 = vector.broadcast %209 : vector<16x1xf32> to vector<16x32xf32>
      %218 = arith.subf %199, %217 : vector<16x32xf32>
      %cst_82 = arith.constant 9.99999974E-6 : f32
      %219 = vector.broadcast %cst_82 : f32 to vector<16x1xf32>
      %220 = arith.addf %216, %219 : vector<16x1xf32>
      %221 = math.rsqrt %220 : vector<16x1xf32>
      %222 = vector.broadcast %221 : vector<16x1xf32> to vector<16x32xf32>
      %223 = arith.mulf %218, %222 : vector<16x32xf32>
      %224 = vector.broadcast %204 : vector<1x32xf32> to vector<16x32xf32>
      %225 = arith.mulf %223, %224 : vector<16x32xf32>
      %226 = vector.broadcast %205 : vector<1x32xf32> to vector<16x32xf32>
      %227 = arith.addf %225, %226 : vector<16x32xf32>
      %228 = vector.shape_cast %227 : vector<16x32xf32> to vector<2x8x32xf32>
      %c0_83 = arith.constant 0 : index
      %c0_84 = arith.constant 0 : index
      %229 = vector.load %arg16[%c0_83, %c0_84] : memref<8x1xf32, #tpu.memory_space<vmem>>, vector<8x1xf32>
      %230 = vector.shape_cast %229 : vector<8x1xf32> to vector<1x8x1xf32>
      %231 = vector.broadcast %230 : vector<1x8x1xf32> to vector<2x8x32xf32>
      %232 = arith.mulf %228, %231 : vector<2x8x32xf32>
      %cst_85 = arith.constant dense<0.000000e+00> : vector<2x32xf32>
      %233 = vector.multi_reduction <add>, %232, %cst_85 [1] : vector<2x8x32xf32> to vector<2x32xf32>
      %234 = arith.truncf %233 : vector<2x32xf32> to vector<2x32xbf16>
      %c0_86 = arith.constant 0 : index
      %c0_87 = arith.constant 0 : index
      %235 = vector.load %arg17[%c0_86, %c0_87] : memref<32x512xbf16, #tpu.memory_space<vmem>>, vector<32x512xbf16>
      %cst_88 = arith.constant dense<0.000000e+00> : vector<2x512xf32>
      %236 = tpu.matmul %234, %235, %cst_88 {dimension_numbers = #tpu.dot_dimension_numbers<[1], [0], [0], [1], [0, 0, 1, 1], [], []>} : vector<2x32xbf16>, vector<32x512xbf16>, vector<2x512xf32> -> vector<2x512xf32>
      %c0_89 = arith.constant 0 : index
      %c0_90 = arith.constant 0 : index
      %237 = vector.load %arg18[%c0_89, %c0_90] : memref<1x512xf32, #tpu.memory_space<vmem>>, vector<1x512xf32>
      %238 = vector.broadcast %237 : vector<1x512xf32> to vector<2x512xf32>
      %239 = arith.addf %236, %238 : vector<2x512xf32>
      %c0_91 = arith.constant 0 : index
      %c0_92 = arith.constant 0 : index
      %240 = vector.load %arg19[%c0_91, %c0_92] : memref<1x512xf32, #tpu.memory_space<vmem>>, vector<1x512xf32>
      %c0_93 = arith.constant 0 : index
      %c0_94 = arith.constant 0 : index
      %241 = vector.load %arg20[%c0_93, %c0_94] : memref<1x512xf32, #tpu.memory_space<vmem>>, vector<1x512xf32>
      %cst_95 = arith.constant dense<0.000000e+00> : vector<2xf32>
      %242 = vector.multi_reduction <add>, %239, %cst_95 [1] : vector<2x512xf32> to vector<2xf32>
      %243 = vector.shape_cast %242 : vector<2xf32> to vector<2x1xf32>
      %cst_96 = arith.constant 5.120000e+02 : f32
      %244 = vector.broadcast %cst_96 : f32 to vector<2x1xf32>
      %245 = arith.divf %243, %244 : vector<2x1xf32>
      %246 = vector.broadcast %245 : vector<2x1xf32> to vector<2x512xf32>
      %247 = arith.subf %239, %246 : vector<2x512xf32>
      %248 = arith.mulf %247, %247 : vector<2x512xf32>
      %cst_97 = arith.constant dense<0.000000e+00> : vector<2xf32>
      %249 = vector.multi_reduction <add>, %248, %cst_97 [1] : vector<2x512xf32> to vector<2xf32>
      %250 = vector.shape_cast %249 : vector<2xf32> to vector<2x1xf32>
      %cst_98 = arith.constant 5.120000e+02 : f32
      %251 = vector.broadcast %cst_98 : f32 to vector<2x1xf32>
      %252 = arith.divf %250, %251 : vector<2x1xf32>
      %253 = vector.broadcast %245 : vector<2x1xf32> to vector<2x512xf32>
      %254 = arith.subf %239, %253 : vector<2x512xf32>
      %cst_99 = arith.constant 9.99999974E-6 : f32
      %255 = vector.broadcast %cst_99 : f32 to vector<2x1xf32>
      %256 = arith.addf %252, %255 : vector<2x1xf32>
      %257 = math.rsqrt %256 : vector<2x1xf32>
      %258 = vector.broadcast %257 : vector<2x1xf32> to vector<2x512xf32>
      %259 = arith.mulf %254, %258 : vector<2x512xf32>
      %260 = vector.broadcast %240 : vector<1x512xf32> to vector<2x512xf32>
      %261 = arith.mulf %259, %260 : vector<2x512xf32>
      %262 = vector.broadcast %241 : vector<1x512xf32> to vector<2x512xf32>
      %263 = arith.addf %261, %262 : vector<2x512xf32>
      %cst_100 = arith.constant 5.000000e-01 : f32
      %264 = vector.broadcast %cst_100 : f32 to vector<2x512xf32>
      %265 = arith.mulf %264, %263 : vector<2x512xf32>
      %cst_101 = arith.constant 0.707106769 : f32
      %266 = vector.broadcast %cst_101 : f32 to vector<2x512xf32>
      %267 = arith.mulf %263, %266 : vector<2x512xf32>
      %cst_102 = arith.constant 0.000000e+00 : f32
      %268 = vector.broadcast %cst_102 : f32 to vector<2x512xf32>
      %269 = arith.cmpf oge, %267, %268 : vector<2x512xf32>
      %cst_103 = arith.constant 1.000000e+00 : f32
      %cst_104 = arith.constant -1.000000e+00 : f32
      %270 = vector.broadcast %cst_103 : f32 to vector<2x512xf32>
      %271 = vector.broadcast %cst_104 : f32 to vector<2x512xf32>
      %272 = arith.select %269, %270, %271 : vector<2x512xi1>, vector<2x512xf32>
      %273 = math.absf %267 : vector<2x512xf32>
      %cst_105 = arith.constant 0.327591091 : f32
      %274 = vector.broadcast %cst_105 : f32 to vector<2x512xf32>
      %275 = arith.mulf %274, %273 : vector<2x512xf32>
      %cst_106 = arith.constant 1.000000e+00 : f32
      %276 = vector.broadcast %cst_106 : f32 to vector<2x512xf32>
      %277 = arith.addf %276, %275 : vector<2x512xf32>
      %278 = tpu.reciprocal %277 {approx = true} : vector<2x512xf32> -> vector<2x512xf32>
      %cst_107 = arith.constant 1.06140542 : f32
      %279 = vector.broadcast %cst_107 : f32 to vector<2x512xf32>
      %280 = arith.mulf %279, %278 : vector<2x512xf32>
      %cst_108 = arith.constant -1.45315206 : f32
      %281 = vector.broadcast %cst_108 : f32 to vector<2x512xf32>
      %282 = arith.addf %280, %281 : vector<2x512xf32>
      %283 = arith.mulf %282, %278 : vector<2x512xf32>
      %cst_109 = arith.constant 1.42141378 : f32
      %284 = vector.broadcast %cst_109 : f32 to vector<2x512xf32>
      %285 = arith.addf %283, %284 : vector<2x512xf32>
      %286 = arith.mulf %285, %278 : vector<2x512xf32>
      %cst_110 = arith.constant -0.284496725 : f32
      %287 = vector.broadcast %cst_110 : f32 to vector<2x512xf32>
      %288 = arith.addf %286, %287 : vector<2x512xf32>
      %289 = arith.mulf %288, %278 : vector<2x512xf32>
      %cst_111 = arith.constant 0.254829586 : f32
      %290 = vector.broadcast %cst_111 : f32 to vector<2x512xf32>
      %291 = arith.addf %289, %290 : vector<2x512xf32>
      %292 = arith.mulf %291, %278 : vector<2x512xf32>
      %cst_112 = arith.constant 0.000000e+00 : f32
      %293 = vector.broadcast %cst_112 : f32 to vector<2x512xf32>
      %294 = arith.subf %293, %273 : vector<2x512xf32>
      %295 = arith.mulf %294, %273 : vector<2x512xf32>
      %296 = math.exp %295 : vector<2x512xf32>
      %297 = arith.mulf %292, %296 : vector<2x512xf32>
      %cst_113 = arith.constant 1.000000e+00 : f32
      %298 = vector.broadcast %cst_113 : f32 to vector<2x512xf32>
      %299 = arith.subf %298, %297 : vector<2x512xf32>
      %300 = arith.mulf %272, %299 : vector<2x512xf32>
      %cst_114 = arith.constant 1.000000e+00 : f32
      %301 = vector.broadcast %cst_114 : f32 to vector<2x512xf32>
      %302 = arith.addf %301, %300 : vector<2x512xf32>
      %303 = arith.mulf %265, %302 : vector<2x512xf32>
      %304 = arith.truncf %303 : vector<2x512xf32> to vector<2x512xbf16>
      %c0_115 = arith.constant 0 : index
      %c0_116 = arith.constant 0 : index
      %305 = vector.load %arg21[%c0_115, %c0_116] : memref<512x256xbf16, #tpu.memory_space<vmem>>, vector<512x256xbf16>
      %cst_117 = arith.constant dense<0.000000e+00> : vector<2x256xf32>
      %306 = tpu.matmul %304, %305, %cst_117 {dimension_numbers = #tpu.dot_dimension_numbers<[1], [0], [0], [1], [0, 0, 1, 1], [], []>} : vector<2x512xbf16>, vector<512x256xbf16>, vector<2x256xf32> -> vector<2x256xf32>
      %c0_118 = arith.constant 0 : index
      %c0_119 = arith.constant 0 : index
      %307 = vector.load %arg22[%c0_118, %c0_119] : memref<1x256xf32, #tpu.memory_space<vmem>>, vector<1x256xf32>
      %308 = vector.broadcast %307 : vector<1x256xf32> to vector<2x256xf32>
      %309 = arith.addf %306, %308 : vector<2x256xf32>
      %c0_120 = arith.constant 0 : index
      %c0_121 = arith.constant 0 : index
      %310 = vector.load %arg23[%c0_120, %c0_121] : memref<1x256xf32, #tpu.memory_space<vmem>>, vector<1x256xf32>
      %c0_122 = arith.constant 0 : index
      %c0_123 = arith.constant 0 : index
      %311 = vector.load %arg24[%c0_122, %c0_123] : memref<1x256xf32, #tpu.memory_space<vmem>>, vector<1x256xf32>
      %cst_124 = arith.constant dense<0.000000e+00> : vector<2xf32>
      %312 = vector.multi_reduction <add>, %309, %cst_124 [1] : vector<2x256xf32> to vector<2xf32>
      %313 = vector.shape_cast %312 : vector<2xf32> to vector<2x1xf32>
      %cst_125 = arith.constant 2.560000e+02 : f32
      %314 = vector.broadcast %cst_125 : f32 to vector<2x1xf32>
      %315 = arith.divf %313, %314 : vector<2x1xf32>
      %316 = vector.broadcast %315 : vector<2x1xf32> to vector<2x256xf32>
      %317 = arith.subf %309, %316 : vector<2x256xf32>
      %318 = arith.mulf %317, %317 : vector<2x256xf32>
      %cst_126 = arith.constant dense<0.000000e+00> : vector<2xf32>
      %319 = vector.multi_reduction <add>, %318, %cst_126 [1] : vector<2x256xf32> to vector<2xf32>
      %320 = vector.shape_cast %319 : vector<2xf32> to vector<2x1xf32>
      %cst_127 = arith.constant 2.560000e+02 : f32
      %321 = vector.broadcast %cst_127 : f32 to vector<2x1xf32>
      %322 = arith.divf %320, %321 : vector<2x1xf32>
      %323 = vector.broadcast %315 : vector<2x1xf32> to vector<2x256xf32>
      %324 = arith.subf %309, %323 : vector<2x256xf32>
      %cst_128 = arith.constant 9.99999974E-6 : f32
      %325 = vector.broadcast %cst_128 : f32 to vector<2x1xf32>
      %326 = arith.addf %322, %325 : vector<2x1xf32>
      %327 = math.rsqrt %326 : vector<2x1xf32>
      %328 = vector.broadcast %327 : vector<2x1xf32> to vector<2x256xf32>
      %329 = arith.mulf %324, %328 : vector<2x256xf32>
      %330 = vector.broadcast %310 : vector<1x256xf32> to vector<2x256xf32>
      %331 = arith.mulf %329, %330 : vector<2x256xf32>
      %332 = vector.broadcast %311 : vector<1x256xf32> to vector<2x256xf32>
      %333 = arith.addf %331, %332 : vector<2x256xf32>
      %cst_129 = arith.constant 5.000000e-01 : f32
      %334 = vector.broadcast %cst_129 : f32 to vector<2x256xf32>
      %335 = arith.mulf %334, %333 : vector<2x256xf32>
      %cst_130 = arith.constant 0.707106769 : f32
      %336 = vector.broadcast %cst_130 : f32 to vector<2x256xf32>
      %337 = arith.mulf %333, %336 : vector<2x256xf32>
      %cst_131 = arith.constant 0.000000e+00 : f32
      %338 = vector.broadcast %cst_131 : f32 to vector<2x256xf32>
      %339 = arith.cmpf oge, %337, %338 : vector<2x256xf32>
      %cst_132 = arith.constant 1.000000e+00 : f32
      %cst_133 = arith.constant -1.000000e+00 : f32
      %340 = vector.broadcast %cst_132 : f32 to vector<2x256xf32>
      %341 = vector.broadcast %cst_133 : f32 to vector<2x256xf32>
      %342 = arith.select %339, %340, %341 : vector<2x256xi1>, vector<2x256xf32>
      %343 = math.absf %337 : vector<2x256xf32>
      %cst_134 = arith.constant 0.327591091 : f32
      %344 = vector.broadcast %cst_134 : f32 to vector<2x256xf32>
      %345 = arith.mulf %344, %343 : vector<2x256xf32>
      %cst_135 = arith.constant 1.000000e+00 : f32
      %346 = vector.broadcast %cst_135 : f32 to vector<2x256xf32>
      %347 = arith.addf %346, %345 : vector<2x256xf32>
      %348 = tpu.reciprocal %347 {approx = true} : vector<2x256xf32> -> vector<2x256xf32>
      %cst_136 = arith.constant 1.06140542 : f32
      %349 = vector.broadcast %cst_136 : f32 to vector<2x256xf32>
      %350 = arith.mulf %349, %348 : vector<2x256xf32>
      %cst_137 = arith.constant -1.45315206 : f32
      %351 = vector.broadcast %cst_137 : f32 to vector<2x256xf32>
      %352 = arith.addf %350, %351 : vector<2x256xf32>
      %353 = arith.mulf %352, %348 : vector<2x256xf32>
      %cst_138 = arith.constant 1.42141378 : f32
      %354 = vector.broadcast %cst_138 : f32 to vector<2x256xf32>
      %355 = arith.addf %353, %354 : vector<2x256xf32>
      %356 = arith.mulf %355, %348 : vector<2x256xf32>
      %cst_139 = arith.constant -0.284496725 : f32
      %357 = vector.broadcast %cst_139 : f32 to vector<2x256xf32>
      %358 = arith.addf %356, %357 : vector<2x256xf32>
      %359 = arith.mulf %358, %348 : vector<2x256xf32>
      %cst_140 = arith.constant 0.254829586 : f32
      %360 = vector.broadcast %cst_140 : f32 to vector<2x256xf32>
      %361 = arith.addf %359, %360 : vector<2x256xf32>
      %362 = arith.mulf %361, %348 : vector<2x256xf32>
      %cst_141 = arith.constant 0.000000e+00 : f32
      %363 = vector.broadcast %cst_141 : f32 to vector<2x256xf32>
      %364 = arith.subf %363, %343 : vector<2x256xf32>
      %365 = arith.mulf %364, %343 : vector<2x256xf32>
      %366 = math.exp %365 : vector<2x256xf32>
      %367 = arith.mulf %362, %366 : vector<2x256xf32>
      %cst_142 = arith.constant 1.000000e+00 : f32
      %368 = vector.broadcast %cst_142 : f32 to vector<2x256xf32>
      %369 = arith.subf %368, %367 : vector<2x256xf32>
      %370 = arith.mulf %342, %369 : vector<2x256xf32>
      %cst_143 = arith.constant 1.000000e+00 : f32
      %371 = vector.broadcast %cst_143 : f32 to vector<2x256xf32>
      %372 = arith.addf %371, %370 : vector<2x256xf32>
      %373 = arith.mulf %335, %372 : vector<2x256xf32>
      %374 = arith.truncf %373 : vector<2x256xf32> to vector<2x256xbf16>
      %c0_144 = arith.constant 0 : index
      %c0_145 = arith.constant 0 : index
      %375 = vector.load %arg25[%c0_144, %c0_145] : memref<256x128xbf16, #tpu.memory_space<vmem>>, vector<256x128xbf16>
      %cst_146 = arith.constant dense<0.000000e+00> : vector<2x128xf32>
      %376 = tpu.matmul %374, %375, %cst_146 {dimension_numbers = #tpu.dot_dimension_numbers<[1], [0], [0], [1], [0, 0, 1, 1], [], []>} : vector<2x256xbf16>, vector<256x128xbf16>, vector<2x128xf32> -> vector<2x128xf32>
      %c0_147 = arith.constant 0 : index
      %c0_148 = arith.constant 0 : index
      %377 = vector.load %arg26[%c0_147, %c0_148] : memref<1x128xf32, #tpu.memory_space<vmem>>, vector<1x128xf32>
      %378 = vector.broadcast %377 : vector<1x128xf32> to vector<2x128xf32>
      %379 = arith.addf %376, %378 : vector<2x128xf32>
      %c0_149 = arith.constant 0 : index
      %c0_150 = arith.constant 0 : index
      %380 = vector.load %arg27[%c0_149, %c0_150] : memref<2x128xf32, #tpu.memory_space<vmem>>, vector<2x128xf32>
      tpu.vector_store %arg27[%c0_149, %c0_150], %379 {strides = array<i32>} : memref<2x128xf32, #tpu.memory_space<vmem>>, vector<2x128xf32>,
    } else {
    }
    return
  }
  func.func @transform_0(%arg0: i32) -> (i32, i32, i32) {
    %c0_i32 = arith.constant 0 : i32
    %c0_i32_0 = arith.constant 0 : i32
    %c0_i32_1 = arith.constant 0 : i32
    %c0_i32_2 = arith.constant 0 : i32
    return %c0_i32, %c0_i32_0, %c0_i32_1 : i32, i32, i32
  }
  func.func @transform_1(%arg0: i32) -> (i32, i32, i32) {
    %c0_i32 = arith.constant 0 : i32
    %c0_i32_0 = arith.constant 0 : i32
    %c0_i32_1 = arith.constant 0 : i32
    return %arg0, %c0_i32, %c0_i32_0 : i32, i32, i32
  }
  func.func @transform_2(%arg0: i32) -> (i32, i32, i32) {
    %c0_i32 = arith.constant 0 : i32
    %c0_i32_0 = arith.constant 0 : i32
    %c0_i32_1 = arith.constant 0 : i32
    return %arg0, %c0_i32, %c0_i32_0 : i32, i32, i32
  }
  func.func @transform_3(%arg0: i32) -> (i32, i32, i32) {
    %c0_i32 = arith.constant 0 : i32
    %c0_i32_0 = arith.constant 0 : i32
    %c0_i32_1 = arith.constant 0 : i32
    return %arg0, %c0_i32, %c0_i32_0 : i32, i32, i32
  }
  func.func @transform_4(%arg0: i32) -> (i32, i32, i32) {
    %c0_i32 = arith.constant 0 : i32
    %c0_i32_0 = arith.constant 0 : i32
    %c0_i32_1 = arith.constant 0 : i32
    return %arg0, %c0_i32, %c0_i32_0 : i32, i32, i32
  }
  func.func @transform_5(%arg0: i32) -> (i32, i32, i32) {
    %c0_i32 = arith.constant 0 : i32
    %c0_i32_0 = arith.constant 0 : i32
    %c0_i32_1 = arith.constant 0 : i32
    return %arg0, %c0_i32, %c0_i32_0 : i32, i32, i32
  }
  func.func @transform_6(%arg0: i32) -> (i32, i32, i32) {
    %c0_i32 = arith.constant 0 : i32
    %c0_i32_0 = arith.constant 0 : i32
    %c0_i32_1 = arith.constant 0 : i32
    return %arg0, %c0_i32, %c0_i32_0 : i32, i32, i32
  }
  func.func @transform_7(%arg0: i32) -> (i32, i32, i32) {
    %c0_i32 = arith.constant 0 : i32
    %c0_i32_0 = arith.constant 0 : i32
    %c0_i32_1 = arith.constant 0 : i32
    return %arg0, %c0_i32, %c0_i32_0 : i32, i32, i32
  }
  func.func @transform_8(%arg0: i32) -> (i32, i32, i32) {
    %c0_i32 = arith.constant 0 : i32
    %c0_i32_0 = arith.constant 0 : i32
    %c0_i32_1 = arith.constant 0 : i32
    return %arg0, %c0_i32, %c0_i32_0 : i32, i32, i32
  }
  func.func @transform_9(%arg0: i32) -> (i32, i32, i32) {
    %c0_i32 = arith.constant 0 : i32
    %c0_i32_0 = arith.constant 0 : i32
    %c0_i32_1 = arith.constant 0 : i32
    return %arg0, %c0_i32, %c0_i32_0 : i32, i32, i32
  }
  func.func @transform_10(%arg0: i32) -> (i32, i32, i32) {
    %c0_i32 = arith.constant 0 : i32
    %c0_i32_0 = arith.constant 0 : i32
    %c0_i32_1 = arith.constant 0 : i32
    return %arg0, %c0_i32, %c0_i32_0 : i32, i32, i32
  }
  func.func @transform_11(%arg0: i32) -> (i32, i32, i32) {
    %c0_i32 = arith.constant 0 : i32
    %c0_i32_0 = arith.constant 0 : i32
    %c0_i32_1 = arith.constant 0 : i32
    return %arg0, %c0_i32, %c0_i32_0 : i32, i32, i32
  }
  func.func @transform_12(%arg0: i32) -> (i32, i32, i32) {
    %c0_i32 = arith.constant 0 : i32
    %c0_i32_0 = arith.constant 0 : i32
    %c0_i32_1 = arith.constant 0 : i32
    return %arg0, %c0_i32, %c0_i32_0 : i32, i32, i32
  }
  func.func @transform_13(%arg0: i32) -> (i32, i32) {
    %c0_i32 = arith.constant 0 : i32
    %c0_i32_0 = arith.constant 0 : i32
    %c0_i32_1 = arith.constant 0 : i32
    return %c0_i32, %c0_i32_0 : i32, i32
  }
  func.func @transform_14(%arg0: i32) -> (i32, i32) {
    %c0_i32 = arith.constant 0 : i32
    %c0_i32_0 = arith.constant 0 : i32
    %c0_i32_1 = arith.constant 0 : i32
    return %c0_i32, %c0_i32_0 : i32, i32
  }
  func.func @transform_15(%arg0: i32) -> (i32, i32) {
    %c0_i32 = arith.constant 0 : i32
    %c0_i32_0 = arith.constant 0 : i32
    %c0_i32_1 = arith.constant 0 : i32
    return %c0_i32, %c0_i32_0 : i32, i32
  }
  func.func @transform_16(%arg0: i32) -> (i32, i32) {
    %c0_i32 = arith.constant 0 : i32
    %c0_i32_0 = arith.constant 0 : i32
    %c0_i32_1 = arith.constant 0 : i32
    return %c0_i32, %c0_i32_0 : i32, i32
  }
  func.func @transform_17(%arg0: i32) -> (i32, i32) {
    %c0_i32 = arith.constant 0 : i32
    %c0_i32_0 = arith.constant 0 : i32
    %c0_i32_1 = arith.constant 0 : i32
    return %c0_i32, %c0_i32_0 : i32, i32
  }
  func.func @transform_18(%arg0: i32) -> (i32, i32) {
    %c0_i32 = arith.constant 0 : i32
    %c0_i32_0 = arith.constant 0 : i32
    %c0_i32_1 = arith.constant 0 : i32
    return %c0_i32, %c0_i32_0 : i32, i32
  }
  func.func @transform_19(%arg0: i32) -> (i32, i32) {
    %c0_i32 = arith.constant 0 : i32
    %c0_i32_0 = arith.constant 0 : i32
    %c0_i32_1 = arith.constant 0 : i32
    return %c0_i32, %c0_i32_0 : i32, i32
  }
  func.func @transform_20(%arg0: i32) -> (i32, i32) {
    %c0_i32 = arith.constant 0 : i32
    %c0_i32_0 = arith.constant 0 : i32
    %c0_i32_1 = arith.constant 0 : i32
    return %c0_i32, %c0_i32_0 : i32, i32
  }
  func.func @transform_21(%arg0: i32) -> (i32, i32) {
    %c0_i32 = arith.constant 0 : i32
    %c0_i32_0 = arith.constant 0 : i32
    %c0_i32_1 = arith.constant 0 : i32
    return %c0_i32, %c0_i32_0 : i32, i32
  }
  func.func @transform_22(%arg0: i32) -> (i32, i32) {
    %c0_i32 = arith.constant 0 : i32
    %c0_i32_0 = arith.constant 0 : i32
    %c0_i32_1 = arith.constant 0 : i32
    return %c0_i32, %c0_i32_0 : i32, i32
  }
  func.func @transform_23(%arg0: i32) -> (i32, i32) {
    %c0_i32 = arith.constant 0 : i32
    %c0_i32_0 = arith.constant 0 : i32
    %c0_i32_1 = arith.constant 0 : i32
    return %c0_i32, %c0_i32_0 : i32, i32
  }
  func.func @transform_24(%arg0: i32) -> (i32, i32) {
    %c0_i32 = arith.constant 0 : i32
    %c0_i32_0 = arith.constant 0 : i32
    %c0_i32_1 = arith.constant 0 : i32
    return %c0_i32, %c0_i32_0 : i32, i32
  }
  func.func @transform_25(%arg0: i32) -> (i32, i32) {
    %c0_i32 = arith.constant 0 : i32
    %c0_i32_0 = arith.constant 0 : i32
    %c0_i32_1 = arith.constant 0 : i32
    return %c0_i32, %c0_i32_0 : i32, i32
  }
  func.func @transform_26(%arg0: i32) -> (i32, i32) {
    %c0_i32 = arith.constant 0 : i32
    %c0_i32_0 = arith.constant 0 : i32
    %c0_i32_1 = arith.constant 0 : i32
    return %c0_i32, %c0_i32_0 : i32, i32
  }
}

</mosaic_0001>

<bundles_post_ra>
// kernel: gpt_forward.1
= control target key start
LH: loop header
LB: loop body
LE: loop exit
PB: predicated region body
PF: predicated region fallthrough
CT: control target
= control target key end

     0   :  { %s7229_s0 = inlined_call_operand.vmem [shape: f32[2,8,32], index: 0, kind: input, shape index: {}]   ;;  %s7230_s1 = inlined_call_operand.hbm [shape: f32[2,1,32], index: 1, kind: input, shape index: {}]   ;;  %s7231_s2 = inlined_call_operand.hbm [shape: f32[2,1,32], index: 2, kind: input, shape index: {}]   ;;  %s7232_s3 = inlined_call_operand.hbm [shape: bf16[2,32,96], index: 3, kind: input, shape index: {}]   ;;  %s7233_s4 = inlined_call_operand.hbm [shape: f32[2,1,96], index: 4, kind: input, shape index: {}]   ;;  %s7234_s5 = inlined_call_operand.hbm [shape: bf16[2,32,32], index: 5, kind: input, shape index: {}]   ;;  %s7235_s6 = inlined_call_operand.hbm [shape: f32[2,1,32], index: 6, kind: input, shape index: {}]   ;;  %s7236_s7 = inlined_call_operand.hbm [shape: f32[2,1,32], index: 7, kind: input, shape index: {}]   ;;  %s7237_s8 = inlined_call_operand.hbm [shape: f32[2,1,32], index: 8, kind: input, shape index: {}]   ;;  %s7238_s9 = inlined_call_operand.hbm [shape: bf16[2,32,128], index: 9, kind: input, shape index: {}]   ;;  %s7239_s10 = inlined_call_operand.hbm [shape: f32[2,1,128], index: 10, kind: input, shape index: {}]   ;;  %s7240_s11 = inlined_call_operand.vmem [shape: bf16[2,128,32], index: 11, kind: input, shape index: {}]   ;;  %s7241_s12 = inlined_call_operand.hbm [shape: f32[2,1,32], index: 12, kind: input, shape index: {}]   ;;  %s7242_s13 = inlined_call_operand.hbm [shape: f32[1,32], index: 13, kind: input, shape index: {}]   ;;  %s7243_s14 = inlined_call_operand.hbm [shape: f32[1,32], index: 14, kind: input, shape index: {}]   ;;  %s7244_s15 = inlined_call_operand.vmem [shape: f32[8,1], index: 15, kind: input, shape index: {}]   ;;  %s7245_s16 = inlined_call_operand.hbm [shape: bf16[32,512], index: 16, kind: input, shape index: {}]   ;;  %s7246_s17 = inlined_call_operand.hbm [shape: f32[1,512], index: 17, kind: input, shape index: {}]   ;;  %s7247_s18 = inlined_call_operand.hbm [shape: f32[1,512], index: 18, kind: input, shape index: {}]   ;;  %s7248_s19 = inlined_call_operand.hbm [shape: f32[1,512], index: 19, kind: input, shape index: {}]   ;;  %s7249_s20 = inlined_call_operand.vmem [shape: bf16[512,256], index: 20, kind: input, shape index: {}]   ;;  %s7250_s21 = inlined_call_operand.hbm [shape: f32[1,256], index: 21, kind: input, shape index: {}]   ;;  %s7251_s22 = inlined_call_operand.hbm [shape: f32[1,256], index: 22, kind: input, shape index: {}]   ;;  %s7252_s23 = inlined_call_operand.hbm [shape: f32[1,256], index: 23, kind: input, shape index: {}]   ;;  %s7253_s24 = inlined_call_operand.hbm [shape: bf16[256,128], index: 24, kind: input, shape index: {}]   ;;  %s7254_s25 = inlined_call_operand.hbm [shape: f32[1,128], index: 25, kind: input, shape index: {}]   ;;  %s7255_s26 = inlined_call_operand.hbm [shape: f32[2,128], index: 26, kind: output, shape index: {}]  }
   0x1   :  { %7296 = sst [smem:[#allocation56_spill]] %s7229_s0 }
   0x2   :  { %7297 = sst [smem:[#allocation57_spill]] %s7230_s1 }
   0x3   :  { %7298 = sst [smem:[#allocation58_spill]] %s7231_s2 }
   0x4   :  { %7299 = sst [smem:[#allocation59_spill]] %s7232_s3 }
   0x5   :  { %7300 = sst [smem:[#allocation60_spill]] %s7233_s4 }
   0x6   :  { %7301 = sst [smem:[#allocation61_spill]] %s7234_s5 }
   0x7   :  { %7302 = sst [smem:[#allocation62_spill]] %s7235_s6 }
   0x8   :  { %7303 = sst [smem:[#allocation63_spill]] %s7236_s7 }
   0x9   :  { %7304 = sst [smem:[#allocation64_spill]] %s7237_s8 }
   0xa   :  { %7305 = sst [smem:[#allocation65_spill]] %s7238_s9 }
   0xb   :  { %7306 = sst [smem:[#allocation66_spill]] %s7239_s10 }
   0xc   :  { %7307 = sst [smem:[#allocation67_spill]] %s7240_s11 }
   0xd   :  { %7308 = sst [smem:[#allocation68_spill]] %s7242_s13 }
   0xe   :  { %7309 = sst [smem:[#allocation69_spill]] %s7243_s14 }
   0xf   :  { %7310 = sst [smem:[#allocation70_spill]] %s7244_s15 }
  0x10   :  { %7311 = sst [smem:[#allocation71_spill]] %s7245_s16 }
  0x11   :  { %7312 = sst [smem:[#allocation72_spill]] %s7246_s17 }
  0x12   :  { %7313 = sst [smem:[#allocation73_spill]] %s7247_s18 }
  0x13   :  { %7314 = sst [smem:[#allocation74_spill]] %s7248_s19 }
  0x14   :  { %7315 = sst [smem:[#allocation75_spill]] %s7249_s20 }
  0x15   :  { %7316 = sst [smem:[#allocation76_spill]] %s7250_s21 }
  0x16   :  { %7317 = sst [smem:[#allocation77_spill]] %s7251_s22 }
  0x17   :  { %7318 = sst [smem:[#allocation78_spill]] %s7252_s23 }
  0x18   :  { %7319 = sst [smem:[#allocation79_spill]] %s7253_s24 }
  0x19   :  { %7320 = sst [smem:[#allocation80_spill]] %s7254_s25 }
  0x1a   :  { %7321 = sst [smem:[#allocation81_spill]] %s7255_s26 }
  0x1b   :  { %31 = vsyncpa [#allocation4], 0 }
  0x1c   :  { %33 = vsyncpa [#allocation4 + $0x1], 0 }
  0x1d   :  { %34 = vsyncpa [#allocation7], 0 }
  0x1e   :  { %36 = vsyncpa [#allocation7 + $0x1], 0 }
  0x1f   :  { %37 = vsyncpa [#allocation10], 0 }
  0x20   :  { %39 = vsyncpa [#allocation10 + $0x1], 0 }
  0x21   :  { %40 = vsyncpa [#allocation13], 0 }
  0x22   :  { %42 = vsyncpa [#allocation13 + $0x1], 0 }
  0x23   :  { %43 = vsyncpa [#allocation16], 0 }
  0x24   :  { %45 = vsyncpa [#allocation16 + $0x1], 0 }
  0x25   :  { %46 = vsyncpa [#allocation19], 0 }
  0x26   :  { %48 = vsyncpa [#allocation19 + $0x1], 0 }
  0x27   :  { %49 = vsyncpa [#allocation22], 0 }
  0x28   :  { %50 = vsyncpa [#allocation25], 0 }
  0x29   :  { %51 = vsyncpa [#allocation28], 0 }
  0x2a   :  { %52 = vsyncpa [#allocation31], 0 }
  0x2b   :  { %53 = vsyncpa [#allocation34], 0 }
  0x2c   :  { %54 = vsyncpa [#allocation37], 0 }
  0x2d   :  { %55 = vsyncpa [#allocation5], 0  ;;  %s6033_s27 = smov 0   ;;  %s6035_s3 = smov 0  }
  0x2e   :  { %s6037_s7 = smov 0   ;;  %s6039_s28 = smov 0  }
  0x2f LB: > { %7322 = sst [smem:[#allocation52_spill]] %s5852_s7  ;;  %s5858_s8 = smov [#allocation21]   ;;  %s5856_s28 = sphi %s6039_s28, %s7396_s28   ;;  %s5852_s7 = sphi %s6037_s7, %s7398_s7   ;;  %s5848_s3 = sphi %s6035_s3, %s7400_s3   ;;  %s5844_s27 = sphi %s6033_s27, %s7399_s27  }
  0x30   : > { %s709_s4 = sshll.u32 %s5858_s8, 4  ;;  %s6054_s29 = sadd.s32 4294967295, %s5856_s28   ;;  %s710_s4 = int_to_ptr.vmem [resolvable:$true] %s709_s4 }
  0x31   : > { %7323 = sst [smem:[#allocation53_spill]] %s6054_s29  ;;  %p4280_p0 = scmp.ge.s32.totalorder %s5856_s28, 1 }
  0x32   : > { %p7267_p1 = scmp.eq.s32.totalorder %s6054_s29, 0  ;;  %p693_p2 = scmp.lt.s32.totalorder %s5856_s28, 3 }
  0x33   : > { %s5859_s9 = smov [#allocation24]   ;;  %s5860_s5 = smov [#allocation27]  }
  0x34   : > { %p6060_p4 = pnand %p4280_p0, %p693_p2  ;;  %s733_s30 = sshll.u32 %s5859_s9, 4  ;;  %s6066_s30 = int_to_ptr.vmem [resolvable:$true] %s733_s30 }
  0x35   : > { %s758_s10 = sshll.u32 %s5860_s5, 4  ;;  %s5167_s1 = scalar_lea.vmem %s710_s4, 16  ;;  %s6074_s10 = int_to_ptr.vmem [resolvable:$true] %s758_s10 }
  0x36   : > { %s7324_s0 = scalar_select %p6060_p4, 1, 0 }
  0x37   : > { %p4753_p5 = pneg %p6060_p4  ;;  %p5168_p8 = scmp.ne.s32.totalorder %s710_s4, %s5167_s1 }
  0x38   : > { %s5174_s8 = scalar_lea.vmem %s710_s4, 32  ;;  %p5175_p11 = scmp.lt.s32.totalorder %s710_s4, %s710_s4 }
  0x39   : > { %p6070_p6 = pnand %p4753_p5, %p7267_p1  ;;  %p5176_p12 = scmp.lt.s32.totalorder %s5174_s8, %s5167_s1 }
  0x3b   : > { %s7325_s2 = scalar_select %p6070_p6, 1, 0 }
  0x3c   : > { %p6078_p7 = pneg %p6070_p6  ;;  %p5177_p13 = por %p5176_p12, %p5175_p11 }
  0x3e   : > { %s7326_s6 = scalar_select %p6078_p7, 1, 0 }
  0x3f   : > { %p5170_p9 = pnand %p5168_p8, %p6078_p7 }
  0x41   : > { %p5171_p10 = pneg %p5170_p9 }
  0x43   : > { %p5178_p0 = pnand %p5177_p13, %p5171_p10 }
  0x45   : > { %5181 = shalt.err (!%p5178_p0)
}
  0x46   : > { %s7327_s13 = sld [smem:[#allocation68_spill]]  ;;  %s5193_s26 = scalar_lea.vmem %s6066_s30, 1024 }
  0x47   : > { %p5194_p2 = scmp.ne.s32.totalorder %s6066_s30, %s5193_s26  ;;  %p5201_p9 = scmp.lt.s32.totalorder %s6066_s30, %s6066_s30 }
  0x48   : > { %p5202_p11 = scmp.lt.s32.totalorder %s5193_s26, %s5193_s26 }
  0x49   : > { %p5196_p5 = pnand %p5194_p2, %p6078_p7 }
  0x4a   : > { %p5203_p10 = por %p5202_p11, %p5201_p9 }
  0x4b   : > { %p5197_p8 = pneg %p5196_p5 }
  0x4c   : > { %4756 = dma.hbm_to_vmem [thread:$0]  (!%p6070_p6), %s7327_s13, 16, %s710_s4, [#allocation22]  }
  0x4d   : > { %p5204_p12 = pnand %p5203_p10, %p5197_p8 }
  0x4f   : > { %5207 = shalt.err (!%p5204_p12)
}
  0x50   : > { %s5861_s1 = smov 256   ;;  %s5862_s8 = smov 16  }
  0x51   : > { %s7328_s16 = sld [smem:[#allocation71_spill]]  ;;  %s5219_s5 = scalar_lea.vmem %s6074_s10, 64 }
  0x52   : > { %p5220_p13 = scmp.ne.s32.totalorder %s6074_s10, %s5219_s5  ;;  %p5227_p5 = scmp.lt.s32.totalorder %s6074_s10, %s6074_s10 }
  0x53   : > { %p5228_p8 = scmp.lt.s32.totalorder %s5219_s5, %s5219_s5 }
  0x54   : > { %p5222_p0 = pnand %p5220_p13, %p6078_p7 }
  0x55   : > { %p5229_p9 = por %p5228_p8, %p5227_p5 }
  0x56   : > { %p5223_p2 = pneg %p5222_p0 }
  0x57   : > { %4762 = dma.hbm_to_vmem [thread:$0]  (!%p6070_p6), %s7328_s16, 1024, %s6066_s30, [#allocation25], %s5861_s1, %s5861_s1, %s5862_s8  }
  0x58   : > { %p5230_p11 = pnand %p5229_p9, %p5223_p2 }
  0x5a   : > { %5233 = shalt.err (!%p5230_p11)
}
  0x5b   : > { %s7329_s18 = sld [smem:[#allocation73_spill]]  ;;  %s5863_s30 = smov [#allocation30]  }
  0x5c   : > { %s783_s1 = sshll.u32 %s5863_s30, 4  ;;  %s5864_s8 = smov [#allocation33]   ;;  %s784_s1 = int_to_ptr.vmem [resolvable:$true] %s783_s1 }
  0x5d   : > { %s805_s4 = sshll.u32 %s5864_s8, 4  ;;  %s5245_s9 = scalar_lea.vmem %s784_s1, 32  ;;  %s806_s4 = int_to_ptr.vmem [resolvable:$true] %s805_s4 }
  0x5e   : > { %p5246_p10 = scmp.ne.s32.totalorder %s784_s1, %s5245_s9  ;;  %p5253_p0 = scmp.lt.s32.totalorder %s784_s1, %s784_s1 }
  0x5f   : > { %p5254_p2 = scmp.lt.s32.totalorder %s5245_s9, %s5245_s9 }
  0x60   : > { %p5248_p12 = pnand %p5246_p10, %p6078_p7 }
  0x61   : > { %4768 = dma.hbm_to_vmem [thread:$0]  (!%p6070_p6), %s7329_s18, 64, %s6074_s10, [#allocation28]  }
  0x62   : > { %p5249_p13 = pneg %p5248_p12  ;;  %p5255_p5 = por %p5254_p2, %p5253_p0 }
  0x64   : > { %p5256_p8 = pnand %p5255_p5, %p5249_p13 }
  0x66   : > { %5259 = shalt.err (!%p5256_p8)
}
  0x67   : > { %s7330_s21 = sld [smem:[#allocation76_spill]]  ;;  %s5271_s10 = scalar_lea.vmem %s806_s4, 32 }
  0x68   : > { %p5272_p9 = scmp.ne.s32.totalorder %s806_s4, %s5271_s10  ;;  %p5279_p10 = scmp.lt.s32.totalorder %s806_s4, %s806_s4 }
  0x69   : > { %p5280_p12 = scmp.lt.s32.totalorder %s5271_s10, %s5271_s10 }
  0x6a   : > { %p5274_p11 = pnand %p5272_p9, %p6078_p7 }
  0x6b   : > { %p5281_p1 = por %p5280_p12, %p5279_p10 }
  0x6c   : > { %p5275_p3 = pneg %p5274_p11 }
  0x6d   : > { %4774 = dma.hbm_to_vmem [thread:$0]  (!%p6070_p6), %s7330_s21, 32, %s784_s1, [#allocation31]  }
  0x6e   : > { %p5282_p4 = pnand %p5281_p1, %p5275_p3 }
  0x70   : > { %5285 = shalt.err (!%p5282_p4)
}
  0x71   : > { %s7331_s23 = sld [smem:[#allocation78_spill]]  ;;  %s6128_s1 = sadd.s32 1, %s5856_s28  }
  0x72   : > { %7332 = sst [smem:[#allocation54_spill]] %s6128_s1  ;;  %s86_s8 = ssub.s32 %s5856_s28, %s6128_s1 }
  0x73   : > { %s89_s9 = sadd.s32 1, %s5852_s7  ;;  %p87_p1 = scmp.eq.s32.totalorder %s86_s8, 0 }
  0x74   : > { %p96_p3 = scmp.ne.s32.totalorder %s5852_s7, %s5848_s3  ;;  %p97_p4 = scmp.eq.s32.totalorder %s5856_s28, 0 }
  0x75   : > { %p102_p13 = scmp.ne.s32.totalorder %s5848_s3, %s5844_s27  ;;  %p7334_p2 = scmp.eq.s32.totalorder %s6054_s29, 0 }
  0x76   : > { %s6139_s13 = scalar_select %p87_p1, %s5852_s7, %s89_s9  }
  0x77   : > { %4780 = dma.hbm_to_vmem [thread:$0]  (!%p6070_p6), %s7331_s23, 32, %s806_s4, [#allocation34]  }
  0x78   : > { %7333 = sst [smem:[#allocation55_spill]] %s6139_s13  ;;  %p98_p0 = por %p97_p4, %p96_p3 }
  0x79   : > { %p6143_p5 = por %p7334_p2, %p102_p13  ;;  %p4832_p8 = scmp.lt.s32.totalorder %s5856_s28, 2 }
  0x7a   : > { %s6149_s10 = sand.u32 1, %s5852_s7   ;;  %s6152_s4 = sshll.u32 %s5856_s28, 4 }
  0x7b   : > { %s7335_s5 = scalar_select %p6143_p5, 1, 0 }
  0x7c   : > { %s6155_s26 = sand.u32 1, %s5856_s28   ;;  %p6157_p9 = pnand %p4832_p8, %p98_p0 }
  0x7d   : > { %s7337_s9 = sld [smem:[#allocation58_spill]]  ;;  %s860_s18 = scalar_lea.vmem [#allocation6], %s6149_s10 }
  0x7e   : > { %s7336_s27 = scalar_select %p6157_p9, 1, 0 }
  0x7f   : > { %s867_s21 = sshll.u32 %s860_s18, 4  ;;  %p6173_p10 = pneg %p6157_p9  ;;  %s868_s21 = int_to_ptr.vmem [resolvable:$true] %s867_s21 }
  0x81   : > { %s7338_s7 = scalar_select %p6173_p10, 1, 0 }
  0x83   : > { %s6165_s16 = scalar_lea.hbm %s7337_s9, %s6152_s4  ;;  %s5291_s1 = scalar_lea.hbm %s7337_s9, 32 }
  0x84   : > { %s5286_s13 = scalar_lea.hbm %s6165_s16, 16  ;;  %p5292_p3 = scmp.lt.s32.totalorder %s6165_s16, %s7337_s9 }
  0x85   : > { %p5287_p11 = scmp.ne.s32.totalorder %s6165_s16, %s5286_s13  ;;  %p5293_p4 = scmp.lt.s32.totalorder %s5291_s1, %s5286_s13 }
  0x87   : > { %p5289_p12 = pnand %p6173_p10, %p5287_p11  ;;  %p5294_p13 = por %p5293_p4, %p5292_p3 }
  0x89   : > { %p5290_p1 = pneg %p5289_p12 }
  0x8b   : > { %p5295_p0 = pnand %p5294_p13, %p5290_p1 }
  0x8d   : > { %5298 = shalt.err (!%p5295_p0)
}
  0x8e   : > { %s5299_s18 = scalar_lea.vmem %s868_s21, 16  ;;  %s5865_s23 = smov [#allocation6]  }
  0x8f   : > { %p5300_p2 = scmp.ne.s32.totalorder %s868_s21, %s5299_s18  ;;  %s5304_s11 = sshll.u32 %s5865_s23, 4  ;;  %s5305_s11 = int_to_ptr.vmem [resolvable:$false] %s5304_s11 }
  0x90   : > { %s5306_s29 = scalar_lea.vmem %s5305_s11, 32  ;;  %p5307_p11 = scmp.lt.s32.totalorder %s868_s21, %s5305_s11 }
  0x91   : > { %p5302_p8 = pnand %p5300_p2, %p6173_p10  ;;  %p5308_p12 = scmp.lt.s32.totalorder %s5306_s29, %s5299_s18 }
  0x93   : > { %p5303_p5 = pneg %p5302_p8  ;;  %p5309_p6 = por %p5308_p12, %p5307_p11 }
  0x95   : > { %p5310_p7 = pnand %p5309_p6, %p5303_p5 }
  0x97   : > { %5313 = shalt.err (!%p5310_p7)
}
  0x98   : > { %s7339_s15 = scalar_lea.sflag [#allocation7], %s6155_s26  ;;  %s7340_s23 = sld [smem:[#allocation60_spill]] }
  0x99   : > { %4793 = dma.hbm_to_vmem [thread:$0]  (!%p6157_p9), %s6165_s16, 16, %s868_s21, %s7339_s15  }
  0x9a   : > { %s898_s11 = scalar_lea.vmem [#allocation9], %s6149_s10 }
  0x9b   : > { %s905_s29 = sshll.u32 %s898_s11, 4  ;;  %s906_s29 = int_to_ptr.vmem [resolvable:$true] %s905_s29 }
  0x9e   : > { %s6197_s13 = scalar_lea.hbm %s7340_s23, %s6152_s4  ;;  %s5319_s16 = scalar_lea.hbm %s7340_s23, 32 }
  0x9f   : > { %s5314_s8 = scalar_lea.hbm %s6197_s13, 16  ;;  %p5320_p1 = scmp.lt.s32.totalorder %s6197_s13, %s7340_s23 }
  0xa0   : > { %p5315_p6 = scmp.ne.s32.totalorder %s6197_s13, %s5314_s8  ;;  %p5321_p3 = scmp.lt.s32.totalorder %s5319_s16, %s5314_s8 }
  0xa2   : > { %p5317_p7 = pnand %p5315_p6, %p6173_p10  ;;  %p5322_p4 = por %p5321_p3, %p5320_p1 }
  0xa4   : > { %p5318_p5 = pneg %p5317_p7 }
  0xa6   : > { %p5323_p13 = pnand %p5322_p4, %p5318_p5 }
  0xa8   : > { %5326 = shalt.err (!%p5323_p13)
}
  0xa9   : > { %s5327_s20 = scalar_lea.vmem %s906_s29, 16  ;;  %s5866_s1 = smov [#allocation9]  }
  0xaa   : > { %p5328_p0 = scmp.ne.s32.totalorder %s906_s29, %s5327_s20  ;;  %s5332_s11 = sshll.u32 %s5866_s1, 4  ;;  %s5333_s11 = int_to_ptr.vmem [resolvable:$false] %s5332_s11 }
  0xab   : > { %s5334_s30 = scalar_lea.vmem %s5333_s11, 32  ;;  %p5335_p11 = scmp.lt.s32.totalorder %s906_s29, %s5333_s11 }
  0xac   : > { %p5330_p2 = pnand %p5328_p0, %p6173_p10  ;;  %p5336_p12 = scmp.lt.s32.totalorder %s5334_s30, %s5327_s20 }
  0xae   : > { %p5331_p8 = pneg %p5330_p2  ;;  %p5337_p6 = por %p5336_p12, %p5335_p11 }
  0xb0   : > { %p5338_p7 = pnand %p5337_p6, %p5331_p8 }
  0xb2   : > { %5341 = shalt.err (!%p5338_p7)
}
  0xb3   : > { %s7341_s9 = scalar_lea.sflag [#allocation10], %s6155_s26  ;;  %s7342_s16 = sld [smem:[#allocation62_spill]] }
  0xb4   : > { %4799 = dma.hbm_to_vmem [thread:$0]  (!%p6157_p9), %s6197_s13, 16, %s906_s29, %s7341_s9  }
  0xb5   : > { %s936_s30 = scalar_lea.vmem [#allocation12], %s6149_s10 }
  0xb6   : > { %s943_s15 = sshll.u32 %s936_s30, 4  ;;  %s944_s15 = int_to_ptr.vmem [resolvable:$true] %s943_s15 }
  0xb9   : > { %s6223_s21 = scalar_lea.hbm %s7342_s16, %s6152_s4  ;;  %s5347_s13 = scalar_lea.hbm %s7342_s16, 32 }
  0xba   : > { %s5342_s1 = scalar_lea.hbm %s6223_s21, 16  ;;  %p5348_p4 = scmp.lt.s32.totalorder %s6223_s21, %s7342_s16 }
  0xbb   : > { %p5343_p5 = scmp.ne.s32.totalorder %s6223_s21, %s5342_s1  ;;  %p5349_p13 = scmp.lt.s32.totalorder %s5347_s13, %s5342_s1 }
  0xbd   : > { %p5345_p1 = pnand %p5343_p5, %p6173_p10  ;;  %p5350_p0 = por %p5349_p13, %p5348_p4 }
  0xbf   : > { %p5346_p3 = pneg %p5345_p1 }
  0xc1   : > { %p5351_p2 = pnand %p5350_p0, %p5346_p3 }
  0xc3   : > { %5354 = shalt.err (!%p5351_p2)
}
  0xc4   : > { %s5355_s8 = scalar_lea.vmem %s944_s15, 16  ;;  %s5867_s18 = smov [#allocation12]  }
  0xc5   : > { %p5356_p8 = scmp.ne.s32.totalorder %s944_s15, %s5355_s8  ;;  %s5360_s30 = sshll.u32 %s5867_s18, 4  ;;  %s5361_s30 = int_to_ptr.vmem [resolvable:$false] %s5360_s30 }
  0xc6   : > { %s5362_s20 = scalar_lea.vmem %s5361_s30, 32  ;;  %p5363_p6 = scmp.lt.s32.totalorder %s944_s15, %s5361_s30 }
  0xc7   : > { %p5358_p11 = pnand %p5356_p8, %p6173_p10  ;;  %p5364_p7 = scmp.lt.s32.totalorder %s5362_s20, %s5355_s8 }
  0xc9   : > { %p5359_p12 = pneg %p5358_p11  ;;  %p5365_p5 = por %p5364_p7, %p5363_p6 }
  0xcb   : > { %p5366_p1 = pnand %p5365_p5, %p5359_p12 }
  0xcd   : > { %5369 = shalt.err (!%p5366_p1)
}
  0xce   : > { %s7343_s23 = scalar_lea.sflag [#allocation13], %s6155_s26  ;;  %s7344_s13 = sld [smem:[#allocation64_spill]] }
  0xcf   : > { %4805 = dma.hbm_to_vmem [thread:$0]  (!%p6157_p9), %s6223_s21, 16, %s944_s15, %s7343_s23  }
  0xd0   : > { %s970_s20 = scalar_lea.vmem [#allocation15], %s6149_s10 }
  0xd1   : > { %s977_s9 = sshll.u32 %s970_s20, 4  ;;  %s978_s9 = int_to_ptr.vmem [resolvable:$true] %s977_s9 }
  0xd4   : > { %s6249_s29 = scalar_lea.hbm %s7344_s13, %s6152_s4  ;;  %s5375_s21 = scalar_lea.hbm %s7344_s13, 32 }
  0xd5   : > { %s5370_s18 = scalar_lea.hbm %s6249_s29, 16  ;;  %p5376_p0 = scmp.lt.s32.totalorder %s6249_s29, %s7344_s13 }
  0xd6   : > { %p5371_p3 = scmp.ne.s32.totalorder %s6249_s29, %s5370_s18  ;;  %p5377_p2 = scmp.lt.s32.totalorder %s5375_s21, %s5370_s18 }
  0xd8   : > { %p5373_p4 = pnand %p5371_p3, %p6173_p10  ;;  %p5378_p8 = por %p5377_p2, %p5376_p0 }
  0xda   : > { %p5374_p13 = pneg %p5373_p4 }
  0xdc   : > { %p5379_p11 = pnand %p5378_p8, %p5374_p13 }
  0xde   : > { %5382 = shalt.err (!%p5379_p11)
}
  0xdf   : > { %s5383_s1 = scalar_lea.vmem %s978_s9, 16  ;;  %s5868_s11 = smov [#allocation15]  }
  0xe0   : > { %p5384_p12 = scmp.ne.s32.totalorder %s978_s9, %s5383_s1  ;;  %s5388_s20 = sshll.u32 %s5868_s11, 4  ;;  %s5389_s20 = int_to_ptr.vmem [resolvable:$false] %s5388_s20 }
  0xe1   : > { %s5390_s8 = scalar_lea.vmem %s5389_s20, 32  ;;  %p5391_p5 = scmp.lt.s32.totalorder %s978_s9, %s5389_s20 }
  0xe2   : > { %p5386_p6 = pnand %p5384_p12, %p6173_p10  ;;  %p5392_p1 = scmp.lt.s32.totalorder %s5390_s8, %s5383_s1 }
  0xe4   : > { %p5387_p7 = pneg %p5386_p6  ;;  %p5393_p3 = por %p5392_p1, %p5391_p5 }
  0xe6   : > { %p5394_p4 = pnand %p5393_p3, %p5387_p7 }
  0xe8   : > { %5397 = shalt.err (!%p5394_p4)
}
  0xe9   : > { %s7345_s16 = scalar_lea.sflag [#allocation16], %s6155_s26  ;;  %s7346_s21 = sld [smem:[#allocation66_spill]] }
  0xea   : > { %4811 = dma.hbm_to_vmem [thread:$0]  (!%p6157_p9), %s6249_s29, 16, %s978_s9, %s7345_s16  }
  0xeb   : > { %s1008_s8 = scalar_lea.vmem [#allocation18], %s6149_s10 }
  0xec   : > { %s1015_s23 = sshll.u32 %s1008_s8, 4  ;;  %s1016_s23 = int_to_ptr.vmem [resolvable:$true] %s1015_s23 }
  0xef   : > { %s6275_s15 = scalar_lea.hbm %s7346_s21, %s6152_s4  ;;  %s5403_s29 = scalar_lea.hbm %s7346_s21, 32 }
  0xf0   : > { %s5398_s11 = scalar_lea.hbm %s6275_s15, 16  ;;  %p5404_p8 = scmp.lt.s32.totalorder %s6275_s15, %s7346_s21 }
  0xf1   : > { %p5399_p13 = scmp.ne.s32.totalorder %s6275_s15, %s5398_s11  ;;  %p5405_p11 = scmp.lt.s32.totalorder %s5403_s29, %s5398_s11 }
  0xf3   : > { %p5401_p0 = pnand %p5399_p13, %p6173_p10  ;;  %p5406_p12 = por %p5405_p11, %p5404_p8 }
  0xf5   : > { %p5402_p2 = pneg %p5401_p0 }
  0xf7   : > { %p5407_p6 = pnand %p5406_p12, %p5402_p2 }
  0xf9   : > { %5410 = shalt.err (!%p5407_p6)
}
  0xfa   : > { %s5411_s18 = scalar_lea.vmem %s1016_s23, 16  ;;  %s5869_s30 = smov [#allocation18]  }
  0xfb   : > { %p5412_p7 = scmp.ne.s32.totalorder %s1016_s23, %s5411_s18  ;;  %s5416_s8 = sshll.u32 %s5869_s30, 4  ;;  %s5417_s8 = int_to_ptr.vmem [resolvable:$false] %s5416_s8 }
  0xfc   : > { %s5418_s1 = scalar_lea.vmem %s5417_s8, 32  ;;  %p5419_p3 = scmp.lt.s32.totalorder %s1016_s23, %s5417_s8 }
  0xfd   : > { %p5414_p5 = pnand %p5412_p7, %p6173_p10  ;;  %p5420_p4 = scmp.lt.s32.totalorder %s5418_s1, %s5411_s18 }
  0xff   : > { %p5415_p1 = pneg %p5414_p5  ;;  %p5421_p13 = por %p5420_p4, %p5419_p3 }
 0x101   : > { %p5422_p0 = pnand %p5421_p13, %p5415_p1 }
 0x103   : > { %5425 = shalt.err (!%p5422_p0)
}
 0x104   : > { %s7347_s13 = scalar_lea.sflag [#allocation19], %s6155_s26  ;;  %s5870_s11 = smov [#allocation23]  }
 0x105   : > { %4817 = dma.hbm_to_vmem [thread:$0]  (!%p6157_p9), %s6275_s15, 16, %s1016_s23, %s7347_s13  }
 0x106   : > { %s720_s20 = sshll.u32 %s5870_s11, 4  ;;  %s5871_s29 = smov [#allocation26]   ;;  %s721_s20 = int_to_ptr.vmem [resolvable:$true] %s720_s20 }
 0x107   : > { %s747_s9 = sshll.u32 %s5871_s29, 4  ;;  %s5437_s16 = scalar_lea.vmem %s721_s20, 16  ;;  %s748_s9 = int_to_ptr.vmem [resolvable:$true] %s747_s9 }
 0x108   : > { %p5438_p2 = scmp.ne.s32.totalorder %s721_s20, %s5437_s16  ;;  %p7348_p8 = scmp.ne.s32.totalorder %s7326_s6, 0 }
 0x109   : > { %s5444_s1 = scalar_lea.vmem %s721_s20, 32  ;;  %p5445_p6 = scmp.lt.s32.totalorder %s721_s20, %s721_s20 }
 0x10a   : > { %p5440_p11 = pnand %p5438_p2, %p7348_p8  ;;  %p5446_p7 = scmp.lt.s32.totalorder %s5444_s1, %s5437_s16 }
 0x10c   : > { %p5441_p12 = pneg %p5440_p11  ;;  %p5447_p5 = por %p5446_p7, %p5445_p6 }
 0x10e   : > { %p5448_p1 = pnand %p5447_p5, %p5441_p12 }
 0x110   : > { %5451 = shalt.err (!%p5448_p1)
}
 0x111   : > { %p7349_p3 = scmp.ne.s32.totalorder %s7325_s2, 0  ;;  %s7350_s14 = sld [smem:[#allocation69_spill]] }
 0x112   : > { %s5463_s23 = scalar_lea.vmem %s748_s9, 64  ;;  %p5471_p2 = scmp.lt.s32.totalorder %s748_s9, %s748_s9 }
 0x113   : > { %p5464_p4 = scmp.ne.s32.totalorder %s748_s9, %s5463_s23  ;;  %p5472_p11 = scmp.lt.s32.totalorder %s5463_s23, %s5463_s23 }
 0x115   : > { %p5466_p13 = pnand %p5464_p4, %p7348_p8  ;;  %p5473_p9 = por %p5472_p11, %p5471_p2 }
 0x117   : > { %4759 = dma.hbm_to_vmem [thread:$0]  (!%p7349_p3), %s7350_s14, 16, %s721_s20, [#allocation22]  }
 0x118   : > { %p5467_p0 = pneg %p5466_p13 }
 0x11a   : > { %p5474_p10 = pnand %p5473_p9, %p5467_p0 }
 0x11c   : > { %5477 = shalt.err (!%p5474_p10)
}
 0x11d   : > { %s7351_s17 = sld [smem:[#allocation72_spill]]  ;;  %s5872_s13 = smov [#allocation29]  }
 0x11e   : > { %s769_s11 = sshll.u32 %s5872_s13, 4  ;;  %s5873_s20 = smov [#allocation32]   ;;  %s770_s11 = int_to_ptr.vmem [resolvable:$true] %s769_s11 }
 0x11f   : > { %s794_s29 = sshll.u32 %s5873_s20, 4  ;;  %s5489_s16 = scalar_lea.vmem %s770_s11, 64  ;;  %s795_s29 = int_to_ptr.vmem [resolvable:$true] %s794_s29 }
 0x120   : > { %p5490_p12 = scmp.ne.s32.totalorder %s770_s11, %s5489_s16  ;;  %p5497_p5 = scmp.lt.s32.totalorder %s770_s11, %s770_s11 }
 0x121   : > { %p5498_p9 = scmp.lt.s32.totalorder %s5489_s16, %s5489_s16 }
 0x122   : > { %p5492_p6 = pnand %p5490_p12, %p7348_p8 }
 0x123   : > { %4765 = dma.hbm_to_vmem [thread:$0]  (!%p7349_p3), %s7351_s17, 64, %s748_s9, [#allocation25]  }
 0x124   : > { %p5493_p7 = pneg %p5492_p6  ;;  %p5499_p10 = por %p5498_p9, %p5497_p5 }
 0x126   : > { %p5500_p1 = pnand %p5499_p10, %p5493_p7 }
 0x128   : > { %5503 = shalt.err (!%p5500_p1)
}
 0x129   : > { %s7352_s19 = sld [smem:[#allocation74_spill]]  ;;  %s5515_s9 = scalar_lea.vmem %s795_s29, 32 }
 0x12a   : > { %p5516_p4 = scmp.ne.s32.totalorder %s795_s29, %s5515_s9  ;;  %p5523_p2 = scmp.lt.s32.totalorder %s795_s29, %s795_s29 }
 0x12b   : > { %p5524_p11 = scmp.lt.s32.totalorder %s5515_s9, %s5515_s9 }
 0x12c   : > { %p5518_p13 = pnand %p5516_p4, %p7348_p8 }
 0x12d   : > { %p5525_p12 = por %p5524_p11, %p5523_p2 }
 0x12e   : > { %p5519_p0 = pneg %p5518_p13 }
 0x12f   : > { %4771 = dma.hbm_to_vmem [thread:$0]  (!%p7349_p3), %s7352_s19, 64, %s770_s11, [#allocation28]  }
 0x130   : > { %p5526_p6 = pnand %p5525_p12, %p5519_p0 }
 0x132   : > { %5529 = shalt.err (!%p5526_p6)
}
 0x133   : > { %s7353_s22 = sld [smem:[#allocation77_spill]]  ;;  %s5874_s30 = smov [#allocation35]  }
 0x134   : > { %s815_s8 = sshll.u32 %s5874_s30, 4  ;;  %s816_s8 = int_to_ptr.vmem [resolvable:$true] %s815_s8 }
 0x135   : > { %s5541_s13 = scalar_lea.vmem %s816_s8, 2048  ;;  %p5549_p10 = scmp.lt.s32.totalorder %s816_s8, %s816_s8 }
 0x136   : > { %p5542_p7 = scmp.ne.s32.totalorder %s816_s8, %s5541_s13  ;;  %p5550_p1 = scmp.lt.s32.totalorder %s5541_s13, %s5541_s13 }
 0x138   : > { %p5544_p5 = pnand %p5542_p7, %p7348_p8  ;;  %p5551_p4 = por %p5550_p1, %p5549_p10 }
 0x139   : > { %4777 = dma.hbm_to_vmem [thread:$0]  (!%p7349_p3), %s7353_s22, 32, %s795_s29, [#allocation31]  }
 0x13a   : > { %p5545_p9 = pneg %p5544_p5 }
 0x13c   : > { %p5552_p13 = pnand %p5551_p4, %p5545_p9 }
 0x13e   : > { %5555 = shalt.err (!%p5552_p13)
}
 0x13f   : > { %s7289_s11 = smov 64   ;;  %s7291_s20 = smov 4  }
 0x140   : > { %s7354_s24 = sld [smem:[#allocation79_spill]]  ;;  %s5877_s1 = smov [#allocation36]  }
 0x141   : > { %s829_s18 = sshll.u32 %s5877_s1, 4  ;;  %s7355_s23 = sld [smem:[#allocation57_spill]]  ;;  %s830_s18 = int_to_ptr.vmem [resolvable:$true] %s829_s18 }
 0x142   : > { %s5567_s13 = scalar_lea.vmem %s830_s18, 16  ;;  %s5574_s14 = scalar_lea.vmem %s830_s18, 32 }
 0x143   : > { %p5568_p0 = scmp.ne.s32.totalorder %s830_s18, %s5567_s13  ;;  %p5575_p12 = scmp.lt.s32.totalorder %s830_s18, %s830_s18 }
 0x144   : > { %p5576_p6 = scmp.lt.s32.totalorder %s5574_s14, %s5567_s13 }
 0x145   : > { %p5570_p2 = pnand %p5568_p0, %p7348_p8 }
 0x146   : > { %4783 = dma.hbm_to_vmem [thread:$0]  (!%p7349_p3), %s7354_s24, 2048, %s816_s8, [#allocation34], %s7289_s11, %s7289_s11, %s7291_s20  }
 0x147   : > { %s6339_s30 = scalar_lea.hbm %s7355_s23, %s6152_s4  ;;  %p5571_p11 = pneg %p5570_p2 }
 0x148   : > { %p5577_p7 = por %p5576_p6, %p5575_p12 }
 0x14a   : > { %p5578_p5 = pnand %p5577_p7, %p5571_p11 }
 0x14c   : > { %5581 = shalt.err (!%p5578_p5)
}
 0x14d   : > { %s7356_s25 = sld [smem:[#allocation80_spill]]  ;;  %s843_s6 = scalar_lea.vmem [#allocation3], %s6149_s10 }
 0x14e   : > { %s850_s16 = sshll.u32 %s843_s6, 4  ;;  %s6350_s1 = sshll.u32 %s6149_s10, 4  ;;  %s851_s16 = int_to_ptr.vmem [resolvable:$true] %s850_s16 }
 0x14f   : > { %s841_s14 = scalar_lea.sflag [#allocation4], %s6149_s10  ;;  %s5582_s9 = scalar_lea.hbm %s6339_s30, 16 }
 0x150   : > { %p5583_p8 = scmp.ne.s32.totalorder %s6339_s30, %s5582_s9  ;;  %p7357_p9 = scmp.ne.s32.totalorder %s7338_s7, 0 }
 0x151   : > { %s5587_s13 = scalar_lea.hbm %s7355_s23, 32  ;;  %p5588_p4 = scmp.lt.s32.totalorder %s6339_s30, %s7355_s23 }
 0x152   : > { %p5585_p10 = pnand %p5583_p8, %p7357_p9 }
 0x153   : > { %4786 = dma.hbm_to_vmem [thread:$0]  (!%p7349_p3), %s7356_s25, 16, %s830_s18, [#allocation37]  }
 0x154   : > { %p5586_p1 = pneg %p5585_p10  ;;  %p5589_p3 = scmp.lt.s32.totalorder %s5587_s13, %s5582_s9 }
 0x156   : > { %p5590_p13 = por %p5589_p3, %p5588_p4 }
 0x158   : > { %p5591_p0 = pnand %p5590_p13, %p5586_p1 }
 0x15a   : > { %5594 = shalt.err (!%p5591_p0)
}
 0x15b   : > { %s5595_s18 = scalar_lea.vmem %s851_s16, 16  ;;  %s5878_s6 = smov [#allocation3]  }
 0x15c   : > { %p5596_p2 = scmp.ne.s32.totalorder %s851_s16, %s5595_s18  ;;  %s5600_s11 = sshll.u32 %s5878_s6, 4  ;;  %s5601_s11 = int_to_ptr.vmem [resolvable:$false] %s5600_s11 }
 0x15d   : > { %s5602_s20 = scalar_lea.vmem %s5601_s11, 32  ;;  %p5603_p6 = scmp.lt.s32.totalorder %s851_s16, %s5601_s11 }
 0x15e   : > { %p5598_p11 = pnand %p5596_p2, %p7357_p9  ;;  %p5604_p7 = scmp.lt.s32.totalorder %s5602_s20, %s5595_s18 }
 0x160   : > { %p5599_p12 = pneg %p5598_p11  ;;  %p5605_p5 = por %p5604_p7, %p5603_p6 }
 0x162   : > { %p5606_p8 = pnand %p5605_p5, %p5599_p12 }
 0x164   : > { %5609 = shalt.err (!%p5606_p8)
}
 0x165   : > { %p7358_p10 = scmp.ne.s32.totalorder %s7336_s27, 0  ;;  %s6370_s9 = sshll.u32 %s5856_s28, 8 }
 0x166   : > { %s878_s2 = scalar_lea.vmem [#allocation8], %s6350_s1  ;;  %s7359_s29 = sld [smem:[#allocation59_spill]] }
 0x167   : > { %4790 = dma.hbm_to_vmem [thread:$0]  (!%p7358_p10), %s6339_s30, 16, %s851_s16, %s841_s14  }
 0x168   : > { %s885_s15 = sshll.u32 %s878_s2, 4  ;;  %s886_s15 = int_to_ptr.vmem [resolvable:$true] %s885_s15 }
 0x16c   : > { %s6377_s11 = scalar_lea.hbm %s7359_s29, %s6370_s9  ;;  %s5615_s16 = scalar_lea.hbm %s7359_s29, 512 }
 0x16d   : > { %s5610_s20 = scalar_lea.hbm %s6377_s11, 256  ;;  %p5616_p13 = scmp.lt.s32.totalorder %s6377_s11, %s7359_s29 }
 0x16e   : > { %p5611_p1 = scmp.ne.s32.totalorder %s6377_s11, %s5610_s20  ;;  %p5617_p0 = scmp.lt.s32.totalorder %s5615_s16, %s5610_s20 }
 0x170   : > { %p5613_p4 = pnand %p5611_p1, %p7357_p9  ;;  %p5618_p2 = por %p5617_p0, %p5616_p13 }
 0x172   : > { %p5614_p3 = pneg %p5613_p4 }
 0x174   : > { %p5619_p11 = pnand %p5618_p2, %p5614_p3 }
 0x176   : > { %5622 = shalt.err (!%p5619_p11)
}
 0x177   : > { %s5623_s6 = scalar_lea.vmem %s886_s15, 256  ;;  %s5879_s2 = smov [#allocation8]  }
 0x178   : > { %p5624_p12 = scmp.ne.s32.totalorder %s886_s15, %s5623_s6  ;;  %s5628_s13 = sshll.u32 %s5879_s2, 4  ;;  %s5629_s13 = int_to_ptr.vmem [resolvable:$false] %s5628_s13 }
 0x179   : > { %s5630_s8 = scalar_lea.vmem %s5629_s13, 512  ;;  %p5631_p5 = scmp.lt.s32.totalorder %s886_s15, %s5629_s13 }
 0x17a   : > { %p5626_p6 = pnand %p5624_p12, %p7357_p9  ;;  %p5632_p8 = scmp.lt.s32.totalorder %s5630_s8, %s5623_s6 }
 0x17c   : > { %p5627_p7 = pneg %p5626_p6  ;;  %p5633_p1 = por %p5632_p8, %p5631_p5 }
 0x17e   : > { %p5634_p4 = pnand %p5633_p1, %p5627_p7 }
 0x180   : > { %5637 = shalt.err (!%p5634_p4)
}
 0x181   : > { %s7360_s20 = smov 4   ;;  %s7361_s30 = smov 64  }
 0x182   : > { %s7362_s28 = scalar_lea.sflag [#allocation7], %s6155_s26  ;;  %s7363_s18 = sld [smem:[#allocation61_spill]] }
 0x183   : > { %4796 = dma.hbm_to_vmem [thread:$0]  (!%p7358_p10), %s6377_s11, 256, %s886_s15, %s7362_s28, %s7361_s30, %s7361_s30, %s7360_s20  }
 0x184   : > { %s916_s2 = scalar_lea.vmem [#allocation11], %s6350_s1  ;;  %s7364_s19 = sld [smem:[#allocation63_spill]] }
 0x185   : > { %s923_s13 = sshll.u32 %s916_s2, 4  ;;  %s6407_s13 = int_to_ptr.vmem [resolvable:$true] %s923_s13 }
 0x188   : > { %s6404_s6 = scalar_lea.hbm %s7363_s18, %s6370_s9  ;;  %s5643_s28 = scalar_lea.hbm %s7363_s18, 512 }
 0x189   : > { %s5638_s22 = scalar_lea.hbm %s6404_s6, 256  ;;  %p5644_p2 = scmp.lt.s32.totalorder %s6404_s6, %s7363_s18 }
 0x18a   : > { %s6413_s21 = scalar_lea.hbm %s7364_s19, %s6152_s4  ;;  %p5639_p3 = scmp.ne.s32.totalorder %s6404_s6, %s5638_s22 }
 0x18b   : > { %p5645_p11 = scmp.lt.s32.totalorder %s5643_s28, %s5638_s22 }
 0x18c   : > { %p5641_p13 = pnand %p5639_p3, %p7357_p9 }
 0x18d   : > { %p5646_p12 = por %p5645_p11, %p5644_p2 }
 0x18e   : > { %p5642_p0 = pneg %p5641_p13 }
 0x190   : > { %p5647_p6 = pnand %p5646_p12, %p5642_p0 }
 0x192   : > { %5650 = shalt.err (!%p5647_p6)
}
 0x193   : > { %s5651_s17 = scalar_lea.vmem %s6407_s13, 256  ;;  %s5880_s2 = smov [#allocation11]  }
 0x194   : > { %p5652_p7 = scmp.ne.s32.totalorder %s6407_s13, %s5651_s17  ;;  %s5656_s8 = sshll.u32 %s5880_s2, 4  ;;  %s5657_s8 = int_to_ptr.vmem [resolvable:$false] %s5656_s8 }
 0x195   : > { %s5658_s15 = scalar_lea.vmem %s5657_s8, 512  ;;  %p5659_p1 = scmp.lt.s32.totalorder %s6407_s13, %s5657_s8 }
 0x196   : > { %p5654_p5 = pnand %p5652_p7, %p7357_p9  ;;  %p5660_p4 = scmp.lt.s32.totalorder %s5658_s15, %s5651_s17 }
 0x198   : > { %p5655_p8 = pneg %p5654_p5  ;;  %p5661_p3 = por %p5660_p4, %p5659_p1 }
 0x19a   : > { %p5662_p13 = pnand %p5661_p3, %p5655_p8 }
 0x19c   : > { %5665 = shalt.err (!%p5662_p13)
}
 0x19d   : > { %s7365_s22 = scalar_lea.sflag [#allocation10], %s6155_s26  ;;  %s953_s11 = scalar_lea.vmem [#allocation14], %s6149_s10 }
 0x19e   : > { %4802 = dma.hbm_to_vmem [thread:$0]  (!%p7358_p10), %s6404_s6, 256, %s6407_s13, %s7365_s22, %s7361_s30, %s7361_s30, %s7360_s20  }
 0x19f   : > { %s960_s28 = sshll.u32 %s953_s11, 4  ;;  %s7366_s17 = sld [smem:[#allocation65_spill]]  ;;  %s961_s28 = int_to_ptr.vmem [resolvable:$true] %s960_s28 }
 0x1a0   : > { %s5666_s8 = scalar_lea.hbm %s6413_s21, 16  ;;  %s5671_s23 = scalar_lea.hbm %s7364_s19, 32 }
 0x1a1   : > { %p5667_p0 = scmp.ne.s32.totalorder %s6413_s21, %s5666_s8  ;;  %p5672_p12 = scmp.lt.s32.totalorder %s6413_s21, %s7364_s19 }
 0x1a2   : > { %p5673_p6 = scmp.lt.s32.totalorder %s5671_s23, %s5666_s8 }
 0x1a3   : > { %p5669_p2 = pnand %p5667_p0, %p7357_p9 }
 0x1a4   : > { %p5674_p7 = por %p5673_p6, %p5672_p12 }
 0x1a5   : > { %s6445_s2 = scalar_lea.hbm %s7366_s17, %s6370_s9  ;;  %p5670_p11 = pneg %p5669_p2 }
 0x1a7   : > { %p5675_p5 = pnand %p5674_p7, %p5670_p11 }
 0x1a9   : > { %5678 = shalt.err (!%p5675_p5)
}
 0x1aa   : > { %s5679_s6 = scalar_lea.vmem %s961_s28, 16  ;;  %s5881_s9 = smov [#allocation14]  }
 0x1ab   : > { %p5680_p8 = scmp.ne.s32.totalorder %s961_s28, %s5679_s6  ;;  %s5684_s13 = sshll.u32 %s5881_s9, 4  ;;  %s5685_s13 = int_to_ptr.vmem [resolvable:$false] %s5684_s13 }
 0x1ac   : > { %s5686_s22 = scalar_lea.vmem %s5685_s13, 32  ;;  %p5687_p3 = scmp.lt.s32.totalorder %s961_s28, %s5685_s13 }
 0x1ad   : > { %p5682_p1 = pnand %p5680_p8, %p7357_p9  ;;  %p5688_p13 = scmp.lt.s32.totalorder %s5686_s22, %s5679_s6 }
 0x1af   : > { %p5683_p4 = pneg %p5682_p1  ;;  %p5689_p0 = por %p5688_p13, %p5687_p3 }
 0x1b1   : > { %p5690_p2 = pnand %p5689_p0, %p5683_p4 }
 0x1b3   : > { %5693 = shalt.err (!%p5690_p2)
}
 0x1b4   : > { %s7367_s24 = scalar_lea.sflag [#allocation13], %s6155_s26  ;;  %s988_s25 = scalar_lea.vmem [#allocation17], %s6350_s1 }
 0x1b5   : > { %4808 = dma.hbm_to_vmem [thread:$0]  (!%p7358_p10), %s6413_s21, 16, %s961_s28, %s7367_s24  }
 0x1b6   : > { %s995_s23 = sshll.u32 %s988_s25, 4  ;;  %s6472_s16 = scalar_lea.hbm %s7241_s12, %s6152_s4  ;;  %s6466_s23 = int_to_ptr.vmem [resolvable:$true] %s995_s23 }
 0x1b7   : > { %s5694_s14 = scalar_lea.hbm %s6445_s2, 256  ;;  %s5699_s6 = scalar_lea.hbm %s7366_s17, 512 }
 0x1b8   : > { %p5695_p11 = scmp.ne.s32.totalorder %s6445_s2, %s5694_s14  ;;  %p5700_p7 = scmp.lt.s32.totalorder %s6445_s2, %s7366_s17 }
 0x1b9   : > { %p5701_p5 = scmp.lt.s32.totalorder %s5699_s6, %s5694_s14 }
 0x1ba   : > { %p5697_p12 = pnand %p5695_p11, %p7357_p9 }
 0x1bb   : > { %p5702_p8 = por %p5701_p5, %p5700_p7 }
 0x1bc   : > { %p5698_p6 = pneg %p5697_p12 }
 0x1be   : > { %p5703_p1 = pnand %p5702_p8, %p5698_p6 }
 0x1c0   : > { %5706 = shalt.err (!%p5703_p1)
}
 0x1c1   : > { %s5707_s4 = scalar_lea.vmem %s6466_s23, 256  ;;  %s5882_s1 = smov [#allocation17]  }
 0x1c2   : > { %p5708_p4 = scmp.ne.s32.totalorder %s6466_s23, %s5707_s4  ;;  %s5712_s28 = sshll.u32 %s5882_s1, 4  ;;  %s5713_s28 = int_to_ptr.vmem [resolvable:$false] %s5712_s28 }
 0x1c3   : > { %s5714_s13 = scalar_lea.vmem %s5713_s28, 512  ;;  %p5715_p0 = scmp.lt.s32.totalorder %s6466_s23, %s5713_s28 }
 0x1c4   : > { %p5710_p3 = pnand %p5708_p4, %p7357_p9  ;;  %p5716_p2 = scmp.lt.s32.totalorder %s5714_s13, %s5707_s4 }
 0x1c6   : > { %p5711_p13 = pneg %p5710_p3  ;;  %p5717_p11 = por %p5716_p2, %p5715_p0 }
 0x1c8   : > { %p5718_p12 = pnand %p5717_p11, %p5711_p13 }
 0x1ca   : > { %5721 = shalt.err (!%p5718_p12)
}
 0x1cb   : > { %s7368_s22 = scalar_lea.sflag [#allocation16], %s6155_s26  ;;  %s1033_s24 = scalar_lea.vmem [#allocation20], %s6149_s10 }
 0x1cc   : > { %4814 = dma.hbm_to_vmem [thread:$0]  (!%p7358_p10), %s6445_s2, 256, %s6466_s23, %s7368_s22, %s7361_s30, %s7361_s30, %s7360_s20  }
 0x1cd   : > { %s1040_s25 = sshll.u32 %s1033_s24, 4  ;;  %s5722_s18 = scalar_lea.hbm %s6472_s16, 16  ;;  %s1041_s25 = int_to_ptr.vmem [resolvable:$true] %s1040_s25 }
 0x1ce   : > { %p5723_p6 = scmp.ne.s32.totalorder %s6472_s16, %s5722_s18  ;;  %s5727_s8 = scalar_lea.hbm %s7241_s12, 32 }
 0x1cf   : > { %p5728_p8 = scmp.lt.s32.totalorder %s6472_s16, %s7241_s12  ;;  %p5729_p1 = scmp.lt.s32.totalorder %s5727_s8, %s5722_s18 }
 0x1d0   : > { %p5725_p7 = pnand %p5723_p6, %p7357_p9 }
 0x1d1   : > { %p5730_p4 = por %p5729_p1, %p5728_p8 }
 0x1d2   : > { %p5726_p5 = pneg %p5725_p7 }
 0x1d4   : > { %p5731_p3 = pnand %p5730_p4, %p5726_p5 }
 0x1d6   : > { %5734 = shalt.err (!%p5731_p3)
}
 0x1d7   : > { %s5735_s10 = scalar_lea.vmem %s1041_s25, 16  ;;  %s5883_s20 = smov [#allocation20]  }
 0x1d8   : > { %p5736_p13 = scmp.ne.s32.totalorder %s1041_s25, %s5735_s10  ;;  %s5740_s30 = sshll.u32 %s5883_s20, 4  ;;  %s5741_s30 = int_to_ptr.vmem [resolvable:$false] %s5740_s30 }
 0x1d9   : > { %s5742_s2 = scalar_lea.vmem %s5741_s30, 32  ;;  %p5743_p11 = scmp.lt.s32.totalorder %s1041_s25, %s5741_s30 }
 0x1da   : > { %p5738_p0 = pnand %p5736_p13, %p7357_p9  ;;  %p5744_p12 = scmp.lt.s32.totalorder %s5742_s2, %s5735_s10 }
 0x1dc   : > { %p5739_p2 = pneg %p5738_p0  ;;  %p5745_p6 = por %p5744_p12, %p5743_p11 }
 0x1de   : > { %p5746_p7 = pnand %p5745_p6, %p5739_p2 }
 0x1e0   : > { %5749 = shalt.err (!%p5746_p7)
}
 0x1e1   : > { %s7369_s23 = scalar_lea.sflag [#allocation19], %s6155_s26  ;;  %p7370_p5 = scmp.ne.s32.totalorder %s7324_s0, 0 }
 0x1e2   : > { %4820 = dma.hbm_to_vmem [thread:$0]  (!%p7358_p10), %s6472_s16, 16, %s1041_s25, %s7369_s23  }
 0x1e3   : > { %1049 = sbr.rel (%p7370_p5) target bundleno = 4853 (0x12f5), region = 124  ;;  %s6521_s7 = sand.u32 (!%p7370_p5), 1, %s5848_s3  }
 0x1e4   : > { %s1052_s9 = scalar_lea.sflag (!%p7370_p5), [#allocation4], %s6521_s7  ;;  %s1054_s21 = scalar_lea.vmem (!%p7370_p5), [#allocation3], %s6521_s7 }
 0x1e5   : > { %p7371_p9 = scmp.ne.s32.totalorder (!%p7370_p5), %s7335_s5, 0 }
 0x1e8   : > { %5791 = dma.done.wait (%p7371_p9), %s1052_s9, 16  }
 0x1e9   : > { %5793 = vsyncadd (%p7371_p9), %s1052_s9, 4294967280  ;;  %s7372_s27 = sld [smem:[#allocation53_spill]]  ;;  %s1062_s0 = scalar_lea.vmem [#allocation6], %s6521_s7 }
 0x1ef   : > { %s1059_s26 = sand.u32 1, %s7372_s27  }
 0x1f0   : > { %s1060_s16 = scalar_lea.sflag [#allocation7], %s1059_s26 }
 0x1f1   : > { %5795 = dma.done.wait (%p7371_p9), %s1060_s16, 272  }
 0x1f2   : > { %5797 = vsyncadd (%p7371_p9), %s1060_s16, 4294967024  ;;  %s6536_s4 = sshll.u32 %s6521_s7, 4  ;;  %s1077_s28 = scalar_lea.sflag [#allocation10], %s1059_s26 }
 0x1f3   : > { %s1071_s1 = scalar_lea.vmem [#allocation8], %s6536_s4  ;;  %s1079_s13 = scalar_lea.vmem [#allocation9], %s6521_s7 }
 0x1f4   : > { %5799 = dma.done.wait (%p7371_p9), %s1077_s28, 272  }
 0x1f5   : > { %5801 = vsyncadd (%p7371_p9), %s1077_s28, 4294967024  ;;  %s1088_s22 = scalar_lea.vmem [#allocation11], %s6536_s4  ;;  %s1094_s24 = scalar_lea.sflag [#allocation13], %s1059_s26 }
 0x1f6   : > { %s1096_s25 = scalar_lea.vmem [#allocation12], %s6521_s7 }
 0x1f7   : > { %5803 = dma.done.wait (%p7371_p9), %s1094_s24, 32  }
 0x1f8   : > { %5805 = vsyncadd (%p7371_p9), %s1094_s24, 4294967264  ;;  %s1104_s18 = scalar_lea.vmem [#allocation14], %s6521_s7  ;;  %s1110_s11 = scalar_lea.sflag [#allocation16], %s1059_s26 }
 0x1f9   : > { %s1112_s14 = scalar_lea.vmem [#allocation15], %s6521_s7 }
 0x1fa   : > { %5807 = dma.done.wait (%p7371_p9), %s1110_s11, 272  }
 0x1fb   : > { %5809 = vsyncadd (%p7371_p9), %s1110_s11, 4294967024  ;;  %s1121_s8 = scalar_lea.vmem [#allocation17], %s6536_s4  ;;  %s1127_s15 = scalar_lea.sflag [#allocation19], %s1059_s26 }
 0x1fc   : > { %s1129_s6 = scalar_lea.vmem [#allocation18], %s6521_s7 }
 0x1fd   : > { %5811 = dma.done.wait (%p7371_p9), %s1127_s15, 32  }
 0x1fe   : > { %5813 = vsyncadd (%p7371_p9), %s1127_s15, 4294967264  ;;  %s1137_s10 = scalar_lea.vmem [#allocation20], %s6521_s7  ;;  %p7373_p10 = scmp.eq.s32.totalorder %s7372_s27, 0 }
 0x200   : > { %5815 = dma.done.wait (%p7373_p10), [#allocation22], 32   ;;  %p7374_p8 = pmov %p7373_p10 }
 0x202   : > { %5817 = vsyncadd (%p7374_p8), [#allocation22], 4294967264  ;;  %p7375_p1 = pmov %p7374_p8 }
 0x204   : > { %5819 = dma.done.wait (%p7375_p1), [#allocation25], 1088   ;;  %p7376_p4 = pmov %p7375_p1 }
 0x205   : > { %p7377_p3 = pmov %p7375_p1 }
 0x206   : > { %5821 = vsyncadd (%p7376_p4), [#allocation25], 4294966208 }
 0x207   : > { %5823 = dma.done.wait (%p7377_p3), [#allocation28], 128   ;;  %p7378_p13 = pmov %p7375_p1 }
 0x208   : > { %p7379_p0 = pmov %p7375_p1 }
 0x209   : > { %5825 = vsyncadd (%p7378_p13), [#allocation28], 4294967168 }
 0x20a   : > { %5827 = dma.done.wait (%p7379_p0), [#allocation31], 64   ;;  %p7380_p2 = pmov %p7379_p0 }
 0x20b   : > { %p7381_p11 = pmov %p7379_p0 }
 0x20c   : > { %5829 = vsyncadd (%p7380_p2), [#allocation31], 4294967232 }
 0x20d   : > { %5831 = dma.done.wait (%p7381_p11), [#allocation34], 2080   ;;  %p7382_p12 = pmov %p7379_p0 }
 0x20e   : > { %p7383_p6 = pmov %p7379_p0 }
 0x20f   : > { %5833 = vsyncadd (%p7382_p12), [#allocation34], 4294965216 }
 0x210   : > { %5835 = dma.done.wait (%p7383_p6), [#allocation37], 16   ;;  %p7384_p7 = pmov %p7379_p0 }
 0x211   : > { %p1292_p5 = scmp.lt.s32.totalorder %s7372_s27, 1  ;;  %s7385_s23 = sld [smem:[#allocation67_spill]] }
 0x212   : > { %5837 = vsyncadd (%p7384_p7), [#allocation37], 4294967280  ;;  %p7386_p9 = scmp.ne.s32.totalorder %s7372_s27, 0 }
 0x213   : > { %s1293_s5 = scalar_select %p1292_p5, %s7372_s27, 1 }
 0x214   : > { %1301 = sbr.rel (%p7386_p9) target bundleno = 541 (0x21d), region = 216  ;;  %s7387_s28 = sld [smem:[#allocation56_spill]] (!%p7386_p9) }
 0x215   : > { %s4470_s20 = sshll.u32 %s1293_s5, 6 }
 0x217   : > { %s6592_s9 = scalar_lea.vmem %s7385_s23, %s4470_s20 }
 0x219   : > { %vm1304_vm0 = vcmask 261120  }
 0x21a   : > { %s7388_s24 = smov %s7387_s28  ;;  %v1302_v0 = vld [vmem:[%s7387_s28] sm:$0xff] }
 0x21b   : > { %v1303_v1 = vld [vmem:[%s7388_s24 + $0x8] sm:$0xff]  ;;  %1305 = vst.msk [vmem:[#allocation2] sm:$0xff] %vm1304_vm0, %v1302_v0 }
 0x21c   : > { %1306 = vst.msk [vmem:[#allocation2 + $0x8] sm:$0xff] %vm1304_vm0, %v1303_v1 }
 0x21d PF: > { %vm1311_vm1 = vcmask 261120   ;;  %v4937_v16 = vld [vmem:[%s1071_s1 + $0x8] sm:$0xff]   ;;  %v5884_v17 = vmov 0.0   ;;  %vm5885_vm2 = vmmov 0   ;;  %v4938_v18 = vld [vmem:[%s1071_s1] sm:$0xff]   ;;  %s5887_s27 = smov 120  }
 0x21e   : > { %4543 = vmatprep.subr.bf16.mxu0 %v5884_v17  ;;  %4547 = vmatprep.mubr.msk.bf16.mxu0 %vm5885_vm2, %v5884_v17  ;;  %v4328_v27 = vld [vmem:[%s1054_s21] ss:$0 sm:$0xff]  ;;  %s5886_s21 = smov 112   ;;  %s5889_s1 = smov 96   ;;  %vm1454_vm3 = vcmask 64512   ;;  %vm1960_vm4 = vcmask 1043456  }
 0x21f   : > { %4544 = vmatpush3.bf16.msra.mxu0 %v4937_v16  ;;  %4563 = vmatprep.subr.bf16.mxu1 %v5884_v17  ;;  %v4329_v31 = vld [vmem:[%s1062_s0] ss:$0 sm:$0xff]  ;;  %s5888_s0 = smov 104   ;;  %s5891_s5 = smov 8   ;;  %vm2353_vm6 = vcmask 130048   ;;  %vm2355_vm7 = vcmask 195584  }
 0x220   : > { %4545 = vmatprep.subr.bf16.mxu0 %v5884_v17  ;;  %4565 = vmatprep.mubr.msk.bf16.mxu1 %vm5885_vm2, %v5884_v17  ;;  %v4330_v37 = vld [vmem:[%s1079_s13] ss:$0 sm:$0xff]  ;;  %s5890_s13 = smov 64   ;;  %s5892_s20 = smov 16  }
 0x221   : > { %s5893_s30 = smov 24   ;;  %s7391_s4 = sld [smem:[#allocation53_spill]] }
 0x222   : > { %v6602_v2 = vld [vmem:[#allocation2] sm:$0xff] }
 0x223   : > { %v6604_v3 = vld [vmem:[#allocation2 + $0x8] sm:$0xff]  ;;  %v1312_v4 = vsel %vm1311_vm1, %v6602_v2, 0.0  ;;  %4546 = vmatpush3.bf16.msra.mxu0 %v4938_v18  ;;  %v1844_v18 = vlaneseq }
 0x224   : > { %v1315_v5 = vsel %vm1311_vm1, %v6604_v3, 0.0  ;;  %1313 = vadd.xlane.f32.xlu0 %v1312_v4  ;;  %4551 = vmatprep.subr.bf16.mxu0 %v5884_v17 }
 0x227   : > { %p4369_p10 = scmp.ne.s32.totalorder %s7391_s4, 1 }
 0x228   : > { %1316 = vadd.xlane.f32.xlu0 %v1315_v5 }
 0x2ad   : > { %v1314_v6 = vpop.xlane.xlu0 %1313 }
 0x2ae   : > { %v1319_v7 = vmul.f32 0.03125, %v1314_v6 }
 0x2b0   : > { %v1321_v8 = vsub.f32 %v6602_v2, %v1319_v7 }
 0x2b1   : > { %v1317_v9 = vpop.xlane.xlu0 %1316 }
 0x2b2   : > { %v1320_v10 = vmul.f32 0.03125, %v1317_v9  ;;  %v1323_v11 = vmul.f32 %v1321_v8, %v1321_v8 }
 0x2b4   : > { %v1322_v12 = vsub.f32 %v6604_v3, %v1320_v10  ;;  %v1325_v13 = vsel %vm1311_vm1, %v1323_v11, 0.0 }
 0x2b5   : > { %1326 = vadd.xlane.f32.xlu1 %v1325_v13 }
 0x2b6   : > { %v1324_v14 = vmul.f32 %v1322_v12, %v1322_v12 }
 0x2b8   : > { %v1328_v15 = vsel %vm1311_vm1, %v1324_v14, 0.0 }
 0x2b9   : > { %1329 = vadd.xlane.f32.xlu1 %v1328_v15 }
 0x33e   : > { %v1327_v19 = vpop.xlane.xlu1 %1326 }
 0x33f   : > { %v1331_v20 = vmul.f32 0.03125, %v1327_v19  ;;  %v6706_v19 = vshrl.u32 %v1844_v18, 7 }
 0x341   : > { %v1333_v21 = vadd.f32 1e-05, %v1331_v20  ;;  %v1847_v20 = vand.u32 127, %v1844_v18 }
 0x342   : > { %v1330_v22 = vpop.xlane.xlu1 %1329 }
 0x343   : > { %4951 = vrsqrt.f32 %v1333_v21  ;;  %v1332_v23 = vmul.f32 0.03125, %v1330_v22  ;;  %vm6709_vm5 = vcmp.ge.s32.totalorder %v6706_v19, %v1847_v20 }
 0x345   : > { %v1334_v24 = vadd.f32 1e-05, %v1332_v23 }
 0x347   : > { %4953 = vrsqrt.f32 %v1334_v24 }
 0x350   : > { %v4952_v25 = vpop.eup %4951 }
 0x351   : > { %v1337_v26 = vmul.f32 %v4952_v25, %v1321_v8 }
 0x353   : > { %v1345_v30 = vmul.f32 %v4328_v27, %v1337_v26 }
 0x354   : > { %v4954_v28 = vpop.eup %4953 }
 0x355   : > { %v1338_v29 = vmul.f32 %v4954_v28, %v1322_v12  ;;  %v1353_v33 = vadd.f32 %v4329_v31, %v1345_v30 }
 0x357   : > { %v1346_v32 = vmul.f32 %v4328_v27, %v1338_v29 }
 0x359   : > { %v1354_v34 = vadd.f32 %v4329_v31, %v1346_v32 }
 0x35b   : > { %v1355_v35 = vpack.c.bf16 %v1354_v34, %v1353_v33 }
 0x35d   : > { %4548 = vmatmul.mubr.msk.bf16.vlgmr.msra.gmra.mxu0 %vm1311_vm1, %v1355_v35 }
 0x35e   : > { %4553 = vmatprep.mubr.msk.bf16.mxu0 %vm5885_vm2, %v5884_v17 }
 0x41d   : > { %v1416_v36 = vpop.f32.mrf.mxu0 }
 0x41e   : > { %v1417_v40 = vadd.f32 %v4330_v37, %v1416_v36 }
 0x41f   : > { %v4549_v38 = vpop.f32.mrf.mxu0 }
 0x420   : > { %v1443_v45 = vpack.c.bf16 %v1417_v40, %v1417_v40 }
 0x421   : > { %v1419_v39 = vpop.f32.mrf.mxu0 }
 0x422   : > { %v1420_v41 = vadd.f32 %v4330_v37, %v1419_v39 }
 0x423   : > { %v4550_v42 = vpop.f32.mrf.mxu0 }
 0x424   : > { %v4912_v43 = vpack.i.bf16 %v1420_v41, %v1417_v40  ;;  %v6635_v44 = vpack.c.bf16 %v1420_v41, %v1420_v41 }
 0x426   : > { %4913 = vrot.lane.b32.xlu1 %v4912_v43, %s5886_s21  ;;  %4908 = vrot.lane.b32.xlu0 %v4912_v43, %s5887_s27 }
 0x42a   : > { %4918 = vrot.lane.b32.xlu1 %v4912_v43, %s5888_s0  ;;  %1502 = vrot.lane.b32.xlu0 %v6635_v44, %s5889_s1 }
 0x42e   : > { %1452 = vrot.lane.b32.xlu1 %v1443_v45, %s5889_s1 }
 0x498   : > { %v4914_v46 = vpop.permute.xlu1 %4913  ;;  %v4909_v47 = vpop.permute.xlu0 %4908 }
 0x499   : > { %v4911_v48 = vunpack.i.h.bf16 %v4909_v47  ;;  %v4910_v49 = vunpack.i.l.bf16 %v4909_v47  ;;  %v4916_v50 = vunpack.i.h.bf16 %v4914_v46  ;;  %v4915_v51 = vunpack.i.l.bf16 %v4914_v46 }
 0x49b   : > { %v6638_v52 = vpack.c.bf16 %v4911_v48, %v4911_v48  ;;  %v6640_v53 = vpack.c.bf16 %v4910_v49, %v4910_v49  ;;  %v6644_v55 = vpack.c.bf16 %v4916_v50, %v4916_v50  ;;  %v6646_v56 = vpack.c.bf16 %v4915_v51, %v4915_v51 }
 0x49c   : > { %v4919_v54 = vpop.permute.xlu1 %4918  ;;  %v1503_v63 = vpop.permute.xlu0 %1502 }
 0x49d   : > { %1551 = vrot.lane.b32.xlu1 %v6640_v53, %s5889_s1  ;;  %1600 = vrot.lane.b32.xlu0 %v6638_v52, %s5889_s1  ;;  %v4921_v57 = vunpack.i.h.bf16 %v4919_v54  ;;  %v4920_v58 = vunpack.i.l.bf16 %v4919_v54  ;;  %v1508_v0 = vsel %vm1454_vm3, %v1503_v63, 0 }
 0x49f   : > { %v6651_v61 = vpack.c.bf16 %v4921_v57, %v4921_v57  ;;  %v6653_v62 = vpack.c.bf16 %v4920_v58, %v4920_v58 }
 0x4a0   : > { %v1453_v59 = vpop.permute.xlu1 %1452 }
 0x4a1   : > { %v1459_v60 = vsel %vm1454_vm3, %v1453_v59, 0  ;;  %1649 = vrot.lane.b32.xlu1 %v6646_v56, %s5889_s1  ;;  %1698 = vrot.lane.b32.xlu0 %v6644_v55, %s5889_s1 }
 0x4a2   : > { %4552 = vmatpush3.bf16.xpose.msra.mxu0 %v1459_v60 }
 0x4a3   : > { %4557 = vmatprep.subr.bf16.mxu0 %v5884_v17 }
 0x4a5   : > { %1747 = vrot.lane.b32.xlu1 %v6653_v62, %s5889_s1  ;;  %1796 = vrot.lane.b32.xlu0 %v6651_v61, %s5889_s1 }
 0x4a9   : > { %4554 = vmatmul.mubr.msk.bf16.vlgmr.msra.gmra.mxu0 %vm1454_vm3, %v1443_v45  ;;  %1955 = vrot.lane.b32.xlu1 %v1443_v45, %s5890_s13 }
 0x4aa   : > { %4558 = vmatpush3.bf16.xpose.msra.mxu0 %v1508_v0  ;;  %4559 = vmatprep.mubr.msk.bf16.mxu0 %vm5885_vm2, %v5884_v17 }
 0x4ab   : > { %4569 = vmatprep.subr.bf16.mxu0 %v5884_v17 }
 0x4b1   : > { %4560 = vmatmul.mubr.msk.bf16.vlgmr.msra.gmra.mxu0 %vm1454_vm3, %v6635_v44 }
 0x4b2   : > { %4571 = vmatprep.mubr.msk.bf16.mxu0 %vm5885_vm2, %v5884_v17 }
 0x50f   : > { %v1552_v1 = vpop.permute.xlu1 %1551  ;;  %v1601_v4 = vpop.permute.xlu0 %1600 }
 0x510   : > { %v1606_v5 = vsel %vm1454_vm3, %v1601_v4, 0  ;;  %v1557_v6 = vsel %vm1454_vm3, %v1552_v1, 0 }
 0x511   : > { %4564 = vmatpush3.bf16.xpose.msra.mxu1 %v1557_v6  ;;  %4570 = vmatpush3.bf16.xpose.msra.mxu0 %v1606_v5 }
 0x512   : > { %4575 = vmatprep.subr.bf16.mxu1 %v5884_v17  ;;  %4581 = vmatprep.subr.bf16.mxu0 %v5884_v17 }
 0x513   : > { %v1650_v7 = vpop.permute.xlu1 %1649  ;;  %v1699_v8 = vpop.permute.xlu0 %1698 }
 0x514   : > { %v1655_v9 = vsel %vm1454_vm3, %v1650_v7, 0  ;;  %v1704_v10 = vsel %vm1454_vm3, %v1699_v8, 0 }
 0x517   : > { %v1748_v11 = vpop.permute.xlu1 %1747  ;;  %v1797_v12 = vpop.permute.xlu0 %1796 }
 0x518   : > { %4566 = vmatmul.mubr.msk.bf16.vlgmr.msra.gmra.mxu1 %vm1454_vm3, %v6640_v53  ;;  %4572 = vmatmul.mubr.msk.bf16.vlgmr.msra.gmra.mxu0 %vm1454_vm3, %v6638_v52  ;;  %v1753_v13 = vsel %vm1454_vm3, %v1748_v11, 0  ;;  %v1802_v14 = vsel %vm1454_vm3, %v1797_v12, 0 }
 0x519   : > { %4576 = vmatpush3.bf16.xpose.msra.mxu1 %v1655_v9  ;;  %4582 = vmatpush3.bf16.xpose.msra.mxu0 %v1704_v10 }
 0x51a   : > { %4577 = vmatprep.mubr.msk.bf16.mxu1 %vm5885_vm2, %v5884_v17  ;;  %4583 = vmatprep.mubr.msk.bf16.mxu0 %vm5885_vm2, %v5884_v17 }
 0x51b   : > { %4587 = vmatprep.subr.bf16.mxu1 %v5884_v17  ;;  %4593 = vmatprep.subr.bf16.mxu0 %v5884_v17  ;;  %v1956_v15 = vpop.permute.xlu1 %1955 }
 0x51c   : > { %v1962_v16 = vsel %vm1960_vm4, %v1956_v15, 0 }
 0x520   : > { %4578 = vmatmul.mubr.msk.bf16.vlgmr.msra.gmra.mxu1 %vm1454_vm3, %v6646_v56  ;;  %4584 = vmatmul.mubr.msk.bf16.vlgmr.msra.gmra.mxu0 %vm1454_vm3, %v6644_v55 }
 0x521   : > { %4588 = vmatpush3.bf16.xpose.msra.mxu1 %v1753_v13  ;;  %4594 = vmatpush3.bf16.xpose.msra.mxu0 %v1802_v14 }
 0x522   : > { %4589 = vmatprep.mubr.msk.bf16.mxu1 %vm5885_vm2, %v5884_v17  ;;  %4595 = vmatprep.mubr.msk.bf16.mxu0 %vm5885_vm2, %v5884_v17 }
 0x523   : > { %4599 = vmatprep.subr.bf16.mxu1 %v5884_v17  ;;  %4605 = vmatprep.subr.bf16.mxu0 %v5884_v17 }
 0x528   : > { %4590 = vmatmul.mubr.msk.bf16.vlgmr.msra.gmra.mxu1 %vm1454_vm3, %v6653_v62  ;;  %4596 = vmatmul.mubr.msk.bf16.vlgmr.msra.gmra.mxu0 %vm1454_vm3, %v6651_v61 }
 0x529   : > { %4600 = vmatpush3.bf16.msra.mxu1 %v1962_v16  ;;  %4607 = vmatprep.mubr.msk.bf16.mxu0 %vm5885_vm2, %v5884_v17 }
 0x52a   : > { %4601 = vmatprep.mubr.msk.bf16.mxu1 %vm5885_vm2, %v5884_v17  ;;  %4611 = vmatprep.subr.bf16.mxu1 %v5884_v17 }
 0x569   : > { %v1495_v22 = vpop.f32.mrf.mxu0 }
 0x56a   : > { %v6715_v23 = vsel %vm6709_vm5, %v1495_v22, -1e+30 }
 0x56b   : > { %v4555_v24 = vpop.f32.mrf.mxu0  ;;  %v1859_v25 = vsel %vm1454_vm3, %v6715_v23, -inf }
 0x56c   : > { %1860 = vmax.xlane.f32.xlu1 %v1859_v25 }
 0x56d   : > { %v1498_v26 = vpop.f32.mrf.mxu0 }
 0x56f   : > { %v4556_v27 = vpop.f32.mrf.mxu0 }
 0x571   : > { %v1544_v28 = vpop.f32.mrf.mxu0 }
 0x572   : > { %v1852_v29 = vsel %vm6709_vm5, %v1544_v28, -1e+30 }
 0x573   : > { %v4561_v30 = vpop.f32.mrf.mxu0  ;;  %v1862_v31 = vsel %vm1454_vm3, %v1852_v29, -inf }
 0x574   : > { %1863 = vmax.xlane.f32.xlu0 %v1862_v31 }
 0x575   : > { %v1547_v32 = vpop.f32.mrf.mxu0 }
 0x577   : > { %v4562_v33 = vpop.f32.mrf.mxu0 }
 0x5d8   : > { %v1593_v34 = vpop.f32.mrf.mxu1  ;;  %v1642_v35 = vpop.f32.mrf.mxu0 }
 0x5d9   : > { %v1853_v36 = vsel %vm6709_vm5, %v1593_v34, -1e+30  ;;  %v1854_v40 = vsel %vm6709_vm5, %v1642_v35, -1e+30 }
 0x5da   : > { %v4567_v37 = vpop.f32.mrf.mxu1  ;;  %v4573_v38 = vpop.f32.mrf.mxu0  ;;  %v1865_v39 = vsel %vm1454_vm3, %v1853_v36, -inf  ;;  %v1868_v46 = vsel %vm1454_vm3, %v1854_v40, -inf }
 0x5db   : > { %1866 = vmax.xlane.f32.xlu0 %v1865_v39 }
 0x5dc   : > { %v1596_v41 = vpop.f32.mrf.mxu1  ;;  %v1645_v42 = vpop.f32.mrf.mxu0 }
 0x5de   : > { %v4568_v43 = vpop.f32.mrf.mxu1  ;;  %v4574_v45 = vpop.f32.mrf.mxu0 }
 0x5df   : > { %1869 = vmax.xlane.f32.xlu0 %v1868_v46 }
 0x5e0   : > { %v1691_v47 = vpop.f32.mrf.mxu1  ;;  %v1740_v48 = vpop.f32.mrf.mxu0 }
 0x5e1   : > { %v1855_v49 = vsel %vm6709_vm5, %v1691_v47, -1e+30  ;;  %v6732_v50 = vsel %vm6709_vm5, %v1740_v48, -1e+30 }
 0x5e2   : > { %v4579_v51 = vpop.f32.mrf.mxu1  ;;  %v4585_v54 = vpop.f32.mrf.mxu0  ;;  %v1871_v57 = vsel %vm1454_vm3, %v1855_v49, -inf  ;;  %v1874_v58 = vsel %vm1454_vm3, %v6732_v50, -inf }
 0x5e3   : > { %1872 = vmax.xlane.f32.xlu1 %v1871_v57  ;;  %1875 = vmax.xlane.f32.xlu0 %v1874_v58 }
 0x5e4   : > { %v1694_v59 = vpop.f32.mrf.mxu1  ;;  %v1743_v60 = vpop.f32.mrf.mxu0 }
 0x5e6   : > { %v4580_v63 = vpop.f32.mrf.mxu1  ;;  %v4586_v0 = vpop.f32.mrf.mxu0 }
 0x5e8   : > { %v1789_v1 = vpop.f32.mrf.mxu1  ;;  %v1838_v4 = vpop.f32.mrf.mxu0 }
 0x5e9   : > { %v1857_v5 = vsel %vm6709_vm5, %v1789_v1, -1e+30  ;;  %v6741_v6 = vsel %vm6709_vm5, %v1838_v4, -1e+30 }
 0x5ea   : > { %v4591_v7 = vpop.f32.mrf.mxu1  ;;  %v4597_v8 = vpop.f32.mrf.mxu0  ;;  %v1877_v9 = vsel %vm1454_vm3, %v1857_v5, -inf  ;;  %v1880_v10 = vsel %vm1454_vm3, %v6741_v6, -inf }
 0x5eb   : > { %1878 = vmax.xlane.f32.xlu1 %v1877_v9  ;;  %1881 = vmax.xlane.f32.xlu0 %v1880_v10 }
 0x5ec   : > { %v1792_v11 = vpop.f32.mrf.mxu1  ;;  %v1841_v12 = vpop.f32.mrf.mxu0 }
 0x5ee   : > { %v4592_v13 = vpop.f32.mrf.mxu1  ;;  %v4598_v14 = vpop.f32.mrf.mxu0 }
 0x5f5   : > { %v1861_v18 = vpop.xlane.xlu1 %1860 }
 0x5f6   : > { %v1883_v20 = vsub.f32 %v6715_v23, %v1861_v18 }
 0x5f8   : > { %v1891_v22 = vmul.f32 1.442695, %v1883_v20 }
 0x5fc   : > { %2052 = vrot.lane.b32.xlu1 %v6640_v53, %s5890_s13 }
 0x5fd   : > { %v1864_v15 = vpop.xlane.xlu0 %1863 }
 0x5fe   : > { %v1884_v16 = vsub.f32 %v1852_v29, %v1864_v15 }
 0x600   : > { %2100 = vrot.lane.b32.xlu1 %v6638_v52, %s5890_s13  ;;  %v1893_v21 = vmul.f32 1.442695, %v1884_v16 }
 0x601   : > { %2004 = vrot.lane.b32.xlu0 %v6635_v44, %s5890_s13 }
 0x602   : > { %4955 = vpow2.f32 %v1893_v21 }
 0x603   : > { %4957 = vpow2.f32 %v1891_v22 }
 0x60f   : > { %v4956_v24 = vpop.eup %4955 }
 0x610   : > { %v1910_v25 = vsel %vm1454_vm3, %v4956_v24, 0.0  ;;  %v6754_v26 = vpop.eup %4957 }
 0x611   : > { %v1907_v52 = vsel %vm1454_vm3, %v6754_v26, 0.0 }
 0x620   : > { %1911 = vadd.xlane.f32.xlu0 %v1910_v25 }
 0x624   : > { %1908 = vadd.xlane.f32.xlu1 %v1907_v52 }
 0x635   : > { %2148 = vrot.lane.b32.xlu1 %v6646_v56, %s5890_s13 }
 0x664   : > { %v1867_v44 = vpop.xlane.xlu0 %1866 }
 0x665   : > { %v1885_v53 = vsub.f32 %v1853_v36, %v1867_v44 }
 0x667   : > { %v1895_v23 = vmul.f32 1.442695, %v1885_v53 }
 0x668   : > { %v1870_v27 = vpop.xlane.xlu0 %1869 }
 0x669   : > { %4959 = vpow2.f32 %v1895_v23  ;;  %v1886_v28 = vsub.f32 %v1854_v40, %v1870_v27 }
 0x66b   : > { %v1897_v29 = vmul.f32 1.442695, %v1886_v28 }
 0x66c   : > { %v1873_v30 = vpop.xlane.xlu1 %1872  ;;  %v1876_v33 = vpop.xlane.xlu0 %1875 }
 0x66d   : > { %4961 = vpow2.f32 %v1897_v29  ;;  %v1887_v31 = vsub.f32 %v1855_v49, %v1873_v30  ;;  %v1888_v48 = vsub.f32 %v6732_v50, %v1876_v33 }
 0x66f   : > { %v1899_v32 = vmul.f32 1.442695, %v1887_v31  ;;  %v1901_v49 = vmul.f32 1.442695, %v1888_v48 }
 0x671   : > { %4963 = vpow2.f32 %v1899_v32 }
 0x674   : > { %v1879_v34 = vpop.xlane.xlu1 %1878  ;;  %v1882_v35 = vpop.xlane.xlu0 %1881 }
 0x675   : > { %v1889_v37 = vsub.f32 %v1857_v5, %v1879_v34  ;;  %v1890_v51 = vsub.f32 %v6741_v6, %v1882_v35 }
 0x676   : > { %v6760_v38 = vpop.eup %4959 }
 0x677   : > { %v1903_v39 = vmul.f32 1.442695, %v1889_v37  ;;  %v1913_v56 = vsel %vm1454_vm3, %v6760_v38, 0.0  ;;  %v1905_v54 = vmul.f32 1.442695, %v1890_v51 }
 0x678   : > { %1914 = vadd.xlane.f32.xlu1 %v1913_v56  ;;  %v2005_v36 = vpop.permute.xlu0 %2004  ;;  %v2053_v57 = vpop.permute.xlu1 %2052 }
 0x679   : > { %4965 = vpow2.f32 %v1903_v39  ;;  %v2010_v40 = vsel %vm1960_vm4, %v2005_v36, 0  ;;  %v2058_v9 = vsel %vm1960_vm4, %v2053_v57, 0 }
 0x67a   : > { %v6765_v41 = vpop.eup %4961  ;;  %4606 = vmatpush3.bf16.msra.mxu0 %v2010_v40  ;;  %4967 = vpow2.f32 %v1901_v49 }
 0x67b   : > { %v1916_v42 = vsel %vm1454_vm3, %v6765_v41, 0.0  ;;  %4617 = vmatprep.subr.bf16.mxu0 %v5884_v17  ;;  %4969 = vpow2.f32 %v1905_v54 }
 0x67c   : > { %1917 = vadd.xlane.f32.xlu0 %v1916_v42  ;;  %v2101_v58 = vpop.permute.xlu1 %2100 }
 0x67d   : > { %v2106_v6 = vsel %vm1960_vm4, %v2101_v58, 0 }
 0x67e   : > { %v6770_v43 = vpop.eup %4963 }
 0x67f   : > { %v1919_v45 = vsel %vm1454_vm3, %v6770_v43, 0.0 }
 0x680   : > { %1920 = vadd.xlane.f32.xlu1 %v1919_v45 }
 0x686   : > { %v6774_v46 = vpop.eup %4965 }
 0x687   : > { %v1925_v47 = vsel %vm1454_vm3, %v6774_v46, 0.0  ;;  %v6784_v60 = vpop.eup %4967 }
 0x688   : > { %1926 = vadd.xlane.f32.xlu1 %v1925_v47  ;;  %v6788_v50 = vpop.eup %4969 }
 0x692   : > { %2196 = vrot.lane.b32.xlu0 %v6644_v55, %s5890_s13  ;;  %v1922_v55 = vsel %vm1454_vm3, %v6784_v60, 0.0 }
 0x699   : > { %2244 = vrot.lane.b32.xlu1 %v6653_v62, %s5890_s13  ;;  %v1928_v62 = vsel %vm1454_vm3, %v6788_v50, 0.0 }
 0x6a9   : > { %v1912_v59 = vpop.xlane.xlu0 %1911 }
 0x6aa   : > { %4971 = vrcp.f32 %v1912_v59 }
 0x6ad   : > { %v1909_v63 = vpop.xlane.xlu1 %1908 }
 0x6ae   : > { %4973 = vrcp.f32 %v1909_v63 }
 0x6b1   : > { %1923 = vadd.xlane.f32.xlu0 %v1922_v55  ;;  %v2149_v10 = vpop.permute.xlu1 %2148 }
 0x6b2   : > { %v2154_v21 = vsel %vm1960_vm4, %v2149_v10, 0 }
 0x6b5   : > { %1929 = vadd.xlane.f32.xlu0 %v1928_v62 }
 0x6b7   : > { %v4972_v0 = vpop.eup %4971 }
 0x6b8   : > { %v1940_v1 = vmul.f32 %v4972_v0, %v4956_v24 }
 0x6ba   : > { %v1948_v4 = vpack.c.bf16 %v1940_v1, %v1940_v1 }
 0x6bb   : > { %v4974_v5 = vpop.eup %4973 }
 0x6bc   : > { %4608 = vmatmul.mubr.msk.bf16.vlgmr.msra.gmra.mxu0 %vm1454_vm3, %v1948_v4  ;;  %v1939_v7 = vmul.f32 %v4974_v5, %v6754_v26 }
 0x6bd   : > { %4618 = vmatpush3.bf16.msra.mxu0 %v2106_v6  ;;  %4619 = vmatprep.mubr.msk.bf16.mxu0 %vm5885_vm2, %v5884_v17 }
 0x6be   : > { %v1947_v8 = vpack.c.bf16 %v1939_v7, %v1939_v7  ;;  %4629 = vmatprep.subr.bf16.mxu0 %v5884_v17  ;;  %v4939_v7 = vld [vmem:[%s1088_s22 + $0x8] sm:$0xff]  }
 0x6c0   : > { %4602 = vmatmul.mubr.msk.bf16.vlgmr.msra.gmra.mxu1 %vm1454_vm3, %v1947_v8  ;;  %v4940_v8 = vld [vmem:[%s1088_s22] sm:$0xff]  }
 0x6c1   : > { %4612 = vmatpush3.bf16.msra.mxu1 %v2058_v9  ;;  %4613 = vmatprep.mubr.msk.bf16.mxu1 %vm5885_vm2, %v5884_v17 }
 0x6c2   : > { %4623 = vmatprep.subr.bf16.mxu1 %v5884_v17 }
 0x6cb   : > { %2292 = vrot.lane.b32.xlu0 %v6651_v61, %s5890_s13 }
 0x701   : > { %v1915_v11 = vpop.xlane.xlu1 %1914 }
 0x702   : > { %4975 = vrcp.f32 %v1915_v11 }
 0x705   : > { %v1918_v12 = vpop.xlane.xlu0 %1917 }
 0x706   : > { %4977 = vrcp.f32 %v1918_v12 }
 0x709   : > { %v1921_v13 = vpop.xlane.xlu1 %1920  ;;  %v2197_v22 = vpop.permute.xlu0 %2196 }
 0x70a   : > { %4979 = vrcp.f32 %v1921_v13  ;;  %v2202_v26 = vsel %vm1960_vm4, %v2197_v22, 0 }
 0x70f   : > { %v4976_v14 = vpop.eup %4975 }
 0x710   : > { %v1941_v15 = vmul.f32 %v4976_v14, %v6760_v38 }
 0x711   : > { %v1927_v16 = vpop.xlane.xlu1 %1926 }
 0x712   : > { %4981 = vrcp.f32 %v1927_v16  ;;  %v1949_v18 = vpack.c.bf16 %v1941_v15, %v1941_v15 }
 0x713   : > { %v4978_v20 = vpop.eup %4977 }
 0x714   : > { %4614 = vmatmul.mubr.msk.bf16.vlgmr.msra.gmra.mxu1 %vm1454_vm3, %v1949_v18  ;;  %v1942_v61 = vmul.f32 %v4978_v20, %v6765_v41 }
 0x715   : > { %4624 = vmatpush3.bf16.msra.mxu1 %v2154_v21  ;;  %4625 = vmatprep.mubr.msk.bf16.mxu1 %vm5885_vm2, %v5884_v17  ;;  %v2245_v44 = vpop.permute.xlu1 %2244 }
 0x716   : > { %v1950_v24 = vpack.c.bf16 %v1942_v61, %v1942_v61  ;;  %4635 = vmatprep.subr.bf16.mxu1 %v5884_v17  ;;  %v2250_v23 = vsel %vm1960_vm4, %v2245_v44, 0 }
 0x717   : > { %v4980_v25 = vpop.eup %4979 }
 0x718   : > { %4620 = vmatmul.mubr.msk.bf16.vlgmr.msra.gmra.mxu0 %vm1454_vm3, %v1950_v24  ;;  %v1943_v52 = vmul.f32 %v4980_v25, %v6770_v43 }
 0x719   : > { %4630 = vmatpush3.bf16.msra.mxu0 %v2202_v26  ;;  %4631 = vmatprep.mubr.msk.bf16.mxu0 %vm5885_vm2, %v5884_v17 }
 0x71a   : > { %v1951_v53 = vpack.c.bf16 %v1943_v52, %v1943_v52  ;;  %4641 = vmatprep.subr.bf16.mxu0 %v5884_v17 }
 0x71c   : > { %4626 = vmatmul.mubr.msk.bf16.vlgmr.msra.gmra.mxu1 %vm1454_vm3, %v1951_v53 }
 0x71d   : > { %4636 = vmatpush3.bf16.msra.mxu1 %v2250_v23  ;;  %4637 = vmatprep.mubr.msk.bf16.mxu1 %vm5885_vm2, %v5884_v17 }
 0x71e   : > { %4647 = vmatprep.subr.bf16.mxu1 %v5884_v17 }
 0x71f   : > { %v4982_v27 = vpop.eup %4981 }
 0x720   : > { %v1945_v28 = vmul.f32 %v4982_v27, %v6774_v46 }
 0x722   : > { %v1953_v29 = vpack.c.bf16 %v1945_v28, %v1945_v28 }
 0x724   : > { %4638 = vmatmul.mubr.msk.bf16.vlgmr.msra.gmra.mxu1 %vm1454_vm3, %v1953_v29 }
 0x725   : > { %4651 = vmatprep.mubr.msk.bf16.mxu1 %vm5885_vm2, %v5884_v17  ;;  %4648 = vmatpush3.bf16.msra.mxu1 %v4939_v7 }
 0x726   : > { %4649 = vmatprep.subr.bf16.mxu1 %v5884_v17 }
 0x729   : > { %4650 = vmatpush3.bf16.msra.mxu1 %v4940_v8  ;;  %v4355_v8 = vld [vmem:[%s1112_s14] ss:$0 sm:$0xff] }
 0x72a   : > { %4663 = vmatprep.subr.bf16.mxu1 %v5884_v17 }
 0x73a   : > { %v1924_v30 = vpop.xlane.xlu0 %1923 }
 0x73b   : > { %4983 = vrcp.f32 %v1924_v30 }
 0x73e   : > { %v1930_v31 = vpop.xlane.xlu0 %1929 }
 0x73f   : > { %4985 = vrcp.f32 %v1930_v31 }
 0x742   : > { %v2293_v34 = vpop.permute.xlu0 %2292 }
 0x743   : > { %v2298_v38 = vsel %vm1960_vm4, %v2293_v34, 0  ;;  %v4353_v34 = vld [vmem:[%s1096_s25] ss:$0 sm:$0xff]  ;;  %s7392_s25 = sld [smem:[#allocation70_spill]] (!%p4369_p10) }
 0x748   : > { %v4984_v32 = vpop.eup %4983 }
 0x749   : > { %v1944_v33 = vmul.f32 %v4984_v32, %v6784_v60 }
 0x74b   : > { %v1952_v35 = vpack.c.bf16 %v1944_v33, %v1944_v33 }
 0x74c   : > { %v4986_v37 = vpop.eup %4985 }
 0x74d   : > { %4632 = vmatmul.mubr.msk.bf16.vlgmr.msra.gmra.mxu0 %vm1454_vm3, %v1952_v35  ;;  %v1946_v39 = vmul.f32 %v4986_v37, %v6788_v50 }
 0x74e   : > { %4642 = vmatpush3.bf16.msra.mxu0 %v2298_v38  ;;  %4643 = vmatprep.mubr.msk.bf16.mxu0 %vm5885_vm2, %v5884_v17 }
 0x74f   : > { %4655 = vmatprep.subr.bf16.mxu0 %v5884_v17  ;;  %v1954_v56 = vpack.c.bf16 %v1946_v39, %v1946_v39 }
 0x755   : > { %4644 = vmatmul.mubr.msk.bf16.vlgmr.msra.gmra.mxu0 %vm1454_vm3, %v1954_v56 }
 0x756   : > { %4659 = vmatprep.mubr.msk.bf16.mxu0 %vm5885_vm2, %v5884_v17 }
 0x77c   : > { %v2046_v36 = vpop.f32.mrf.mxu0 }
 0x77e   : > { %v4609_v40 = vpop.f32.mrf.mxu0 }
 0x780   : > { %v1998_v41 = vpop.f32.mrf.mxu1  ;;  %v2049_v42 = vpop.f32.mrf.mxu0 }
 0x782   : > { %v4603_v43 = vpop.f32.mrf.mxu1  ;;  %v4610_v45 = vpop.f32.mrf.mxu0 }
 0x784   : > { %v2001_v46 = vpop.f32.mrf.mxu1 }
 0x786   : > { %v4604_v47 = vpop.f32.mrf.mxu1 }
 0x7d4   : > { %v2094_v48 = vpop.f32.mrf.mxu1 }
 0x7d6   : > { %v4615_v49 = vpop.f32.mrf.mxu1 }
 0x7d8   : > { %v2097_v51 = vpop.f32.mrf.mxu1  ;;  %v2142_v54 = vpop.f32.mrf.mxu0 }
 0x7d9   : > { %v4922_v57 = vpack.i.bf16 %v2142_v54, %v2094_v48 }
 0x7da   : > { %v4616_v58 = vpop.f32.mrf.mxu1  ;;  %v4621_v59 = vpop.f32.mrf.mxu0 }
 0x7db   : > { %4923 = vrot.lane.b32.xlu1 %v4922_v57, %s5891_s5  ;;  %v4941_v57 = vld [vmem:[%s1121_s8 + $0x8] sm:$0xff]   ;;  %v4942_v58 = vld [vmem:[%s1121_s8] sm:$0xff]   ;;  %s7393_s8 = sld [smem:[#allocation75_spill]] (!%p4369_p10) }
 0x7dc   : > { %v2145_v60 = vpop.f32.mrf.mxu0  ;;  %v2190_v63 = vpop.f32.mrf.mxu1  ;;  %4656 = vmatpush3.bf16.msra.mxu0 %v4941_v57 }
 0x7dd   : > { %4657 = vmatprep.subr.bf16.mxu0 %v5884_v17 }
 0x7de   : > { %v4622_v55 = vpop.f32.mrf.mxu0  ;;  %v4627_v50 = vpop.f32.mrf.mxu1 }
 0x7e0   : > { %v2193_v62 = vpop.f32.mrf.mxu1  ;;  %4658 = vmatpush3.bf16.msra.mxu0 %v4942_v58 }
 0x7e2   : > { %v4628_v0 = vpop.f32.mrf.mxu1 }
 0x7e4   : > { %v2286_v1 = vpop.f32.mrf.mxu1 }
 0x7e6   : > { %v4639_v4 = vpop.f32.mrf.mxu1 }
 0x7e7   : > { %v4354_v4 = vld [vmem:[%s1104_s18] ss:$0 sm:$0xff] }
 0x7e8   : > { %v2289_v5 = vpop.f32.mrf.mxu1 }
 0x7ea   : > { %v4640_v6 = vpop.f32.mrf.mxu1 }
 0x80d   : > { %v2238_v9 = vpop.f32.mrf.mxu0 }
 0x80e   : > { %v4927_v10 = vpack.i.bf16 %v2238_v9, %v2190_v63 }
 0x80f   : > { %v4633_v11 = vpop.f32.mrf.mxu0 }
 0x810   : > { %4928 = vrot.lane.b32.xlu0 %v4927_v10, %s5892_s20 }
 0x811   : > { %v2241_v12 = vpop.f32.mrf.mxu0 }
 0x813   : > { %v4634_v13 = vpop.f32.mrf.mxu0 }
 0x814   : > { %v4943_v13 = vld [vmem:[%s6592_s9 + $0x38] sm:$0xff]  }
 0x815   : > { %v2334_v14 = vpop.f32.mrf.mxu0 }
 0x816   : > { %v4932_v15 = vpack.i.bf16 %v2334_v14, %v2286_v1  ;;  %v4944_v14 = vld [vmem:[%s6592_s9 + $0x30] sm:$0xff]  }
 0x817   : > { %v4645_v16 = vpop.f32.mrf.mxu0 }
 0x818   : > { %4933 = vrot.lane.b32.xlu1 %v4932_v15, %s5893_s30  ;;  %v4945_v15 = vld [vmem:[%s6592_s9 + $0x28] sm:$0xff]   ;;  %v4946_v16 = vld [vmem:[%s6592_s9 + $0x20] sm:$0xff]  }
 0x819   : > { %v2337_v18 = vpop.f32.mrf.mxu0 }
 0x81a   : > { %v4947_v18 = vld [vmem:[%s6592_s9 + $0x18] sm:$0xff]  }
 0x81b   : > { %v4646_v20 = vpop.f32.mrf.mxu0 }
 0x81c   : > { %v4948_v20 = vld [vmem:[%s6592_s9 + $0x10] sm:$0xff]  }
 0x84d   : > { %v4924_v21 = vpop.permute.xlu1 %4923 }
 0x84e   : > { %v4926_v22 = vunpack.i.h.bf16 %v4924_v21  ;;  %v4925_v24 = vunpack.i.l.bf16 %v4924_v21  ;;  %v4949_v21 = vld [vmem:[%s6592_s9 + $0x8] sm:$0xff]  }
 0x850   : > { %v2369_v44 = vsel %vm1454_vm3, %v2046_v36, %v4926_v22  ;;  %v2352_v53 = vsel %vm1454_vm3, %v1998_v41, %v4925_v24  ;;  %v4356_v22 = vld [vmem:[%s1129_s6] ss:$0 sm:$0xff] }
 0x882   : > { %v4929_v61 = vpop.permute.xlu0 %4928 }
 0x883   : > { %v4931_v25 = vunpack.i.h.bf16 %v4929_v61  ;;  %v4930_v26 = vunpack.i.l.bf16 %v4929_v61  ;;  %v4950_v61 = vld [vmem:[%s6592_s9] sm:$0xff]  }
 0x885   : > { %v2370_v28 = vsel %vm2353_vm6, %v2369_v44, %v4931_v25  ;;  %v2354_v29 = vsel %vm2353_vm6, %v2352_v53, %v4930_v26 }
 0x88a   : > { %v4934_v52 = vpop.permute.xlu1 %4933 }
 0x88b   : > { %v4936_v23 = vunpack.i.h.bf16 %v4934_v52  ;;  %v4935_v27 = vunpack.i.l.bf16 %v4934_v52 }
 0x88d   : > { %v2371_v30 = vsel %vm2355_vm7, %v2370_v28, %v4936_v23  ;;  %v2356_v31 = vsel %vm2355_vm7, %v2354_v29, %v4935_v27 }
 0x88e   : > { %v2372_v32 = vpack.c.bf16 %v2371_v30, %v2356_v31 }
 0x890   : > { %4652 = vmatmul.mubr.msk.bf16.vlgmr.msra.gmra.mxu1 %vm1311_vm1, %v2372_v32 }
 0x891   : > { %4679 = vmatprep.mubr.msk.bf16.mxu1 %vm5885_vm2, %v5884_v17  ;;  %4664 = vmatpush3.bf16.msra.mxu1 %v4943_v13 }
 0x892   : > { %4665 = vmatprep.subr.bf16.mxu1 %v5884_v17 }
 0x895   : > { %4666 = vmatpush3.bf16.msra.mxu1 %v4944_v14 }
 0x896   : > { %4667 = vmatprep.subr.bf16.mxu1 %v5884_v17 }
 0x899   : > { %4668 = vmatpush3.bf16.msra.mxu1 %v4945_v15 }
 0x89a   : > { %4669 = vmatprep.subr.bf16.mxu1 %v5884_v17 }
 0x89d   : > { %4670 = vmatpush3.bf16.msra.mxu1 %v4946_v16 }
 0x89e   : > { %4671 = vmatprep.subr.bf16.mxu1 %v5884_v17 }
 0x8a1   : > { %4672 = vmatpush3.bf16.msra.mxu1 %v4947_v18 }
 0x8a2   : > { %4673 = vmatprep.subr.bf16.mxu1 %v5884_v17 }
 0x8a5   : > { %4674 = vmatpush3.bf16.msra.mxu1 %v4948_v20 }
 0x8a6   : > { %4675 = vmatprep.subr.bf16.mxu1 %v5884_v17 }
 0x8a9   : > { %4676 = vmatpush3.bf16.msra.mxu1 %v4949_v21 }
 0x8aa   : > { %4677 = vmatprep.subr.bf16.mxu1 %v5884_v17 }
 0x8ad   : > { %4678 = vmatpush3.bf16.msra.mxu1 %v4950_v61  ;;  %v4368_v61 = vld [vmem:[%s1137_s10] ss:$0 sm:$0xff] }
 0x950   : > { %v2426_v33 = vpop.f32.mrf.mxu1 }
 0x951   : > { %v2433_v35 = vadd.f32 %v2426_v33, %v6602_v2 }
 0x952   : > { %v4653_v37 = vpop.f32.mrf.mxu1 }
 0x953   : > { %v6851_v38 = vadd.f32 %v4353_v34, %v2433_v35 }
 0x954   : > { %v2429_v39 = vpop.f32.mrf.mxu1 }
 0x955   : > { %v2434_v56 = vadd.f32 %v2429_v39, %v6604_v3  ;;  %v2446_v36 = vsel %vm1311_vm1, %v6851_v38, 0.0 }
 0x956   : > { %2447 = vadd.xlane.f32.xlu0 %v2446_v36  ;;  %v4654_v40 = vpop.f32.mrf.mxu1 }
 0x957   : > { %v6856_v41 = vadd.f32 %v4353_v34, %v2434_v56 }
 0x959   : > { %v2449_v42 = vsel %vm1311_vm1, %v6856_v41, 0.0 }
 0x95a   : > { %2450 = vadd.xlane.f32.xlu1 %v2449_v42 }
 0x9df   : > { %v2448_v2 = vpop.xlane.xlu0 %2447 }
 0x9e0   : > { %v2452_v43 = vmul.f32 0.03125, %v2448_v2 }
 0x9e2   : > { %v2454_v45 = vsub.f32 %v6851_v38, %v2452_v43 }
 0x9e3   : > { %v2451_v46 = vpop.xlane.xlu1 %2450 }
 0x9e4   : > { %v2453_v47 = vmul.f32 0.03125, %v2451_v46  ;;  %v2456_v3 = vmul.f32 %v2454_v45, %v2454_v45 }
 0x9e6   : > { %v2455_v48 = vsub.f32 %v6856_v41, %v2453_v47  ;;  %v2458_v49 = vsel %vm1311_vm1, %v2456_v3, 0.0 }
 0x9e7   : > { %2459 = vadd.xlane.f32.xlu0 %v2458_v49 }
 0x9e8   : > { %v2457_v51 = vmul.f32 %v2455_v48, %v2455_v48 }
 0x9ea   : > { %v2461_v54 = vsel %vm1311_vm1, %v2457_v51, 0.0 }
 0x9eb   : > { %2462 = vadd.xlane.f32.xlu0 %v2461_v54 }
 0xa70   : > { %v2460_v59 = vpop.xlane.xlu0 %2459 }
 0xa71   : > { %v2464_v60 = vmul.f32 0.03125, %v2460_v59 }
 0xa73   : > { %v2466_v63 = vadd.f32 1e-05, %v2464_v60 }
 0xa74   : > { %v2463_v55 = vpop.xlane.xlu0 %2462 }
 0xa75   : > { %4987 = vrsqrt.f32 %v2466_v63  ;;  %v2465_v50 = vmul.f32 0.03125, %v2463_v55 }
 0xa77   : > { %v2467_v62 = vadd.f32 1e-05, %v2465_v50 }
 0xa79   : > { %4989 = vrsqrt.f32 %v2467_v62 }
 0xa82   : > { %v4988_v0 = vpop.eup %4987 }
 0xa83   : > { %v2470_v1 = vmul.f32 %v4988_v0, %v2454_v45 }
 0xa85   : > { %v2478_v7 = vmul.f32 %v4354_v4, %v2470_v1 }
 0xa86   : > { %v4990_v5 = vpop.eup %4989 }
 0xa87   : > { %v2471_v6 = vmul.f32 %v4990_v5, %v2455_v48  ;;  %v2486_v10 = vadd.f32 %v4355_v8, %v2478_v7  ;;  %v5894_v5 = vmov -1.0  }
 0xa89   : > { %v2479_v9 = vmul.f32 %v4354_v4, %v2471_v6 }
 0xa8b   : > { %v2487_v11 = vadd.f32 %v4355_v8, %v2479_v9 }
 0xa8d   : > { %v2488_v12 = vpack.c.bf16 %v2487_v11, %v2486_v10 }
 0xa8f   : > { %4660 = vmatmul.mubr.msk.bf16.vlgmr.msra.gmra.mxu0 %vm1311_vm1, %v2488_v12 }
 0xb4f   : > { %v2549_v24 = vpop.f32.mrf.mxu0 }
 0xb50   : > { %v2550_v25 = vadd.f32 %v4356_v22, %v2549_v24 }
 0xb51   : > { %v4661_v26 = vpop.f32.mrf.mxu0 }
 0xb52   : > { %v2558_v52 = vmul.f32 0.70710677, %v2550_v25  ;;  %v2556_v13 = vmul.f32 0.5, %v2550_v25 }
 0xb53   : > { %v2552_v44 = vpop.f32.mrf.mxu0 }
 0xb54   : > { %v2564_v53 = vand.u32 2147483647, %v2558_v52  ;;  %v2553_v23 = vadd.f32 %v4356_v22, %v2552_v44  ;;  %vm2560_vm8 = vcmp.ge.f32.partialorder %v2558_v52, 0.0 }
 0xb55   : > { %v4662_v27 = vpop.f32.mrf.mxu0  ;;  %v2562_v6 = vsel %vm2560_vm8, 1.0, %v5894_v5 }
 0xb56   : > { %v2566_v28 = vmul.f32 0.3275911, %v2564_v53  ;;  %v2559_v29 = vmul.f32 0.70710677, %v2553_v23  ;;  %v2590_v17 = vsub.f32 0.0, %v2564_v53  ;;  %v2557_v14 = vmul.f32 0.5, %v2553_v23 }
 0xb58   : > { %v2568_v30 = vadd.f32 1.0, %v2566_v28  ;;  %v2565_v31 = vand.u32 2147483647, %v2559_v29  ;;  %v2592_v34 = vmul.f32 %v2590_v17, %v2564_v53  ;;  %vm2561_vm9 = vcmp.ge.f32.partialorder %v2559_v29, 0.0 }
 0xb59   : > { %v2563_v10 = vsel %vm2561_vm9, 1.0, %v5894_v5 }
 0xb5a   : > { %4991 = vrcp.f32 %v2568_v30  ;;  %v2567_v32 = vmul.f32 0.3275911, %v2565_v31  ;;  %v2591_v35 = vsub.f32 0.0, %v2565_v31  ;;  %v2594_v56 = vmul.f32 1.442695, %v2592_v34 }
 0xb5c   : > { %v2569_v33 = vadd.f32 1.0, %v2567_v32  ;;  %v2593_v36 = vmul.f32 %v2591_v35, %v2565_v31 }
 0xb5e   : > { %4993 = vrcp.f32 %v2569_v33  ;;  %v2596_v45 = vmul.f32 1.442695, %v2593_v36 }
 0xb5f   : > { %4995 = vpow2.f32 %v2594_v56 }
 0xb60   : > { %4997 = vpow2.f32 %v2596_v45 }
 0xb67   : > { %v4992_v37 = vpop.eup %4991 }
 0xb68   : > { %v2572_v39 = vmul.f32 1.0614054, %v4992_v37 }
 0xb6a   : > { %v2574_v40 = vadd.f32 -1.4531521, %v2572_v39 }
 0xb6b   : > { %v4994_v42 = vpop.eup %4993 }
 0xb6c   : > { %v2576_v2 = vmul.f32 %v4992_v37, %v2574_v40  ;;  %v2573_v43 = vmul.f32 1.0614054, %v4994_v42  ;;  %v4996_v55 = vpop.eup %4995 }
 0xb6d   : > { %v4998_v4 = vpop.eup %4997 }
 0xb6e   : > { %v2578_v46 = vadd.f32 1.4214138, %v2576_v2  ;;  %v2575_v47 = vadd.f32 -1.4531521, %v2573_v43 }
 0xb70   : > { %v2580_v3 = vmul.f32 %v4992_v37, %v2578_v46  ;;  %v2577_v48 = vmul.f32 %v4994_v42, %v2575_v47 }
 0xb72   : > { %v2582_v49 = vadd.f32 -0.28449672, %v2580_v3  ;;  %v2579_v51 = vadd.f32 1.4214138, %v2577_v48 }
 0xb74   : > { %v2584_v54 = vmul.f32 %v4992_v37, %v2582_v49  ;;  %v2581_v57 = vmul.f32 %v4994_v42, %v2579_v51 }
 0xb76   : > { %v2586_v58 = vadd.f32 0.2548296, %v2584_v54  ;;  %v2583_v59 = vadd.f32 -0.28449672, %v2581_v57 }
 0xb78   : > { %v2588_v60 = vmul.f32 %v4992_v37, %v2586_v58  ;;  %v2585_v63 = vmul.f32 %v4994_v42, %v2583_v59 }
 0xb7a   : > { %v2598_v50 = vmul.f32 %v4996_v55, %v2588_v60  ;;  %v2587_v62 = vadd.f32 0.2548296, %v2585_v63 }
 0xb7c   : > { %v2600_v0 = vsub.f32 1.0, %v2598_v50  ;;  %v2589_v1 = vmul.f32 %v4994_v42, %v2587_v62 }
 0xb7e   : > { %v2602_v7 = vmul.f32 %v2600_v0, %v2562_v6  ;;  %v2599_v8 = vmul.f32 %v4998_v4, %v2589_v1 }
 0xb80   : > { %v2601_v9 = vsub.f32 1.0, %v2599_v8  ;;  %v2604_v11 = vadd.f32 1.0, %v2602_v7 }
 0xb82   : > { %v2603_v12 = vmul.f32 %v2601_v9, %v2563_v10  ;;  %v2606_v16 = vmul.f32 %v2604_v11, %v2556_v13 }
 0xb84   : > { %v2605_v15 = vadd.f32 1.0, %v2603_v12 }
 0xb86   : > { %v2607_v18 = vmul.f32 %v2605_v15, %v2557_v14 }
 0xb88   : > { %v2608_v20 = vpack.c.bf16 %v2607_v18, %v2606_v16 }
 0xb8a   : > { %4680 = vmatmul.mubr.bf16.vlgmr.msra.gmra.mxu1 %v2608_v20 }
 0xc4a   : > { %v2707_v21 = vpop.f32.mrf.mxu1 }
 0xc4b   : > { %v2714_v22 = vadd.f32 %v2707_v21, %v6851_v38 }
 0xc4c   : > { %v4681_v24 = vpop.f32.mrf.mxu1 }
 0xc4d   : > { %v2723_v26 = vadd.f32 %v4368_v61, %v2714_v22 }
 0xc4e   : > { %v2710_v52 = vpop.f32.mrf.mxu1 }
 0xc4f   : > { %2725 = vst.msk [vmem:[#allocation2] sm:$0xff] %vm1311_vm1, %v2723_v26  ;;  %v2715_v44 = vadd.f32 %v2710_v52, %v6856_v41  ;;  %2730 = sbr.rel (%p4369_p10) target bundleno = 4829 (0x12dd), region = 220 }
 0xc50   : > { %v4682_v53 = vpop.f32.mrf.mxu1 }
 0xc51   : > { %v2724_v25 = vadd.f32 %v4368_v61, %v2715_v44 }
 0xc53   : > { %2726 = vst.msk [vmem:[#allocation2 + $0x8] sm:$0xff] %vm1311_vm1, %v2724_v25 }
 0xc54   : > { %v2733_v23 = vsel %vm1311_vm1, %v2723_v26, 0.0  ;;  %v2736_v27 = vsel %vm1311_vm1, %v2724_v25, 0.0  ;;  %v2775_v38 = vld [vmem:[%s7392_s25] sm:$0xff]  ;;  %v5895_v28 = vmov 0   ;;  %v5000_v39 = vld [vmem:[#allocation24 + $0x24] ss:$16 sps:$4 sm:$0xff]  }
 0xc55   : > { %2734 = vadd.xlane.f32.xlu0 %v2733_v23  ;;  %2911 = vmatprep.mubr.bf16.mxu1 %v5895_v28  ;;  %v5002_v56 = vld [vmem:[#allocation24 + $0x20] ss:$16 sps:$4 sm:$0xff]   ;;  %v5003_v36 = vld [vmem:[#allocation24 + $0x4] ss:$16 sps:$4 sm:$0xff]   ;;  %v5008_v42 = vld [vmem:[#allocation24 + $0x2c] ss:$16 sps:$4 sm:$0xff]  }
 0xc56   : > { %4999 = vset.pattern.permute.xlu0 %v5895_v28  ;;  %2891 = vmatprep.subr.bf16.mxu1 %v5000_v39  ;;  %v5005_v40 = vld [vmem:[#allocation24] ss:$16 sps:$4 sm:$0xff]   ;;  %v4370_v49 = vld [vmem:[#allocation21] ss:$0 sm:$0xff]  ;;  %v4371_v54 = vld [vmem:[#allocation23] ss:$0 sm:$0xff] }
 0xc57   : > { %2892 = vmatpush1.bf16.msra.mxu1 %v5002_v56  ;;  %vm2833_vm10 = vcmask 1041409   ;;  %v5006_v22 = vld [vmem:[#allocation24 + $0x28] ss:$16 sps:$4 sm:$0xff]   ;;  %v5011_v52 = vld [vmem:[#allocation24 + $0xc] ss:$16 sps:$4 sm:$0xff]   ;;  %v6913_v53 = vsub.s32 1, %v6706_v19 }
 0xc58   : > { %2893 = vmatprep.subr.bf16.mxu1 %v5003_v36  ;;  %v5009_v44 = vld [vmem:[#allocation24 + $0x8] ss:$16 sps:$4 sm:$0xff]   ;;  %v2807_v23 = vld [vmem:[#allocation26] sm:$0xf]  ;;  %vm2963_vm11 = vcmask 1041408  }
 0xc59   : > { %2737 = vadd.xlane.f32.xlu0 %v2736_v27  ;;  %v2816_v27 = vrot.slane %v2807_v23, %v6913_v53 }
 0xc5b   : > { %2894 = vmatpush1.bf16.msra.mxu1 %v5005_v40 }
 0xc5c   : > { %2932 = vmatprep.subr.bf16.mxu1 %v5008_v42 }
 0xc6f   : > { %2778 = vperm.xlu0 %4999, %v2775_v38  }
 0xcde   : > { %v2735_v41 = vpop.xlane.xlu0 %2734 }
 0xcdf   : > { %v2739_v29 = vmul.f32 0.03125, %v2735_v41 }
 0xce1   : > { %v2741_v30 = vsub.f32 %v2723_v26, %v2739_v29  ;;  %v6921_v29 = vsub.s32 2, %v6706_v19 }
 0xce2   : > { %v2738_v31 = vpop.xlane.xlu0 %2737 }
 0xce3   : > { %v2740_v32 = vmul.f32 0.03125, %v2738_v31  ;;  %v2743_v33 = vmul.f32 %v2741_v30, %v2741_v30  ;;  %v6924_v31 = vsub.s32 3, %v6706_v19 }
 0xce5   : > { %v2742_v17 = vsub.f32 %v2724_v25, %v2740_v32  ;;  %v2745_v34 = vsel %vm1311_vm1, %v2743_v33, 0.0  ;;  %v6916_v25 = vsub.s32 0, %v6706_v19 }
 0xce6   : > { %2746 = vadd.xlane.f32.xlu1 %v2745_v34 }
 0xce7   : > { %v2744_v35 = vmul.f32 %v2742_v17, %v2742_v17  ;;  %v2812_v41 = vrot.slane %v2807_v23, %v6916_v25 }
 0xce9   : > { %v2748_v37 = vsel %vm1311_vm1, %v2744_v35, 0.0 }
 0xcea   : > { %2749 = vadd.xlane.f32.xlu1 %v2748_v37  ;;  %v2779_v59 = vpop.permute.xlu0 %2778  ;;  %v2824_v37 = vrot.slane %v2807_v23, %v6924_v31 }
 0xd6f   : > { %v2747_v2 = vpop.xlane.xlu1 %2746 }
 0xd70   : > { %v2751_v43 = vmul.f32 0.03125, %v2747_v2 }
 0xd72   : > { %v2753_v45 = vadd.f32 1e-05, %v2751_v43 }
 0xd73   : > { %v2750_v46 = vpop.xlane.xlu1 %2749 }
 0xd74   : > { %5124 = vrsqrt.f32 %v2753_v45  ;;  %v2752_v47 = vmul.f32 0.03125, %v2750_v46 }
 0xd76   : > { %v2754_v3 = vadd.f32 1e-05, %v2752_v47 }
 0xd78   : > { %5126 = vrsqrt.f32 %v2754_v3 }
 0xd81   : > { %v5125_v48 = vpop.eup %5124 }
 0xd82   : > { %v2757_v51 = vmul.f32 %v5125_v48, %v2741_v30 }
 0xd84   : > { %v2765_v57 = vmul.f32 %v4370_v49, %v2757_v51 }
 0xd85   : > { %v5127_v58 = vpop.eup %5126 }
 0xd86   : > { %v2758_v60 = vmul.f32 %v5127_v58, %v2742_v17  ;;  %v2773_v63 = vadd.f32 %v4371_v54, %v2765_v57  ;;  %v2820_v17 = vrot.slane %v2807_v23, %v6921_v29  ;;  %v5041_v23 = vld [vmem:[%s7393_s8 + $0x30] ss:$8 sps:$4 sm:$0xff]  }
 0xd88   : > { %v2766_v55 = vmul.f32 %v4370_v49, %v2758_v60  ;;  %v2781_v50 = vmul.f32 %v2779_v59, %v2773_v63 }
 0xd8a   : > { %v2774_v62 = vadd.f32 %v4371_v54, %v2766_v55  ;;  %v2783_v0 = vsel %vm1311_vm1, %v2781_v50, 0.0 }
 0xd8b   : > { %v2784_v1 = vrot.slane %v2783_v0, 4 }
 0xd8c   : > { %v2782_v4 = vmul.f32 %v2779_v59, %v2774_v62 }
 0xd8d   : > { %v2785_v5 = vadd.f32 %v2784_v1, %v2783_v0 }
 0xd8e   : > { %v2790_v6 = vsel %vm1311_vm1, %v2782_v4, 0.0 }
 0xd8f   : > { %v2786_v7 = vrot.slane %v2785_v5, 2  ;;  %v2791_v8 = vrot.slane %v2790_v6, 4 }
 0xd91   : > { %v2787_v9 = vadd.f32 %v2786_v7, %v2785_v5  ;;  %v2792_v10 = vadd.f32 %v2791_v8, %v2790_v6  ;;  %v5012_v7 = vld [vmem:[%s7393_s8 + $0x74] ss:$8 sps:$4 sm:$0xff]   ;;  %v5014_v8 = vld [vmem:[%s7393_s8 + $0x170] ss:$8 sps:$4 sm:$0xff]  }
 0xd92   : > { %3553 = vmatprep.subr.bf16.mxu0 %v5012_v7  ;;  %v5096_v7 = vld [vmem:[%s7393_s8 + $0x94] ss:$8 sps:$4 sm:$0xff]  }
 0xd93   : > { %v2788_v11 = vrot.slane %v2787_v9, 1  ;;  %v2793_v12 = vrot.slane %v2792_v10, 2 }
 0xd95   : > { %v2789_v13 = vadd.f32 %v2788_v11, %v2787_v9  ;;  %v2794_v14 = vadd.f32 %v2793_v12, %v2792_v10  ;;  %v5016_v9 = vld [vmem:[%s7393_s8 + $0x174] ss:$8 sps:$4 sm:$0xff]   ;;  %v5017_v10 = vld [vmem:[%s7393_s8 + $0x70] ss:$8 sps:$4 sm:$0xff]   ;;  %v5018_v11 = vld [vmem:[%s7393_s8 + $0x64] ss:$8 sps:$4 sm:$0xff]  }
 0xd96   : > { %v5022_v12 = vld [vmem:[%s7393_s8 + $0x164] ss:$8 sps:$4 sm:$0xff]   ;;  %3554 = vmatpush1.bf16.msra.mxu0 %v5017_v10  ;;  %v5101_v10 = vld [vmem:[%s7393_s8 + $0x90] ss:$8 sps:$4 sm:$0xff]  }
 0xd97   : > { %v2795_v15 = vrot.slane %v2794_v14, 1  ;;  %v2797_v18 = vpack.c.bf16 %v2789_v13, %v2789_v13  ;;  %v5020_v13 = vld [vmem:[%s7393_s8 + $0x160] ss:$8 sps:$4 sm:$0xff]   ;;  %3555 = vmatprep.subr.bf16.mxu0 %v5018_v11  ;;  %v5102_v11 = vld [vmem:[%s7393_s8 + $0x84] ss:$8 sps:$4 sm:$0xff]  }
 0xd99   : > { %v2796_v16 = vadd.f32 %v2795_v15, %v2794_v14  ;;  %v2831_v21 = vunpack.c.l.b16 %v2797_v18  ;;  %v5023_v14 = vld [vmem:[%s7393_s8 + $0x60] ss:$8 sps:$4 sm:$0xff]   ;;  %v5024_v15 = vld [vmem:[%s7393_s8 + $0x54] ss:$8 sps:$4 sm:$0xff]   ;;  %v5026_v18 = vld [vmem:[%s7393_s8 + $0x150] ss:$8 sps:$4 sm:$0xff]  }
 0xd9a   : > { %3556 = vmatpush1.bf16.msra.mxu0 %v5023_v14  ;;  %v5107_v14 = vld [vmem:[%s7393_s8 + $0x80] ss:$8 sps:$4 sm:$0xff]  }
 0xd9b   : > { %v2798_v20 = vpack.c.bf16 %v2796_v16, %v2796_v16  ;;  %v5028_v16 = vld [vmem:[%s7393_s8 + $0x154] ss:$8 sps:$4 sm:$0xff]   ;;  %3557 = vmatprep.subr.bf16.mxu0 %v5024_v15 }
 0xd9d   : > { %v2832_v61 = vunpack.c.l.b16 %v2798_v20  ;;  %v5029_v20 = vld [vmem:[%s7393_s8 + $0x50] ss:$8 sps:$4 sm:$0xff]  }
 0xd9e   : > { %3558 = vmatpush1.bf16.msra.mxu0 %v5029_v20  ;;  %v2961_v20 = vld [vmem:[#allocation27] sm:$0xf] }
 0xd9f   : > { %v2834_v24 = vsel %vm2833_vm10, %v2832_v61, %v2831_v21  ;;  %v5030_v21 = vld [vmem:[%s7393_s8 + $0x44] ss:$8 sps:$4 sm:$0xff]  }
 0xda0   : > { %v2835_v26 = vpack.c.b16 %v2834_v24, %v2834_v24  ;;  %v5034_v61 = vld [vmem:[%s7393_s8 + $0x144] ss:$8 sps:$4 sm:$0xff]   ;;  %v5035_v24 = vld [vmem:[%s7393_s8 + $0x40] ss:$8 sps:$4 sm:$0xff]   ;;  %3559 = vmatprep.subr.bf16.mxu0 %v5030_v21 }
 0xda1   : > { %v2962_v21 = vld [vmem:[#allocation29] sm:$0xf] }
 0xda2   : > { %4380 = vmatmul.mubr.msk.bf16.vlgmr.msra.gmra.mxu1 %vm1311_vm1, %v2835_v26  ;;  %3560 = vmatpush1.bf16.msra.mxu0 %v5035_v24  ;;  %v3007_v24 = vrot.slane %v2961_v20, %v6913_v53 }
 0xda3   : > { %2933 = vmatpush1.bf16.msra.mxu1 %v5006_v22  ;;  %2952 = vmatprep.mubr.bf16.mxu1 %v5895_v28  ;;  %v5032_v22 = vld [vmem:[%s7393_s8 + $0x140] ss:$8 sps:$4 sm:$0xff]  }
 0xda4   : > { %2934 = vmatprep.subr.bf16.mxu1 %v5011_v52  ;;  %v5040_v52 = vld [vmem:[%s7393_s8 + $0x134] ss:$8 sps:$4 sm:$0xff]  }
 0xda7   : > { %2935 = vmatpush1.bf16.msra.mxu1 %v5009_v44  ;;  %v5038_v44 = vld [vmem:[%s7393_s8 + $0x130] ss:$8 sps:$4 sm:$0xff]  }
 0xda8   : > { %3594 = vmatprep.subr.bf16.mxu1 %v5016_v9  ;;  %v5098_v9 = vld [vmem:[%s7393_s8 + $0x190] ss:$8 sps:$4 sm:$0xff]  }
 0xdaa   : > { %4381 = vmatmul.mubr.msk.bf16.vlgmr.msra.gmra.mxu1 %vm1311_vm1, %v2835_v26  ;;  %v5036_v26 = vld [vmem:[%s7393_s8 + $0x34] ss:$8 sps:$4 sm:$0xff]  }
 0xdab   : > { %3595 = vmatpush1.bf16.msra.mxu1 %v5014_v8  ;;  %3561 = vmatprep.subr.bf16.mxu0 %v5036_v26  ;;  %v5100_v8 = vld [vmem:[%s7393_s8 + $0x194] ss:$8 sps:$4 sm:$0xff]   ;;  %v3003_v26 = vrot.slane %v2961_v20, %v6916_v25 }
 0xdac   : > { %3596 = vmatprep.subr.bf16.mxu1 %v5022_v12  ;;  %3562 = vmatpush1.bf16.msra.mxu0 %v5041_v23  ;;  %v5106_v12 = vld [vmem:[%s7393_s8 + $0x184] ss:$8 sps:$4 sm:$0xff]   ;;  %v3040_v23 = vrot.slane %v2962_v21, %v6924_v31 }
 0xdaf   : > { %3597 = vmatpush1.bf16.msra.mxu1 %v5020_v13  ;;  %v5104_v13 = vld [vmem:[%s7393_s8 + $0x180] ss:$8 sps:$4 sm:$0xff]  }
 0xdb0   : > { %3598 = vmatprep.subr.bf16.mxu1 %v5028_v16 }
 0xdb3   : > { %3599 = vmatpush1.bf16.msra.mxu1 %v5026_v18 }
 0xdb4   : > { %3600 = vmatprep.subr.bf16.mxu1 %v5034_v61  ;;  %v3011_v61 = vrot.slane %v2961_v20, %v6921_v29 }
 0xdb7   : > { %3601 = vmatpush1.bf16.msra.mxu1 %v5032_v22  ;;  %v3015_v22 = vrot.slane %v2961_v20, %v6924_v31 }
 0xdb8   : > { %3602 = vmatprep.subr.bf16.mxu1 %v5040_v52 }
 0xdbb   : > { %3603 = vmatpush1.bf16.msra.mxu1 %v5038_v44  ;;  %v3032_v44 = vrot.slane %v2962_v21, %v6913_v53 }
 0xe62   : > { %v2913_v38 = vpop.f32.mrf.mxu1 }
 0xe63   : > { %v2914_v33 = vadd.f32 %v2913_v38, %v2812_v41  ;;  %v5046_v38 = vld [vmem:[%s7393_s8 + $0x124] ss:$8 sps:$4 sm:$0xff]   ;;  %v5044_v41 = vld [vmem:[%s7393_s8 + $0x120] ss:$8 sps:$4 sm:$0xff]  }
 0xe64   : > { %v2915_v28 = vpop.f32.mrf.mxu1  ;;  %3604 = vmatprep.subr.bf16.mxu1 %v5046_v38 }
 0xe65   : > { %v2916_v30 = vadd.f32 %v2915_v28, %v2816_v27  ;;  %v2964_v56 = vsel %vm2963_vm11, %v2914_v33, 0.0  ;;  %v5042_v27 = vld [vmem:[%s7393_s8 + $0x24] ss:$8 sps:$4 sm:$0xff]   ;;  %v5047_v28 = vld [vmem:[%s7393_s8 + $0x20] ss:$8 sps:$4 sm:$0xff]   ;;  %3605 = vmatpush1.bf16.msra.mxu1 %v5044_v41 }
 0xe66   : > { %v2917_v32 = vpop.f32.mrf.mxu1  ;;  %3563 = vmatprep.subr.bf16.mxu0 %v5042_v27  ;;  %v3028_v27 = vrot.slane %v2962_v21, %v6916_v25 }
 0xe67   : > { %v2965_v35 = vsel %vm2963_vm11, %v2916_v30, 0.0  ;;  %v5052_v32 = vld [vmem:[%s7393_s8 + $0x114] ss:$8 sps:$4 sm:$0xff]   ;;  %3564 = vmatpush1.bf16.msra.mxu0 %v5047_v28 }
 0xe68   : > { %v2918_v34 = vpop.f32.mrf.mxu1  ;;  %v2966_v40 = vadd.f32 %v2965_v35, %v2964_v56  ;;  %3606 = vmatprep.subr.bf16.mxu1 %v5052_v32  ;;  %v5058_v35 = vld [vmem:[%s7393_s8 + $0x104] ss:$8 sps:$4 sm:$0xff]   ;;  %v5060_v56 = vld [vmem:[%s7393_s8 + $0xf4] ss:$8 sps:$4 sm:$0xff]   ;;  %v3036_v32 = vrot.slane %v2962_v21, %v6921_v29 }
 0xe69   : > { %v5054_v34 = vld [vmem:[%s7393_s8 + $0x4] ss:$8 sps:$4 sm:$0xff]  }
 0xe6a   : > { %v2954_v39 = vpop.f32.mrf.mxu1 }
 0xe6b   : > { %v2955_v36 = vadd.f32 %v2954_v39, %v2820_v17  ;;  %v5053_v17 = vld [vmem:[%s7393_s8 + $0x10] ss:$8 sps:$4 sm:$0xff]   ;;  %v5059_v39 = vld [vmem:[%s7393_s8] ss:$8 sps:$4 sm:$0xff]  }
 0xe6c   : > { %v2956_v42 = vpop.f32.mrf.mxu1 }
 0xe6d   : > { %v2967_v2 = vsel %vm2963_vm11, %v2955_v36, 0.0  ;;  %v2957_v19 = vadd.f32 %v2956_v42, %v2824_v37  ;;  %v5056_v37 = vld [vmem:[%s7393_s8 + $0x100] ss:$8 sps:$4 sm:$0xff]   ;;  %v5065_v42 = vld [vmem:[%s7393_s8 + $0xf0] ss:$8 sps:$4 sm:$0xff]  }
 0xe6e   : > { %v2958_v43 = vpop.f32.mrf.mxu1  ;;  %v2968_v45 = vadd.f32 %v2967_v2, %v2966_v40  ;;  %v5062_v40 = vld [vmem:[%s7393_s8 + $0x1f0] ss:$8 sps:$4 sm:$0xff]   ;;  %v5066_v2 = vld [vmem:[%s7393_s8 + $0xe4] ss:$8 sps:$4 sm:$0xff]  }
 0xe6f   : > { %v2969_v46 = vsel %vm2963_vm11, %v2957_v19, 0.0  ;;  %v5068_v43 = vld [vmem:[%s7393_s8 + $0x1e0] ss:$8 sps:$4 sm:$0xff]  }
 0xe70   : > { %v2959_v47 = vpop.f32.mrf.mxu1  ;;  %v2970_v3 = vadd.f32 %v2969_v46, %v2968_v45  ;;  %v5071_v45 = vld [vmem:[%s7393_s8 + $0xe0] ss:$8 sps:$4 sm:$0xff]   ;;  %v5072_v46 = vld [vmem:[%s7393_s8 + $0xd4] ss:$8 sps:$4 sm:$0xff]  }
 0xe71   : > { %v5076_v47 = vld [vmem:[%s7393_s8 + $0x1d4] ss:$8 sps:$4 sm:$0xff]  }
 0xe72   : > { %2971 = vadd.xlane.f32.xlu1 %v2970_v3  ;;  %v5074_v3 = vld [vmem:[%s7393_s8 + $0x1d0] ss:$8 sps:$4 sm:$0xff]  }
 0xefb   : > { %v2972_v48 = vpop.xlane.xlu1 %2971 }
 0xefc   : > { %v2974_v49 = vmul.f32 0.001953125, %v2972_v48  ;;  %v5077_v48 = vld [vmem:[%s7393_s8 + $0xd0] ss:$8 sps:$4 sm:$0xff]  }
 0xefe   : > { %v6932_v51 = vsub.f32 %v2914_v33, %v2974_v49  ;;  %v6934_v54 = vsub.f32 %v2916_v30, %v2974_v49  ;;  %v6936_v57 = vsub.f32 %v2955_v36, %v2974_v49  ;;  %v6938_v58 = vsub.f32 %v2957_v19, %v2974_v49  ;;  %v5048_v30 = vld [vmem:[%s7393_s8 + $0x14] ss:$8 sps:$4 sm:$0xff]   ;;  %v5050_v33 = vld [vmem:[%s7393_s8 + $0x110] ss:$8 sps:$4 sm:$0xff]   ;;  %v5070_v19 = vld [vmem:[%s7393_s8 + $0x1e4] ss:$8 sps:$4 sm:$0xff]  }
 0xeff   : > { %3565 = vmatprep.subr.bf16.mxu0 %v5048_v30  ;;  %3607 = vmatpush1.bf16.msra.mxu1 %v5050_v33  ;;  %v5064_v36 = vld [vmem:[%s7393_s8 + $0x1f4] ss:$8 sps:$4 sm:$0xff]   ;;  %v5078_v49 = vld [vmem:[%s7393_s8 + $0xc4] ss:$8 sps:$4 sm:$0xff]  }
 0xf00   : > { %v2979_v59 = vmul.f32 %v6932_v51, %v6932_v51  ;;  %v2980_v60 = vmul.f32 %v6934_v54, %v6934_v54  ;;  %v2981_v63 = vmul.f32 %v6936_v57, %v6936_v57  ;;  %v2982_v55 = vmul.f32 %v6938_v58, %v6938_v58  ;;  %3566 = vmatpush1.bf16.msra.mxu0 %v5053_v17 }
 0xf01   : > { %3567 = vmatprep.subr.bf16.mxu0 %v5054_v34  ;;  %3608 = vmatprep.subr.bf16.mxu1 %v5058_v35 }
 0xf02   : > { %v2983_v50 = vsel %vm2963_vm11, %v2979_v59, 0.0  ;;  %v2984_v62 = vsel %vm2963_vm11, %v2980_v60, 0.0  ;;  %v2986_v1 = vsel %vm2963_vm11, %v2981_v63, 0.0  ;;  %v2988_v5 = vsel %vm2963_vm11, %v2982_v55, 0.0  ;;  %v5082_v59 = vld [vmem:[%s7393_s8 + $0x1c4] ss:$8 sps:$4 sm:$0xff]  }
 0xf03   : > { %v2985_v0 = vadd.f32 %v2984_v62, %v2983_v50  ;;  %3609 = vmatpush1.bf16.msra.mxu1 %v5056_v37  ;;  %v5080_v60 = vld [vmem:[%s7393_s8 + $0x1c0] ss:$8 sps:$4 sm:$0xff]   ;;  %v5084_v55 = vld [vmem:[%s7393_s8 + $0xb4] ss:$8 sps:$4 sm:$0xff]   ;;  %v5086_v62 = vld [vmem:[%s7393_s8 + $0x1b0] ss:$8 sps:$4 sm:$0xff]  }
 0xf04   : > { %3568 = vmatpush1.bf16.msra.mxu0 %v5059_v39  ;;  %3610 = vmatprep.subr.bf16.mxu1 %v5064_v36  ;;  %v5083_v63 = vld [vmem:[%s7393_s8 + $0xc0] ss:$8 sps:$4 sm:$0xff]   ;;  %v5088_v50 = vld [vmem:[%s7393_s8 + $0x1b4] ss:$8 sps:$4 sm:$0xff]  }
 0xf05   : > { %v2987_v4 = vadd.f32 %v2986_v1, %v2985_v0  ;;  %3569 = vmatprep.subr.bf16.mxu0 %v5060_v56  ;;  %v5089_v0 = vld [vmem:[%s7393_s8 + $0xb0] ss:$8 sps:$4 sm:$0xff]   ;;  %v5090_v1 = vld [vmem:[%s7393_s8 + $0xa4] ss:$8 sps:$4 sm:$0xff]  }
 0xf07   : > { %v2989_v6 = vadd.f32 %v2988_v5, %v2987_v4  ;;  %3611 = vmatpush2.bf16.msra.mxu1 %v5062_v40  ;;  %v5094_v4 = vld [vmem:[%s7393_s8 + $0x1a4] ss:$8 sps:$4 sm:$0xff]   ;;  %v5092_v5 = vld [vmem:[%s7393_s8 + $0x1a0] ss:$8 sps:$4 sm:$0xff]  }
 0xf08   : > { %3570 = vmatpush2.bf16.msra.mxu0 %v5065_v42  ;;  %3612 = vmatprep.subr.bf16.mxu1 %v5070_v19 }
 0xf09   : > { %2990 = vadd.xlane.f32.xlu1 %v2989_v6  ;;  %3571 = vmatprep.subr.bf16.mxu0 %v5066_v2  ;;  %v5095_v6 = vld [vmem:[%s7393_s8 + $0xa0] ss:$8 sps:$4 sm:$0xff]  }
 0xf0b   : > { %3613 = vmatpush2.bf16.msra.mxu1 %v5068_v43 }
 0xf0c   : > { %3572 = vmatpush2.bf16.msra.mxu0 %v5071_v45  ;;  %3614 = vmatprep.subr.bf16.mxu1 %v5076_v47 }
 0xf0d   : > { %3573 = vmatprep.subr.bf16.mxu0 %v5072_v46 }
 0xf0f   : > { %3615 = vmatpush2.bf16.msra.mxu1 %v5074_v3 }
 0xf10   : > { %3574 = vmatpush2.bf16.msra.mxu0 %v5077_v48  ;;  %3616 = vmatprep.subr.bf16.mxu1 %v5082_v59 }
 0xf11   : > { %3575 = vmatprep.subr.bf16.mxu0 %v5078_v49 }
 0xf13   : > { %3617 = vmatpush2.bf16.msra.mxu1 %v5080_v60 }
 0xf14   : > { %3576 = vmatpush2.bf16.msra.mxu0 %v5083_v63  ;;  %3618 = vmatprep.subr.bf16.mxu1 %v5088_v50 }
 0xf15   : > { %3577 = vmatprep.subr.bf16.mxu0 %v5084_v55 }
 0xf17   : > { %3619 = vmatpush2.bf16.msra.mxu1 %v5086_v62 }
 0xf18   : > { %3578 = vmatpush2.bf16.msra.mxu0 %v5089_v0  ;;  %3620 = vmatprep.subr.bf16.mxu1 %v5094_v4 }
 0xf19   : > { %3579 = vmatprep.subr.bf16.mxu0 %v5090_v1 }
 0xf1b   : > { %3621 = vmatpush2.bf16.msra.mxu1 %v5092_v5 }
 0xf1c   : > { %3580 = vmatpush2.bf16.msra.mxu0 %v5095_v6  ;;  %3622 = vmatprep.subr.bf16.mxu1 %v5100_v8 }
 0xf1d   : > { %3581 = vmatprep.subr.bf16.mxu0 %v5096_v7 }
 0xf1f   : > { %3623 = vmatpush2.bf16.msra.mxu1 %v5098_v9 }
 0xf20   : > { %3582 = vmatpush2.bf16.msra.mxu0 %v5101_v10  ;;  %3624 = vmatprep.subr.bf16.mxu1 %v5106_v12 }
 0xf21   : > { %3583 = vmatprep.subr.bf16.mxu0 %v5102_v11 }
 0xf23   : > { %3625 = vmatpush2.bf16.msra.mxu1 %v5104_v13 }
 0xf24   : > { %3584 = vmatpush2.bf16.msra.mxu0 %v5107_v14 }
 0xf92   : > { %v2991_v15 = vpop.xlane.xlu1 %2990 }
 0xf93   : > { %v2992_v16 = vmul.f32 0.001953125, %v2991_v15 }
 0xf95   : > { %v2993_v18 = vadd.f32 1e-05, %v2992_v16 }
 0xf97   : > { %5128 = vrsqrt.f32 %v2993_v18 }
 0xfa4   : > { %v5129_v52 = vpop.eup %5128 }
 0xfa5   : > { %v2996_v38 = vmul.f32 %v5129_v52, %v6934_v54  ;;  %v2998_v41 = vmul.f32 %v5129_v52, %v6938_v58  ;;  %v2995_v28 = vmul.f32 %v5129_v52, %v6932_v51  ;;  %v2997_v30 = vmul.f32 %v5129_v52, %v6936_v57 }
 0xfa7   : > { %v3021_v33 = vmul.f32 %v3007_v24, %v2996_v38  ;;  %v3023_v17 = vmul.f32 %v3015_v22, %v2998_v41  ;;  %v3020_v34 = vmul.f32 %v3003_v26, %v2995_v28  ;;  %v3022_v35 = vmul.f32 %v3011_v61, %v2997_v30 }
 0xfa9   : > { %v7156_v37 = vadd.f32 %v3032_v44, %v3021_v33  ;;  %v7158_v39 = vadd.f32 %v3040_v23, %v3023_v17  ;;  %v7160_v31 = vadd.f32 %v3028_v27, %v3020_v34  ;;  %v7162_v56 = vadd.f32 %v3036_v32, %v3022_v35 }
 0xfab   : > { %v7165_v54 = vmul.f32 0.70710677, %v7156_v37  ;;  %v7168_v51 = vmul.f32 0.70710677, %v7158_v39  ;;  %v7171_v29 = vmul.f32 0.70710677, %v7160_v31 }
 0xfac   : > { %v7177_v40 = vmul.f32 0.70710677, %v7162_v56 }
 0xfad   : > { %v3066_v57 = vand.u32 2147483647, %v7165_v54  ;;  %v3068_v58 = vand.u32 2147483647, %v7168_v51  ;;  %v3065_v36 = vand.u32 2147483647, %v7171_v29 }
 0xfae   : > { %v3067_v46 = vand.u32 2147483647, %v7177_v40  ;;  %vm3058_vm12 = vcmp.ge.f32.partialorder %v7165_v54, 0.0  ;;  %vm3060_vm13 = vcmp.ge.f32.partialorder %v7168_v51, 0.0  ;;  %vm3057_vm14 = vcmp.ge.f32.partialorder %v7171_v29, 0.0 }
 0xfaf   : > { %v3070_v42 = vmul.f32 0.3275911, %v3066_v57  ;;  %v3072_v2 = vmul.f32 0.3275911, %v3068_v58  ;;  %v3069_v19 = vmul.f32 0.3275911, %v3065_v36 }
 0xfb0   : > { %v3071_v3 = vmul.f32 0.3275911, %v3067_v46  ;;  %v3118_v49 = vsub.f32 0.0, %v3066_v57  ;;  %v3120_v59 = vsub.f32 0.0, %v3068_v58  ;;  %v3117_v63 = vsub.f32 0.0, %v3065_v36 }
 0xfb1   : > { %v3074_v43 = vadd.f32 1.0, %v3070_v42  ;;  %v3076_v45 = vadd.f32 1.0, %v3072_v2  ;;  %v3073_v47 = vadd.f32 1.0, %v3069_v19  ;;  %v3119_v50 = vsub.f32 0.0, %v3067_v46 }
 0xfb2   : > { %v3075_v48 = vadd.f32 1.0, %v3071_v3  ;;  %v3122_v60 = vmul.f32 %v3118_v49, %v3066_v57  ;;  %v3124_v55 = vmul.f32 %v3120_v59, %v3068_v58  ;;  %v3121_v5 = vmul.f32 %v3117_v63, %v3065_v36 }
 0xfb3   : > { %5130 = vrcp.f32 %v3074_v43  ;;  %v3123_v8 = vmul.f32 %v3119_v50, %v3067_v46  ;;  %v5896_v63 = vmov -1.0   ;;  %v3050_v51 = vmul.f32 0.5, %v7156_v37 }
 0xfb4   : > { %5132 = vrcp.f32 %v3076_v45  ;;  %v3127_v4 = vmul.f32 1.442695, %v3122_v60  ;;  %v3131_v7 = vmul.f32 1.442695, %v3124_v55  ;;  %v3125_v14 = vmul.f32 1.442695, %v3121_v5 }
 0xfb5   : > { %5134 = vrcp.f32 %v3073_v47  ;;  %v3129_v18 = vmul.f32 1.442695, %v3123_v8  ;;  %v3062_v55 = vsel %vm3058_vm12, 1.0, %v5896_v63  ;;  %v3064_v50 = vsel %vm3060_vm13, 1.0, %v5896_v63 }
 0xfb6   : > { %5136 = vrcp.f32 %v3075_v48  ;;  %vm3059_vm15 = vcmp.ge.f32.partialorder %v7177_v40, 0.0  ;;  %v3049_v37 = vmul.f32 0.5, %v7160_v31 }
 0xfb7   : > { %5138 = vpow2.f32 %v3127_v4 }
 0xfb8   : > { %5140 = vpow2.f32 %v3131_v7 }
 0xfb9   : > { %5142 = vpow2.f32 %v3125_v14 }
 0xfba   : > { %5144 = vpow2.f32 %v3129_v18 }
 0xfc0   : > { %v5131_v62 = vpop.eup %5130 }
 0xfc1   : > { %v5133_v0 = vpop.eup %5132  ;;  %v3082_v1 = vmul.f32 1.0614054, %v5131_v62 }
 0xfc2   : > { %v3084_v6 = vmul.f32 1.0614054, %v5133_v0  ;;  %v5135_v10 = vpop.eup %5134 }
 0xfc3   : > { %v3086_v9 = vadd.f32 -1.4531521, %v3082_v1  ;;  %v3081_v13 = vmul.f32 1.0614054, %v5135_v10  ;;  %v5137_v15 = vpop.eup %5136 }
 0xfc4   : > { %v3088_v11 = vadd.f32 -1.4531521, %v3084_v6  ;;  %v3083_v61 = vmul.f32 1.0614054, %v5137_v15  ;;  %v5139_v2 = vpop.eup %5138 }
 0xfc5   : > { %v3090_v12 = vmul.f32 %v5131_v62, %v3086_v9  ;;  %v3085_v21 = vadd.f32 -1.4531521, %v3081_v13  ;;  %v5141_v43 = vpop.eup %5140  ;;  %v3052_v9 = vmul.f32 0.5, %v7158_v39 }
 0xfc6   : > { %v3092_v16 = vmul.f32 %v5133_v0, %v3088_v11  ;;  %v3087_v52 = vadd.f32 -1.4531521, %v3083_v61  ;;  %v5143_v60 = vpop.eup %5142  ;;  %v3061_v11 = vsel %vm3057_vm14, 1.0, %v5896_v63  ;;  %v3051_v61 = vmul.f32 0.5, %v7162_v56 }
 0xfc7   : > { %v3094_v20 = vadd.f32 1.4214138, %v3090_v12  ;;  %v3089_v26 = vmul.f32 %v5135_v10, %v3085_v21  ;;  %v5145_v4 = vpop.eup %5144 }
 0xfc8   : > { %v3096_v22 = vadd.f32 1.4214138, %v3092_v16  ;;  %v3091_v38 = vmul.f32 %v5137_v15, %v3087_v52  ;;  %v3221_v52 = vld [vmem:[#allocation30] sm:$0x3] }
 0xfc9   : > { %v3098_v24 = vmul.f32 %v5131_v62, %v3094_v20  ;;  %v3093_v27 = vadd.f32 1.4214138, %v3089_v26 }
 0xfca   : > { %v3100_v44 = vmul.f32 %v5133_v0, %v3096_v22  ;;  %v3095_v32 = vadd.f32 1.4214138, %v3091_v38 }
 0xfcb   : > { %v3102_v23 = vadd.f32 -0.28449672, %v3098_v24  ;;  %v3097_v30 = vmul.f32 %v5135_v10, %v3093_v27 }
 0xfcc   : > { %v3104_v41 = vadd.f32 -0.28449672, %v3100_v44  ;;  %v3099_v35 = vmul.f32 %v5137_v15, %v3095_v32  ;;  %v3226_v44 = vrot.slane %v3221_v52, %v6916_v25 }
 0xfcd   : > { %v3106_v28 = vmul.f32 %v5131_v62, %v3102_v23  ;;  %v3101_v34 = vadd.f32 -0.28449672, %v3097_v30  ;;  %v3230_v23 = vrot.slane %v3221_v52, %v6913_v53 }
 0xfce   : > { %v3108_v33 = vmul.f32 %v5133_v0, %v3104_v41  ;;  %v3103_v42 = vadd.f32 -0.28449672, %v3099_v35 }
 0xfcf   : > { %v3110_v17 = vadd.f32 0.2548296, %v3106_v28  ;;  %v3105_v36 = vmul.f32 %v5135_v10, %v3101_v34 }
 0xfd0   : > { %v3112_v57 = vadd.f32 0.2548296, %v3108_v33  ;;  %v3107_v47 = vmul.f32 %v5137_v15, %v3103_v42 }
 0xfd1   : > { %v3114_v58 = vmul.f32 %v5131_v62, %v3110_v17  ;;  %v3109_v46 = vadd.f32 0.2548296, %v3105_v36 }
 0xfd2   : > { %v3116_v19 = vmul.f32 %v5133_v0, %v3112_v57  ;;  %v3111_v59 = vadd.f32 0.2548296, %v3107_v47 }
 0xfd3   : > { %v3134_v45 = vmul.f32 %v5139_v2, %v3114_v58  ;;  %v3113_v49 = vmul.f32 %v5135_v10, %v3109_v46 }
 0xfd4   : > { %v3136_v3 = vmul.f32 %v5141_v43, %v3116_v19  ;;  %v3115_v0 = vmul.f32 %v5137_v15, %v3111_v59  ;;  %v3063_v15 = vsel %vm3059_vm15, 1.0, %v5896_v63  ;;  %v5109_v59 = vld [vmem:[#allocation35 + $0x38] sm:$0xff]  }
 0xfd5   : > { %v3138_v48 = vsub.f32 1.0, %v3134_v45  ;;  %v3133_v54 = vmul.f32 %v5143_v60, %v3113_v49  ;;  %v5108_v49 = vld [vmem:[#allocation35 + $0x78] sm:$0xff]   ;;  %v5110_v60 = vld [vmem:[#allocation35 + $0x70] sm:$0xff]  }
 0xfd6   : > { %v3140_v62 = vsub.f32 1.0, %v3136_v3  ;;  %v3135_v8 = vmul.f32 %v5145_v4, %v3115_v0  ;;  %4521 = vmatprep.subr.bf16.mxu0 %v5108_v49  ;;  %v5116_v0 = vld [vmem:[#allocation35 + $0x58] sm:$0xff]  }
 0xfd7   : > { %v3142_v1 = vmul.f32 %v3138_v48, %v3062_v55  ;;  %v3137_v7 = vsub.f32 1.0, %v3133_v54  ;;  %v5111_v55 = vld [vmem:[#allocation35 + $0x30] sm:$0xff]   ;;  %v5115_v54 = vld [vmem:[#allocation35 + $0x20] sm:$0xff]   ;;  %v5117_v4 = vld [vmem:[#allocation35 + $0x18] sm:$0xff]  }
 0xfd8   : > { %v3144_v5 = vmul.f32 %v3140_v62, %v3064_v50  ;;  %v3139_v14 = vsub.f32 1.0, %v3135_v8  ;;  %v5112_v50 = vld [vmem:[#allocation35 + $0x68] sm:$0xff]   ;;  %v5122_v8 = vld [vmem:[#allocation35 + $0x40] sm:$0xff]  }
 0xfd9   : > { %v3146_v6 = vadd.f32 1.0, %v3142_v1  ;;  %v3141_v13 = vmul.f32 %v3137_v7, %v3061_v11  ;;  %v5113_v62 = vld [vmem:[#allocation35 + $0x28] sm:$0xff]   ;;  %v5114_v1 = vld [vmem:[#allocation35 + $0x60] sm:$0xff]  }
 0xfda   : > { %v3148_v10 = vadd.f32 1.0, %v3144_v5  ;;  %v3143_v20 = vmul.f32 %v3139_v14, %v3063_v15  ;;  %v5119_v5 = vld [vmem:[#allocation35 + $0x10] sm:$0xff]   ;;  %v5121_v7 = vld [vmem:[#allocation35 + $0x8] sm:$0xff]   ;;  %v3636_v14 = vld [vmem:[#allocation33] sm:$0x3] }
 0xfdb   : > { %v3150_v12 = vmul.f32 %v3146_v6, %v3050_v51  ;;  %v3145_v18 = vadd.f32 1.0, %v3141_v13  ;;  %v5118_v51 = vld [vmem:[#allocation35 + $0x50] sm:$0xff]   ;;  %v5120_v6 = vld [vmem:[#allocation35 + $0x48] sm:$0xff]   ;;  %v3635_v13 = vld [vmem:[#allocation32] sm:$0x3] }
 0xfdc   : > { %v3152_v29 = vmul.f32 %v3148_v10, %v3052_v9  ;;  %v3147_v39 = vadd.f32 1.0, %v3143_v20  ;;  %v5123_v9 = vld [vmem:[#allocation35] sm:$0xff]   ;;  %v3666_v15 = vrot.slane %v3635_v13, %v6913_v53  ;;  %v3675_v20 = vrot.slane %v3636_v14, %v6916_v25 }
 0xfdd   : > { %v3154_v16 = vpack.c.bf16 %v3150_v12, %v3150_v12  ;;  %v3149_v40 = vmul.f32 %v3145_v18, %v3049_v37 }
 0xfde   : > { %v3156_v21 = vpack.c.bf16 %v3152_v29, %v3152_v29  ;;  %v3151_v24 = vmul.f32 %v3147_v39, %v3051_v61  ;;  %v3662_v29 = vrot.slane %v3635_v13, %v6916_v25 }
 0xfdf   : > { %3585 = vmatprep.mubr.bf16.mxu0 %v3154_v16  ;;  %v3153_v22 = vpack.c.bf16 %v3149_v40, %v3149_v40 }
 0xfe0   : > { %3626 = vmatprep.mubr.bf16.mxu1 %v3156_v21  ;;  %v3155_v26 = vpack.c.bf16 %v3151_v24, %v3151_v24  ;;  %v3679_v21 = vrot.slane %v3636_v14, %v6913_v53 }
 0xfe1   : > { %3586 = vmatmul.mubr.bf16.vlgmr.msra.gmra.mxu0 %v3153_v22 }
 0xfe2   : > { %3627 = vmatmul.mubr.bf16.vlgmr.msra.gmra.mxu1 %v3155_v26  ;;  %4522 = vmatpush3.bf16.msra.mxu0 %v5109_v59 }
 0xfe3   : > { %4523 = vmatprep.subr.bf16.mxu0 %v5110_v60 }
 0xfe6   : > { %4524 = vmatpush3.bf16.msra.mxu0 %v5111_v55 }
 0xfe7   : > { %4525 = vmatprep.subr.bf16.mxu0 %v5112_v50 }
 0xfea   : > { %4526 = vmatpush3.bf16.msra.mxu0 %v5113_v62 }
 0xfeb   : > { %4527 = vmatprep.subr.bf16.mxu0 %v5114_v1 }
 0xfee   : > { %4528 = vmatpush3.bf16.msra.mxu0 %v5115_v54 }
 0xfef   : > { %4529 = vmatprep.subr.bf16.mxu0 %v5116_v0 }
 0xff2   : > { %4530 = vmatpush3.bf16.msra.mxu0 %v5117_v4 }
 0xff3   : > { %4531 = vmatprep.subr.bf16.mxu0 %v5118_v51 }
 0xff6   : > { %4532 = vmatpush3.bf16.msra.mxu0 %v5119_v5 }
 0xff7   : > { %4533 = vmatprep.subr.bf16.mxu0 %v5120_v6 }
 0xffa   : > { %4534 = vmatpush3.bf16.msra.mxu0 %v5121_v7 }
 0xffb   : > { %4535 = vmatprep.subr.bf16.mxu0 %v5122_v8 }
 0xffe   : > { %4536 = vmatpush3.bf16.msra.mxu0 %v5123_v9 }
0x10a1   : > { %v3587_v31 = vpop.f32.mrf.mxu0 }
0x10a2   : > { %v3588_v27 = vadd.f32 %v3587_v31, %v3226_v44  ;;  %v3628_v38 = vpop.f32.mrf.mxu1 }
0x10a3   : > { %v3589_v41 = vpop.f32.mrf.mxu0 }
0x10a4   : > { %v3629_v28 = vadd.f32 %v3628_v38, %v3588_v27  ;;  %v3590_v30 = vadd.f32 %v3589_v41, %v3230_v23  ;;  %v3630_v32 = vpop.f32.mrf.mxu1 }
0x10a5   : > { %v3591_v56 = vpop.f32.mrf.mxu0 }
0x10a6   : > { %v3631_v33 = vadd.f32 %v3630_v32, %v3590_v30  ;;  %v3632_v17 = vpop.f32.mrf.mxu1  ;;  %v3637_v35 = vsel %vm2963_vm11, %v3629_v28, 0.0 }
0x10a7   : > { %v3592_v34 = vpop.f32.mrf.mxu0 }
0x10a8   : > { %v3638_v57 = vsel %vm2963_vm11, %v3631_v33, 0.0  ;;  %v3633_v58 = vpop.f32.mrf.mxu1 }
0x10a9   : > { %v3639_v36 = vadd.f32 %v3638_v57, %v3637_v35 }
0x10ab   : > { %3640 = vadd.xlane.f32.xlu1 %v3639_v36 }
0x1134   : > { %v3641_v42 = vpop.xlane.xlu1 %3640 }
0x1135   : > { %v3643_v2 = vmul.f32 0.00390625, %v3641_v42 }
0x1137   : > { %v3644_v19 = vsub.f32 %v3629_v28, %v3643_v2  ;;  %v3645_v43 = vsub.f32 %v3631_v33, %v3643_v2 }
0x1139   : > { %v3646_v45 = vmul.f32 %v3644_v19, %v3644_v19  ;;  %v3647_v46 = vmul.f32 %v3645_v43, %v3645_v43 }
0x113b   : > { %v3648_v47 = vsel %vm2963_vm11, %v3646_v45, 0.0  ;;  %v3649_v3 = vsel %vm2963_vm11, %v3647_v46, 0.0 }
0x113c   : > { %v3650_v48 = vadd.f32 %v3649_v3, %v3648_v47 }
0x113e   : > { %3651 = vadd.xlane.f32.xlu1 %v3650_v48 }
0x11c7   : > { %v3652_v10 = vpop.xlane.xlu1 %3651 }
0x11c8   : > { %v3653_v11 = vmul.f32 0.00390625, %v3652_v10 }
0x11ca   : > { %v3654_v12 = vadd.f32 1e-05, %v3653_v11 }
0x11cc   : > { %5146 = vrsqrt.f32 %v3654_v12 }
0x11d9   : > { %v5147_v16 = vpop.eup %5146 }
0x11da   : > { %v3656_v37 = vmul.f32 %v5147_v16, %v3644_v19  ;;  %v3657_v18 = vmul.f32 %v5147_v16, %v3645_v43 }
0x11dc   : > { %v3670_v40 = vmul.f32 %v3666_v15, %v3657_v18  ;;  %v3669_v61 = vmul.f32 %v3662_v29, %v3656_v37  ;;  %v4446_v15 = vld [vmem:[#allocation36] ss:$0 sm:$0xff] }
0x11de   : > { %v3683_v39 = vadd.f32 %v3679_v21, %v3670_v40  ;;  %v3682_v22 = vadd.f32 %v3675_v20, %v3669_v61 }
0x11e0   : > { %v3687_v24 = vmul.f32 0.70710677, %v3683_v39  ;;  %v3686_v26 = vmul.f32 0.70710677, %v3682_v22  ;;  %v3685_v7 = vmul.f32 0.5, %v3683_v39  ;;  %v3684_v9 = vmul.f32 0.5, %v3682_v22 }
0x11e2   : > { %v3693_v52 = vand.u32 2147483647, %v3687_v24  ;;  %v3692_v44 = vand.u32 2147483647, %v3686_v26  ;;  %vm3689_vm0 = vcmp.ge.f32.partialorder %v3687_v24, 0.0  ;;  %vm3688_vm1 = vcmp.ge.f32.partialorder %v3686_v26, 0.0 }
0x11e3   : > { %v3691_v0 = vsel %vm3689_vm0, 1.0, %v5896_v63  ;;  %v3690_v5 = vsel %vm3688_vm1, 1.0, %v5896_v63 }
0x11e4   : > { %v3695_v23 = vmul.f32 0.3275911, %v3693_v52  ;;  %v3694_v31 = vmul.f32 0.3275911, %v3692_v44  ;;  %v3719_v41 = vsub.f32 0.0, %v3693_v52  ;;  %v3718_v28 = vsub.f32 0.0, %v3692_v44 }
0x11e6   : > { %v3697_v27 = vadd.f32 1.0, %v3695_v23  ;;  %v3696_v38 = vadd.f32 1.0, %v3694_v31  ;;  %v3721_v30 = vmul.f32 %v3719_v41, %v3693_v52  ;;  %v3720_v25 = vmul.f32 %v3718_v28, %v3692_v44 }
0x11e8   : > { %5148 = vrcp.f32 %v3697_v27  ;;  %v3724_v33 = vmul.f32 1.442695, %v3721_v30  ;;  %v3722_v34 = vmul.f32 1.442695, %v3720_v25 }
0x11e9   : > { %5150 = vrcp.f32 %v3696_v38 }
0x11ea   : > { %5152 = vpow2.f32 %v3724_v33 }
0x11eb   : > { %5154 = vpow2.f32 %v3722_v34 }
0x11f5   : > { %v5149_v32 = vpop.eup %5148 }
0x11f6   : > { %v5151_v53 = vpop.eup %5150  ;;  %v3701_v56 = vmul.f32 1.0614054, %v5149_v32 }
0x11f7   : > { %v3700_v17 = vmul.f32 1.0614054, %v5151_v53  ;;  %v5153_v60 = vpop.eup %5152 }
0x11f8   : > { %v3703_v35 = vadd.f32 -1.4531521, %v3701_v56  ;;  %v5155_v50 = vpop.eup %5154 }
0x11f9   : > { %v3702_v57 = vadd.f32 -1.4531521, %v3700_v17 }
0x11fa   : > { %v3705_v58 = vmul.f32 %v5149_v32, %v3703_v35 }
0x11fb   : > { %v3704_v36 = vmul.f32 %v5151_v53, %v3702_v57 }
0x11fc   : > { %v3707_v42 = vadd.f32 1.4214138, %v3705_v58 }
0x11fd   : > { %v3706_v2 = vadd.f32 1.4214138, %v3704_v36 }
0x11fe   : > { %v3709_v19 = vmul.f32 %v5149_v32, %v3707_v42 }
0x11ff   : > { %v3708_v43 = vmul.f32 %v5151_v53, %v3706_v2 }
0x1200   : > { %v3711_v45 = vadd.f32 -0.28449672, %v3709_v19 }
0x1201   : > { %v3710_v46 = vadd.f32 -0.28449672, %v3708_v43 }
0x1202   : > { %v3713_v47 = vmul.f32 %v5149_v32, %v3711_v45 }
0x1203   : > { %v3712_v3 = vmul.f32 %v5151_v53, %v3710_v46 }
0x1204   : > { %v3715_v48 = vadd.f32 0.2548296, %v3713_v47 }
0x1205   : > { %v3714_v49 = vadd.f32 0.2548296, %v3712_v3 }
0x1206   : > { %v3717_v59 = vmul.f32 %v5149_v32, %v3715_v48 }
0x1207   : > { %v3716_v55 = vmul.f32 %v5151_v53, %v3714_v49 }
0x1208   : > { %v3727_v62 = vmul.f32 %v5153_v60, %v3717_v59 }
0x1209   : > { %v3726_v1 = vmul.f32 %v5155_v50, %v3716_v55 }
0x120a   : > { %v3729_v54 = vsub.f32 1.0, %v3727_v62 }
0x120b   : > { %v3728_v4 = vsub.f32 1.0, %v3726_v1 }
0x120c   : > { %v3731_v51 = vmul.f32 %v3729_v54, %v3691_v0 }
0x120d   : > { %v3730_v6 = vmul.f32 %v3728_v4, %v3690_v5 }
0x120e   : > { %v3733_v8 = vadd.f32 1.0, %v3731_v51 }
0x120f   : > { %v3732_v10 = vadd.f32 1.0, %v3730_v6 }
0x1210   : > { %v3735_v11 = vmul.f32 %v3733_v8, %v3685_v7 }
0x1211   : > { %v3734_v12 = vmul.f32 %v3732_v10, %v3684_v9 }
0x1212   : > { %v3737_v13 = vpack.c.bf16 %v3735_v11, %v3735_v11 }
0x1213   : > { %v3736_v14 = vpack.c.bf16 %v3734_v12, %v3734_v12 }
0x1214   : > { %3905 = vmatprep.mubr.bf16.mxu0 %v3737_v13 }
0x1215   : > { %3906 = vmatmul.mubr.bf16.vlgmr.msra.gmra.mxu0 %v3736_v14 }
0x12d5   : > { %v4537_v29 = vpop.f32.mrf.mxu0 }
0x12d7   : > { %v4538_v16 = vpop.f32.mrf.mxu0 }
0x12d8   : > { %v4539_v37 = vadd.f32 %v4538_v16, %v4537_v29 }
0x12d9   : > { %v4540_v18 = vpop.f32.mrf.mxu0 }
0x12da   : > { %v3908_v20 = vadd.f32 %v4539_v37, %v4446_v15 }
0x12db   : > { %v4541_v21 = vpop.f32.mrf.mxu0 }
0x12dc   : > { %3913 = vst [vmem:[#allocation38] sm:$0x3] %v3908_v20 }
0x12dd PF: > { %s7394_s16 = sld [smem:[#allocation53_spill]]  ;;  %s5897_s28 = smov [#allocation38]  }
0x12de   : > { %s3921_s11 = sshll.u32 %s5897_s28, 4  ;;  %s3922_s11 = int_to_ptr.vmem [resolvable:$true] %s3921_s11 }
0x12df   : > { %s5750_s15 = scalar_lea.vmem %s3922_s11, 32  ;;  %p5757_p13 = scmp.lt.s32.totalorder %s3922_s11, %s3922_s11 }
0x12e0   : > { %p5751_p1 = scmp.ne.s32.totalorder %s3922_s11, %s5750_s15  ;;  %p5758_p0 = scmp.lt.s32.totalorder %s5750_s15, %s5750_s15 }
0x12e2   : > { %p5759_p2 = por %p5758_p0, %p5757_p13 }
0x12e3   : > { %p4844_p8 = scmp.eq.s32.totalorder %s7394_s16, 1 }
0x12e5   : > { %p5752_p4 = pnand %p5751_p1, %p4844_p8 }
0x12e7   : > { %p5753_p3 = pneg %p5752_p4 }
0x12e9   : > { %p5760_p11 = pnand %p5759_p2, %p5753_p3 }
0x12eb   : > { %5763 = shalt.err (!%p5760_p11)
}
0x12ec   : > { %s7395_s0 = sld [smem:[#allocation81_spill]] }
0x12f2   : > { %4750 = dma.vmem_to_hbm [thread:$0]  (%p4844_p8), %s3922_s11, 32, %s7395_s0, [#allocation5]  }
0x12f3   : > { %5839 = dma.done.wait (%p4844_p8), [#allocation5], 32  }
0x12f4   : > { %5841 = vsyncadd (%p4844_p8), [#allocation5], 4294967264 }
0x12f5 PF: > { %s7396_s28 = sld [smem:[#allocation54_spill]]  ;;  %s7399_s27 = smov %s5848_s3 }
0x12f6   : > { %s7397_s1 = sld [smem:[#allocation52_spill]] }
0x12f7   : > { %s7398_s7 = sld [smem:[#allocation55_spill]] }
0x12fb   : > { %p58_p12 = scmp.ge.s32.totalorder %s7396_s28, 4  }
0x12fc   : > { %s7400_s3 = smov %s7397_s1 }
0x12fd   :  { %60 = sbr.rel (!%p58_p12) target bundleno = 47 (0x2f), region = 336 }
0x1302   :  { %3934 = vsyncpa [#allocation4], 1 }
0x1303   :  { %3936 = vsyncpa [#allocation4 + $0x1], 1 }
0x1304   :  { %3937 = vsyncpa [#allocation7], 1 }
0x1305   :  { %3939 = vsyncpa [#allocation7 + $0x1], 1 }
0x1306   :  { %3940 = vsyncpa [#allocation10], 1 }
0x1307   :  { %3942 = vsyncpa [#allocation10 + $0x1], 1 }
0x1308   :  { %3943 = vsyncpa [#allocation13], 1 }
0x1309   :  { %3945 = vsyncpa [#allocation13 + $0x1], 1 }
0x130a   :  { %3946 = vsyncpa [#allocation16], 1 }
0x130b   :  { %3948 = vsyncpa [#allocation16 + $0x1], 1 }
0x130c   :  { %3949 = vsyncpa [#allocation19], 1 }
0x130d   :  { %3951 = vsyncpa [#allocation19 + $0x1], 1 }
0x130e   :  { %3952 = vsyncpa [#allocation22], 1 }
0x130f   :  { %3953 = vsyncpa [#allocation25], 1 }
0x1310   :  { %3954 = vsyncpa [#allocation28], 1 }
0x1311   :  { %3955 = vsyncpa [#allocation31], 1 }
0x1312   :  { %3956 = vsyncpa [#allocation34], 1 }
0x1313   :  { %3957 = vsyncpa [#allocation37], 1 }
0x1314   :  { %3958 = vsyncpa [#allocation5], 1 }
0x1315   :  { %3960 = vsyncpa [#allocation5 + $0x1], 1 }

</bundles_post_ra>
